<compile_context>
chip_gen: v6e
topology: v6e:2x2x1
jax: 0.10.0
libtpu: 0.0.40
codegen_flags: <defaults>
</compile_context>

<pallas_src>
import functools

import jax
import jax.numpy as jnp
from jax.experimental import pallas as pl
from jax.experimental.pallas import tpu as pltpu


def _round_up(x, m):
    return (x + m - 1) // m * m


def _ensemble_kernel(offsets, row_chunk, n_chunks, wp,
                     x_ref, w_ref, b_ref, mask_ref, wc_ref, bc_ref, o_ref):
    # One grid step == one image.
    #   x_ref   : (C_in, S_in)      bf16  zero-padded, flattened image (B squeezed)
    #   w_ref   : (9, F_pad, C_in)  bf16  one (F_pad, C_in) tap matrix per 3x3 offset
    #   b_ref   : (F_pad, 1)        f32   conv biases (zeros in padded lanes)
    #   mask_ref: (1, H*Wp)         f32   1/(H*W) on valid output columns, 0 elsewhere
    #   wc_ref  : (F_pad, 1)        f32   classifier weight (zeros in padded lanes)
    #   bc_ref  : (1, 1)            f32   classifier bias
    #   o_ref   : (B, 1)            f32   logits; resident across the sequential grid
    f_pad = w_ref.shape[1]
    s_c = row_chunk * wp                      # columns per in-kernel chunk

    pooled = jnp.zeros((f_pad, 1), jnp.float32)
    for ci in range(n_chunks):                # static, unrolled
        p0 = ci * s_c
        # conv3x3 over ALL ensemble members: 9 shifted-view matmuls (in-kernel
        # im2col), bf16 operands, f32 accumulation on the MXU.
        z = jnp.zeros((f_pad, s_c), jnp.float32)
        for o, off in enumerate(offsets):
            xs = x_ref[:, pl.ds(p0 + off, s_c)]                     # (C_in, s_c) bf16
            z = z + jnp.dot(w_ref[o], xs, preferred_element_type=jnp.float32)
        # bias + ReLU in f32, then fold in the valid-column mask * 1/(H*W) and
        # reduce over lanes -> partial global-average-pool.
        z = jnp.maximum(z + b_ref[...], 0.0)
        z = z * mask_ref[:, pl.ds(p0, s_c)]
        pooled = pooled + jnp.sum(z, axis=1, keepdims=True)         # (F_pad, 1)

    # Linear(F, 1): elementwise * + sublane reduction (never an N=1 MXU matmul).
    logit = jnp.sum(pooled * wc_ref[...], axis=0, keepdims=True) + bc_ref[...]
    b_idx = pl.program_id(0)
    o_ref[pl.ds(b_idx, 1), :] = logit


def _choose_row_chunk(h, wp, max_cols=256):
    """Largest divisor rc of h with rc*wp <= max_cols (keeps the f32 (128, rc*wp)
    intermediate comfortably inside the vreg file)."""
    best = 1
    for rc in range(1, h + 1):
        if h % rc == 0 and rc * wp <= max_cols:
            best = rc
    return best


def ensemble_forward(x, conv_weights4, conv_biases, cls_weight, cls_bias,
                     *, row_chunk=None):
    """Ensemble forward pass.

    conv_weights4[m]: (C_m, C_in, 3, 3) OIHW conv weight of model m's stem.
    conv_biases[m]  : (C_m,)            conv bias of model m's stem.
    cls_weight      : (sum_m C_m, 1)    classifier weight (transposed).
    cls_bias        : (1, 1)            classifier bias.
    """
    B, C_in, H, W = x.shape
    hp, wp = H + 2, W + 2
    s_out = H * wp                      # output columns per image (incl. 2 pad cols/row)
    max_off = 2 * wp + 2                # largest static shift (dy=2, dx=2)
    s_in = _round_up(s_out + max_off, 128)
    f_total = cls_weight.shape[0]
    f_pad = _round_up(f_total, 128)

    # ---- host-side packing (just a zero pad + flatten of x; no im2col) -----
    xp = jnp.pad(x, ((0, 0), (0, 0), (1, 1), (1, 1)))               # (B, C_in, Hp, Wp)
    x_flat = xp.reshape(B, C_in, hp * wp)
    x_flat = jnp.pad(x_flat, ((0, 0), (0, 0), (0, s_in - hp * wp)))
    x_flat = x_flat.astype(jnp.bfloat16)                            # (B, C_in, S_in)

    w_cat = jnp.concatenate(conv_weights4, axis=0)                  # (F, C_in, 3, 3)
    w_all = jnp.transpose(w_cat, (2, 3, 0, 1)).reshape(9, f_total, C_in)
    w_all = jnp.pad(w_all, ((0, 0), (0, f_pad - f_total), (0, 0))).astype(jnp.bfloat16)

    b_all = jnp.concatenate([b.reshape(-1) for b in conv_biases], axis=0)
    b_all = jnp.pad(b_all, (0, f_pad - f_total)).astype(jnp.float32).reshape(f_pad, 1)

    wc = jnp.pad(cls_weight.reshape(f_total, 1),
                 ((0, f_pad - f_total), (0, 0))).astype(jnp.float32)  # zero-padded lanes
    bc = cls_bias.reshape(1, 1).astype(jnp.float32)

    cols = jnp.arange(s_out) % wp
    mask = jnp.where(cols < W, 1.0 / (H * W), 0.0).astype(jnp.float32).reshape(1, s_out)

    if row_chunk is None:
        row_chunk = _choose_row_chunk(H, wp)
    assert H % row_chunk == 0, (H, row_chunk)
    n_chunks = H // row_chunk
    offsets = tuple(dy * wp + dx for dy in range(3) for dx in range(3))

    kernel = functools.partial(_ensemble_kernel, offsets, row_chunk, n_chunks, wp)
    return pl.pallas_call(
        kernel,
        out_shape=jax.ShapeDtypeStruct((B, 1), jnp.float32),
        grid=(B,),
        in_specs=[
            pl.BlockSpec((None, C_in, s_in), lambda b: (b, 0, 0)),   # one image / step
            pl.BlockSpec((9, f_pad, C_in), lambda b: (0, 0, 0)),     # conv taps (resident)
            pl.BlockSpec((f_pad, 1), lambda b: (0, 0)),              # conv bias (resident)
            pl.BlockSpec((1, s_out), lambda b: (0, 0)),              # pool mask (resident)
            pl.BlockSpec((f_pad, 1), lambda b: (0, 0)),              # classifier w (resident)
            pl.BlockSpec((1, 1), lambda b: (0, 0)),                  # classifier b (resident)
        ],
        out_specs=pl.BlockSpec((B, 1), lambda b: (0, 0)),            # full resident block
        compiler_params=pltpu.CompilerParams(
            dimension_semantics=("arbitrary",),      # resident output block -> sequential
            vmem_limit_bytes=32 * 1024 * 1024,       # safe on v5e/v6e/v7x (64 MiB)
        ),
    )(x_flat, w_all, b_all, mask, wc, bc)


def ensemble_reference(x, conv_weights4, conv_biases, cls_weight, cls_bias):
    """Pure-JAX reference (lax.conv).  Conv operands bf16-rounded to mirror the
    kernel's bf16 MXU inputs; accumulation stays f32 in both."""
    xq = x.astype(jnp.bfloat16).astype(jnp.float32)
    feats = []
    for w4, b in zip(conv_weights4, conv_biases):
        wq = w4.astype(jnp.bfloat16).astype(jnp.float32)
        y = jax.lax.conv_general_dilated(
            xq, wq, window_strides=(1, 1), padding="SAME",
            dimension_numbers=("NCHW", "OIHW", "NCHW"))
        y = jnp.maximum(y + b.reshape(1, -1, 1, 1), 0.0)
        feats.append(jnp.mean(y, axis=(2, 3)))                        # (B, C_m)
    f = jnp.concatenate(feats, axis=1)
    return f @ cls_weight + cls_bias


if __name__ == "__main__":
    B, C_in, H, W = 2, 4, 16, 16
    feat_dims = (32, 48)                       # model.fc.in_features per ensemble member
    F_total = sum(feat_dims)                   # classifier = Linear(F_total, 1)

    key = jax.random.PRNGKey(0)
    keys = jax.random.split(key, 2 + 2 * len(feat_dims) + 2)

    x = jax.random.normal(keys[0], (B, C_in, H, W), dtype=jnp.float32)

    conv_weights4, conv_biases = [], []
    for m, c_m in enumerate(feat_dims):
        w4 = 0.1 * jax.random.normal(keys[2 + 2 * m], (c_m, C_in, 3, 3),
                                     dtype=jnp.float32)               # OIHW
        b = 0.1 * jax.random.normal(keys[3 + 2 * m], (c_m,), dtype=jnp.float32)
        conv_weights4.append(w4)
        conv_biases.append(b)

    cls_weight = 0.1 * jax.random.normal(keys[-2], (F_total, 1), dtype=jnp.float32)
    cls_bias = 0.1 * jax.random.normal(keys[-1], (1, 1), dtype=jnp.float32)

    out = ensemble_forward(x, conv_weights4, conv_biases, cls_weight, cls_bias)
    out = jax.block_until_ready(out)

    ref = ensemble_reference(x, conv_weights4, conv_biases, cls_weight, cls_bias)
    assert out.shape == (B, 1), out.shape
    assert jnp.allclose(out, ref, atol=5e-3, rtol=5e-3), (out, ref)

    print("KERNEL_OK")
</pallas_src>

<mosaic_0001>
module attributes {stable_mosaic.version = 11 : i64} {
  func.func @_ensemble_kernel(%arg0: i32, %arg1: memref<1x4x384xbf16, #tpu.memory_space<vmem>>, %arg2: memref<9x128x4xbf16, #tpu.memory_space<vmem>>, %arg3: memref<128x1xf32, #tpu.memory_space<vmem>>, %arg4: memref<1x288xf32, #tpu.memory_space<vmem>>, %arg5: memref<128x1xf32, #tpu.memory_space<vmem>>, %arg6: memref<1x1xf32, #tpu.memory_space<vmem>>, %arg7: memref<2x1xf32, #tpu.memory_space<vmem>>) attributes {dimension_semantics = [#tpu.dimension_semantics<arbitrary>], iteration_bounds = array<i64: 2>, scalar_prefetch = 0 : i64, scratch_operands = 0 : i64, tpu.core_type = #tpu.core_type<tc>, window_params = [{transform_indices = @transform_0, window_bounds = array<i64: 1, 4, 384>}, {pipeline_mode = #tpu.pipeline_mode<synchronous>, transform_indices = @transform_1, window_bounds = array<i64: 9, 128, 4>}, {pipeline_mode = #tpu.pipeline_mode<synchronous>, transform_indices = @transform_2, window_bounds = array<i64: 128, 1>}, {pipeline_mode = #tpu.pipeline_mode<synchronous>, transform_indices = @transform_3, window_bounds = array<i64: 1, 288>}, {pipeline_mode = #tpu.pipeline_mode<synchronous>, transform_indices = @transform_4, window_bounds = array<i64: 128, 1>}, {pipeline_mode = #tpu.pipeline_mode<synchronous>, transform_indices = @transform_5, window_bounds = array<i64: 1, 1>}, {pipeline_mode = #tpu.pipeline_mode<synchronous>, transform_indices = @transform_6, window_bounds = array<i64: 2, 1>}]} {
    %cst = arith.constant 0.000000e+00 : f32
    %0 = vector.broadcast %cst : f32 to vector<128x1xf32>
    %cst_0 = arith.constant 0.000000e+00 : f32
    %1 = vector.broadcast %cst_0 : f32 to vector<128x144xf32>
    %c0 = arith.constant 0 : index
    %c0_1 = arith.constant 0 : index
    %c0_2 = arith.constant 0 : index
    %2 = vector.load %arg1[%c0, %c0_1, %c0_2] : memref<1x4x384xbf16, #tpu.memory_space<vmem>>, vector<1x4x144xbf16>
    %3 = vector.shape_cast %2 : vector<1x4x144xbf16> to vector<4x144xbf16>
    %c0_3 = arith.constant 0 : index
    %c0_4 = arith.constant 0 : index
    %c0_5 = arith.constant 0 : index
    %4 = vector.load %arg2[%c0_3, %c0_4, %c0_5] : memref<9x128x4xbf16, #tpu.memory_space<vmem>>, vector<1x128x4xbf16>
    %5 = vector.shape_cast %4 : vector<1x128x4xbf16> to vector<128x4xbf16>
    %cst_6 = arith.constant dense<0.000000e+00> : vector<128x144xf32>
    %6 = tpu.matmul %5, %3, %cst_6 {dimension_numbers = #tpu.dot_dimension_numbers<[1], [0], [0], [1], [0, 0, 1, 1], [], []>} : vector<128x4xbf16>, vector<4x144xbf16>, vector<128x144xf32> -> vector<128x144xf32>
    %7 = arith.addf %1, %6 : vector<128x144xf32>
    %c0_7 = arith.constant 0 : index
    %c0_8 = arith.constant 0 : index
    %c1 = arith.constant 1 : index
    %8 = vector.load %arg1[%c0_7, %c0_8, %c1] : memref<1x4x384xbf16, #tpu.memory_space<vmem>>, vector<1x4x144xbf16>
    %9 = vector.shape_cast %8 : vector<1x4x144xbf16> to vector<4x144xbf16>
    %c1_9 = arith.constant 1 : index
    %c0_10 = arith.constant 0 : index
    %c0_11 = arith.constant 0 : index
    %10 = vector.load %arg2[%c1_9, %c0_10, %c0_11] : memref<9x128x4xbf16, #tpu.memory_space<vmem>>, vector<1x128x4xbf16>
    %11 = vector.shape_cast %10 : vector<1x128x4xbf16> to vector<128x4xbf16>
    %cst_12 = arith.constant dense<0.000000e+00> : vector<128x144xf32>
    %12 = tpu.matmul %11, %9, %cst_12 {dimension_numbers = #tpu.dot_dimension_numbers<[1], [0], [0], [1], [0, 0, 1, 1], [], []>} : vector<128x4xbf16>, vector<4x144xbf16>, vector<128x144xf32> -> vector<128x144xf32>
    %13 = arith.addf %7, %12 : vector<128x144xf32>
    %c0_13 = arith.constant 0 : index
    %c0_14 = arith.constant 0 : index
    %c2 = arith.constant 2 : index
    %14 = vector.load %arg1[%c0_13, %c0_14, %c2] : memref<1x4x384xbf16, #tpu.memory_space<vmem>>, vector<1x4x144xbf16>
    %15 = vector.shape_cast %14 : vector<1x4x144xbf16> to vector<4x144xbf16>
    %c2_15 = arith.constant 2 : index
    %c0_16 = arith.constant 0 : index
    %c0_17 = arith.constant 0 : index
    %16 = vector.load %arg2[%c2_15, %c0_16, %c0_17] : memref<9x128x4xbf16, #tpu.memory_space<vmem>>, vector<1x128x4xbf16>
    %17 = vector.shape_cast %16 : vector<1x128x4xbf16> to vector<128x4xbf16>
    %cst_18 = arith.constant dense<0.000000e+00> : vector<128x144xf32>
    %18 = tpu.matmul %17, %15, %cst_18 {dimension_numbers = #tpu.dot_dimension_numbers<[1], [0], [0], [1], [0, 0, 1, 1], [], []>} : vector<128x4xbf16>, vector<4x144xbf16>, vector<128x144xf32> -> vector<128x144xf32>
    %19 = arith.addf %13, %18 : vector<128x144xf32>
    %c0_19 = arith.constant 0 : index
    %c0_20 = arith.constant 0 : index
    %c18 = arith.constant 18 : index
    %20 = vector.load %arg1[%c0_19, %c0_20, %c18] : memref<1x4x384xbf16, #tpu.memory_space<vmem>>, vector<1x4x144xbf16>
    %21 = vector.shape_cast %20 : vector<1x4x144xbf16> to vector<4x144xbf16>
    %c3 = arith.constant 3 : index
    %c0_21 = arith.constant 0 : index
    %c0_22 = arith.constant 0 : index
    %22 = vector.load %arg2[%c3, %c0_21, %c0_22] : memref<9x128x4xbf16, #tpu.memory_space<vmem>>, vector<1x128x4xbf16>
    %23 = vector.shape_cast %22 : vector<1x128x4xbf16> to vector<128x4xbf16>
    %cst_23 = arith.constant dense<0.000000e+00> : vector<128x144xf32>
    %24 = tpu.matmul %23, %21, %cst_23 {dimension_numbers = #tpu.dot_dimension_numbers<[1], [0], [0], [1], [0, 0, 1, 1], [], []>} : vector<128x4xbf16>, vector<4x144xbf16>, vector<128x144xf32> -> vector<128x144xf32>
    %25 = arith.addf %19, %24 : vector<128x144xf32>
    %c0_24 = arith.constant 0 : index
    %c0_25 = arith.constant 0 : index
    %c19 = arith.constant 19 : index
    %26 = vector.load %arg1[%c0_24, %c0_25, %c19] : memref<1x4x384xbf16, #tpu.memory_space<vmem>>, vector<1x4x144xbf16>
    %27 = vector.shape_cast %26 : vector<1x4x144xbf16> to vector<4x144xbf16>
    %c4 = arith.constant 4 : index
    %c0_26 = arith.constant 0 : index
    %c0_27 = arith.constant 0 : index
    %28 = vector.load %arg2[%c4, %c0_26, %c0_27] : memref<9x128x4xbf16, #tpu.memory_space<vmem>>, vector<1x128x4xbf16>
    %29 = vector.shape_cast %28 : vector<1x128x4xbf16> to vector<128x4xbf16>
    %cst_28 = arith.constant dense<0.000000e+00> : vector<128x144xf32>
    %30 = tpu.matmul %29, %27, %cst_28 {dimension_numbers = #tpu.dot_dimension_numbers<[1], [0], [0], [1], [0, 0, 1, 1], [], []>} : vector<128x4xbf16>, vector<4x144xbf16>, vector<128x144xf32> -> vector<128x144xf32>
    %31 = arith.addf %25, %30 : vector<128x144xf32>
    %c0_29 = arith.constant 0 : index
    %c0_30 = arith.constant 0 : index
    %c20 = arith.constant 20 : index
    %32 = vector.load %arg1[%c0_29, %c0_30, %c20] : memref<1x4x384xbf16, #tpu.memory_space<vmem>>, vector<1x4x144xbf16>
    %33 = vector.shape_cast %32 : vector<1x4x144xbf16> to vector<4x144xbf16>
    %c5 = arith.constant 5 : index
    %c0_31 = arith.constant 0 : index
    %c0_32 = arith.constant 0 : index
    %34 = vector.load %arg2[%c5, %c0_31, %c0_32] : memref<9x128x4xbf16, #tpu.memory_space<vmem>>, vector<1x128x4xbf16>
    %35 = vector.shape_cast %34 : vector<1x128x4xbf16> to vector<128x4xbf16>
    %cst_33 = arith.constant dense<0.000000e+00> : vector<128x144xf32>
    %36 = tpu.matmul %35, %33, %cst_33 {dimension_numbers = #tpu.dot_dimension_numbers<[1], [0], [0], [1], [0, 0, 1, 1], [], []>} : vector<128x4xbf16>, vector<4x144xbf16>, vector<128x144xf32> -> vector<128x144xf32>
    %37 = arith.addf %31, %36 : vector<128x144xf32>
    %c0_34 = arith.constant 0 : index
    %c0_35 = arith.constant 0 : index
    %c36 = arith.constant 36 : index
    %38 = vector.load %arg1[%c0_34, %c0_35, %c36] : memref<1x4x384xbf16, #tpu.memory_space<vmem>>, vector<1x4x144xbf16>
    %39 = vector.shape_cast %38 : vector<1x4x144xbf16> to vector<4x144xbf16>
    %c6 = arith.constant 6 : index
    %c0_36 = arith.constant 0 : index
    %c0_37 = arith.constant 0 : index
    %40 = vector.load %arg2[%c6, %c0_36, %c0_37] : memref<9x128x4xbf16, #tpu.memory_space<vmem>>, vector<1x128x4xbf16>
    %41 = vector.shape_cast %40 : vector<1x128x4xbf16> to vector<128x4xbf16>
    %cst_38 = arith.constant dense<0.000000e+00> : vector<128x144xf32>
    %42 = tpu.matmul %41, %39, %cst_38 {dimension_numbers = #tpu.dot_dimension_numbers<[1], [0], [0], [1], [0, 0, 1, 1], [], []>} : vector<128x4xbf16>, vector<4x144xbf16>, vector<128x144xf32> -> vector<128x144xf32>
    %43 = arith.addf %37, %42 : vector<128x144xf32>
    %c0_39 = arith.constant 0 : index
    %c0_40 = arith.constant 0 : index
    %c37 = arith.constant 37 : index
    %44 = vector.load %arg1[%c0_39, %c0_40, %c37] : memref<1x4x384xbf16, #tpu.memory_space<vmem>>, vector<1x4x144xbf16>
    %45 = vector.shape_cast %44 : vector<1x4x144xbf16> to vector<4x144xbf16>
    %c7 = arith.constant 7 : index
    %c0_41 = arith.constant 0 : index
    %c0_42 = arith.constant 0 : index
    %46 = vector.load %arg2[%c7, %c0_41, %c0_42] : memref<9x128x4xbf16, #tpu.memory_space<vmem>>, vector<1x128x4xbf16>
    %47 = vector.shape_cast %46 : vector<1x128x4xbf16> to vector<128x4xbf16>
    %cst_43 = arith.constant dense<0.000000e+00> : vector<128x144xf32>
    %48 = tpu.matmul %47, %45, %cst_43 {dimension_numbers = #tpu.dot_dimension_numbers<[1], [0], [0], [1], [0, 0, 1, 1], [], []>} : vector<128x4xbf16>, vector<4x144xbf16>, vector<128x144xf32> -> vector<128x144xf32>
    %49 = arith.addf %43, %48 : vector<128x144xf32>
    %c0_44 = arith.constant 0 : index
    %c0_45 = arith.constant 0 : index
    %c38 = arith.constant 38 : index
    %50 = vector.load %arg1[%c0_44, %c0_45, %c38] : memref<1x4x384xbf16, #tpu.memory_space<vmem>>, vector<1x4x144xbf16>
    %51 = vector.shape_cast %50 : vector<1x4x144xbf16> to vector<4x144xbf16>
    %c8 = arith.constant 8 : index
    %c0_46 = arith.constant 0 : index
    %c0_47 = arith.constant 0 : index
    %52 = vector.load %arg2[%c8, %c0_46, %c0_47] : memref<9x128x4xbf16, #tpu.memory_space<vmem>>, vector<1x128x4xbf16>
    %53 = vector.shape_cast %52 : vector<1x128x4xbf16> to vector<128x4xbf16>
    %cst_48 = arith.constant dense<0.000000e+00> : vector<128x144xf32>
    %54 = tpu.matmul %53, %51, %cst_48 {dimension_numbers = #tpu.dot_dimension_numbers<[1], [0], [0], [1], [0, 0, 1, 1], [], []>} : vector<128x4xbf16>, vector<4x144xbf16>, vector<128x144xf32> -> vector<128x144xf32>
    %55 = arith.addf %49, %54 : vector<128x144xf32>
    %c0_49 = arith.constant 0 : index
    %c0_50 = arith.constant 0 : index
    %56 = vector.load %arg3[%c0_49, %c0_50] : memref<128x1xf32, #tpu.memory_space<vmem>>, vector<128x1xf32>
    %57 = vector.broadcast %56 : vector<128x1xf32> to vector<128x144xf32>
    %58 = arith.addf %55, %57 : vector<128x144xf32>
    %cst_51 = arith.constant 0.000000e+00 : f32
    %59 = vector.broadcast %cst_51 : f32 to vector<128x144xf32>
    %60 = arith.maximumf %58, %59 : vector<128x144xf32>
    %c0_52 = arith.constant 0 : index
    %c0_53 = arith.constant 0 : index
    %61 = vector.load %arg4[%c0_52, %c0_53] : memref<1x288xf32, #tpu.memory_space<vmem>>, vector<1x144xf32>
    %62 = vector.broadcast %61 : vector<1x144xf32> to vector<128x144xf32>
    %63 = arith.mulf %60, %62 : vector<128x144xf32>
    %cst_54 = arith.constant dense<0.000000e+00> : vector<128xf32>
    %64 = vector.multi_reduction <add>, %63, %cst_54 [1] : vector<128x144xf32> to vector<128xf32>
    %65 = vector.shape_cast %64 : vector<128xf32> to vector<128x1xf32>
    %66 = arith.addf %0, %65 : vector<128x1xf32>
    %cst_55 = arith.constant 0.000000e+00 : f32
    %67 = vector.broadcast %cst_55 : f32 to vector<128x144xf32>
    %c0_56 = arith.constant 0 : index
    %c0_57 = arith.constant 0 : index
    %c144 = arith.constant 144 : index
    %68 = vector.load %arg1[%c0_56, %c0_57, %c144] : memref<1x4x384xbf16, #tpu.memory_space<vmem>>, vector<1x4x144xbf16>
    %69 = vector.shape_cast %68 : vector<1x4x144xbf16> to vector<4x144xbf16>
    %c0_58 = arith.constant 0 : index
    %c0_59 = arith.constant 0 : index
    %c0_60 = arith.constant 0 : index
    %70 = vector.load %arg2[%c0_58, %c0_59, %c0_60] : memref<9x128x4xbf16, #tpu.memory_space<vmem>>, vector<1x128x4xbf16>
    %71 = vector.shape_cast %70 : vector<1x128x4xbf16> to vector<128x4xbf16>
    %cst_61 = arith.constant dense<0.000000e+00> : vector<128x144xf32>
    %72 = tpu.matmul %71, %69, %cst_61 {dimension_numbers = #tpu.dot_dimension_numbers<[1], [0], [0], [1], [0, 0, 1, 1], [], []>} : vector<128x4xbf16>, vector<4x144xbf16>, vector<128x144xf32> -> vector<128x144xf32>
    %73 = arith.addf %67, %72 : vector<128x144xf32>
    %c0_62 = arith.constant 0 : index
    %c0_63 = arith.constant 0 : index
    %c145 = arith.constant 145 : index
    %74 = vector.load %arg1[%c0_62, %c0_63, %c145] : memref<1x4x384xbf16, #tpu.memory_space<vmem>>, vector<1x4x144xbf16>
    %75 = vector.shape_cast %74 : vector<1x4x144xbf16> to vector<4x144xbf16>
    %c1_64 = arith.constant 1 : index
    %c0_65 = arith.constant 0 : index
    %c0_66 = arith.constant 0 : index
    %76 = vector.load %arg2[%c1_64, %c0_65, %c0_66] : memref<9x128x4xbf16, #tpu.memory_space<vmem>>, vector<1x128x4xbf16>
    %77 = vector.shape_cast %76 : vector<1x128x4xbf16> to vector<128x4xbf16>
    %cst_67 = arith.constant dense<0.000000e+00> : vector<128x144xf32>
    %78 = tpu.matmul %77, %75, %cst_67 {dimension_numbers = #tpu.dot_dimension_numbers<[1], [0], [0], [1], [0, 0, 1, 1], [], []>} : vector<128x4xbf16>, vector<4x144xbf16>, vector<128x144xf32> -> vector<128x144xf32>
    %79 = arith.addf %73, %78 : vector<128x144xf32>
    %c0_68 = arith.constant 0 : index
    %c0_69 = arith.constant 0 : index
    %c146 = arith.constant 146 : index
    %80 = vector.load %arg1[%c0_68, %c0_69, %c146] : memref<1x4x384xbf16, #tpu.memory_space<vmem>>, vector<1x4x144xbf16>
    %81 = vector.shape_cast %80 : vector<1x4x144xbf16> to vector<4x144xbf16>
    %c2_70 = arith.constant 2 : index
    %c0_71 = arith.constant 0 : index
    %c0_72 = arith.constant 0 : index
    %82 = vector.load %arg2[%c2_70, %c0_71, %c0_72] : memref<9x128x4xbf16, #tpu.memory_space<vmem>>, vector<1x128x4xbf16>
    %83 = vector.shape_cast %82 : vector<1x128x4xbf16> to vector<128x4xbf16>
    %cst_73 = arith.constant dense<0.000000e+00> : vector<128x144xf32>
    %84 = tpu.matmul %83, %81, %cst_73 {dimension_numbers = #tpu.dot_dimension_numbers<[1], [0], [0], [1], [0, 0, 1, 1], [], []>} : vector<128x4xbf16>, vector<4x144xbf16>, vector<128x144xf32> -> vector<128x144xf32>
    %85 = arith.addf %79, %84 : vector<128x144xf32>
    %c0_74 = arith.constant 0 : index
    %c0_75 = arith.constant 0 : index
    %c162 = arith.constant 162 : index
    %86 = vector.load %arg1[%c0_74, %c0_75, %c162] : memref<1x4x384xbf16, #tpu.memory_space<vmem>>, vector<1x4x144xbf16>
    %87 = vector.shape_cast %86 : vector<1x4x144xbf16> to vector<4x144xbf16>
    %c3_76 = arith.constant 3 : index
    %c0_77 = arith.constant 0 : index
    %c0_78 = arith.constant 0 : index
    %88 = vector.load %arg2[%c3_76, %c0_77, %c0_78] : memref<9x128x4xbf16, #tpu.memory_space<vmem>>, vector<1x128x4xbf16>
    %89 = vector.shape_cast %88 : vector<1x128x4xbf16> to vector<128x4xbf16>
    %cst_79 = arith.constant dense<0.000000e+00> : vector<128x144xf32>
    %90 = tpu.matmul %89, %87, %cst_79 {dimension_numbers = #tpu.dot_dimension_numbers<[1], [0], [0], [1], [0, 0, 1, 1], [], []>} : vector<128x4xbf16>, vector<4x144xbf16>, vector<128x144xf32> -> vector<128x144xf32>
    %91 = arith.addf %85, %90 : vector<128x144xf32>
    %c0_80 = arith.constant 0 : index
    %c0_81 = arith.constant 0 : index
    %c163 = arith.constant 163 : index
    %92 = vector.load %arg1[%c0_80, %c0_81, %c163] : memref<1x4x384xbf16, #tpu.memory_space<vmem>>, vector<1x4x144xbf16>
    %93 = vector.shape_cast %92 : vector<1x4x144xbf16> to vector<4x144xbf16>
    %c4_82 = arith.constant 4 : index
    %c0_83 = arith.constant 0 : index
    %c0_84 = arith.constant 0 : index
    %94 = vector.load %arg2[%c4_82, %c0_83, %c0_84] : memref<9x128x4xbf16, #tpu.memory_space<vmem>>, vector<1x128x4xbf16>
    %95 = vector.shape_cast %94 : vector<1x128x4xbf16> to vector<128x4xbf16>
    %cst_85 = arith.constant dense<0.000000e+00> : vector<128x144xf32>
    %96 = tpu.matmul %95, %93, %cst_85 {dimension_numbers = #tpu.dot_dimension_numbers<[1], [0], [0], [1], [0, 0, 1, 1], [], []>} : vector<128x4xbf16>, vector<4x144xbf16>, vector<128x144xf32> -> vector<128x144xf32>
    %97 = arith.addf %91, %96 : vector<128x144xf32>
    %c0_86 = arith.constant 0 : index
    %c0_87 = arith.constant 0 : index
    %c164 = arith.constant 164 : index
    %98 = vector.load %arg1[%c0_86, %c0_87, %c164] : memref<1x4x384xbf16, #tpu.memory_space<vmem>>, vector<1x4x144xbf16>
    %99 = vector.shape_cast %98 : vector<1x4x144xbf16> to vector<4x144xbf16>
    %c5_88 = arith.constant 5 : index
    %c0_89 = arith.constant 0 : index
    %c0_90 = arith.constant 0 : index
    %100 = vector.load %arg2[%c5_88, %c0_89, %c0_90] : memref<9x128x4xbf16, #tpu.memory_space<vmem>>, vector<1x128x4xbf16>
    %101 = vector.shape_cast %100 : vector<1x128x4xbf16> to vector<128x4xbf16>
    %cst_91 = arith.constant dense<0.000000e+00> : vector<128x144xf32>
    %102 = tpu.matmul %101, %99, %cst_91 {dimension_numbers = #tpu.dot_dimension_numbers<[1], [0], [0], [1], [0, 0, 1, 1], [], []>} : vector<128x4xbf16>, vector<4x144xbf16>, vector<128x144xf32> -> vector<128x144xf32>
    %103 = arith.addf %97, %102 : vector<128x144xf32>
    %c0_92 = arith.constant 0 : index
    %c0_93 = arith.constant 0 : index
    %c180 = arith.constant 180 : index
    %104 = vector.load %arg1[%c0_92, %c0_93, %c180] : memref<1x4x384xbf16, #tpu.memory_space<vmem>>, vector<1x4x144xbf16>
    %105 = vector.shape_cast %104 : vector<1x4x144xbf16> to vector<4x144xbf16>
    %c6_94 = arith.constant 6 : index
    %c0_95 = arith.constant 0 : index
    %c0_96 = arith.constant 0 : index
    %106 = vector.load %arg2[%c6_94, %c0_95, %c0_96] : memref<9x128x4xbf16, #tpu.memory_space<vmem>>, vector<1x128x4xbf16>
    %107 = vector.shape_cast %106 : vector<1x128x4xbf16> to vector<128x4xbf16>
    %cst_97 = arith.constant dense<0.000000e+00> : vector<128x144xf32>
    %108 = tpu.matmul %107, %105, %cst_97 {dimension_numbers = #tpu.dot_dimension_numbers<[1], [0], [0], [1], [0, 0, 1, 1], [], []>} : vector<128x4xbf16>, vector<4x144xbf16>, vector<128x144xf32> -> vector<128x144xf32>
    %109 = arith.addf %103, %108 : vector<128x144xf32>
    %c0_98 = arith.constant 0 : index
    %c0_99 = arith.constant 0 : index
    %c181 = arith.constant 181 : index
    %110 = vector.load %arg1[%c0_98, %c0_99, %c181] : memref<1x4x384xbf16, #tpu.memory_space<vmem>>, vector<1x4x144xbf16>
    %111 = vector.shape_cast %110 : vector<1x4x144xbf16> to vector<4x144xbf16>
    %c7_100 = arith.constant 7 : index
    %c0_101 = arith.constant 0 : index
    %c0_102 = arith.constant 0 : index
    %112 = vector.load %arg2[%c7_100, %c0_101, %c0_102] : memref<9x128x4xbf16, #tpu.memory_space<vmem>>, vector<1x128x4xbf16>
    %113 = vector.shape_cast %112 : vector<1x128x4xbf16> to vector<128x4xbf16>
    %cst_103 = arith.constant dense<0.000000e+00> : vector<128x144xf32>
    %114 = tpu.matmul %113, %111, %cst_103 {dimension_numbers = #tpu.dot_dimension_numbers<[1], [0], [0], [1], [0, 0, 1, 1], [], []>} : vector<128x4xbf16>, vector<4x144xbf16>, vector<128x144xf32> -> vector<128x144xf32>
    %115 = arith.addf %109, %114 : vector<128x144xf32>
    %c0_104 = arith.constant 0 : index
    %c0_105 = arith.constant 0 : index
    %c182 = arith.constant 182 : index
    %116 = vector.load %arg1[%c0_104, %c0_105, %c182] : memref<1x4x384xbf16, #tpu.memory_space<vmem>>, vector<1x4x144xbf16>
    %117 = vector.shape_cast %116 : vector<1x4x144xbf16> to vector<4x144xbf16>
    %c8_106 = arith.constant 8 : index
    %c0_107 = arith.constant 0 : index
    %c0_108 = arith.constant 0 : index
    %118 = vector.load %arg2[%c8_106, %c0_107, %c0_108] : memref<9x128x4xbf16, #tpu.memory_space<vmem>>, vector<1x128x4xbf16>
    %119 = vector.shape_cast %118 : vector<1x128x4xbf16> to vector<128x4xbf16>
    %cst_109 = arith.constant dense<0.000000e+00> : vector<128x144xf32>
    %120 = tpu.matmul %119, %117, %cst_109 {dimension_numbers = #tpu.dot_dimension_numbers<[1], [0], [0], [1], [0, 0, 1, 1], [], []>} : vector<128x4xbf16>, vector<4x144xbf16>, vector<128x144xf32> -> vector<128x144xf32>
    %121 = arith.addf %115, %120 : vector<128x144xf32>
    %c0_110 = arith.constant 0 : index
    %c0_111 = arith.constant 0 : index
    %122 = vector.load %arg3[%c0_110, %c0_111] : memref<128x1xf32, #tpu.memory_space<vmem>>, vector<128x1xf32>
    %123 = vector.broadcast %122 : vector<128x1xf32> to vector<128x144xf32>
    %124 = arith.addf %121, %123 : vector<128x144xf32>
    %cst_112 = arith.constant 0.000000e+00 : f32
    %125 = vector.broadcast %cst_112 : f32 to vector<128x144xf32>
    %126 = arith.maximumf %124, %125 : vector<128x144xf32>
    %c0_113 = arith.constant 0 : index
    %c144_114 = arith.constant 144 : index
    %127 = vector.load %arg4[%c0_113, %c144_114] : memref<1x288xf32, #tpu.memory_space<vmem>>, vector<1x144xf32>
    %128 = vector.broadcast %127 : vector<1x144xf32> to vector<128x144xf32>
    %129 = arith.mulf %126, %128 : vector<128x144xf32>
    %cst_115 = arith.constant dense<0.000000e+00> : vector<128xf32>
    %130 = vector.multi_reduction <add>, %129, %cst_115 [1] : vector<128x144xf32> to vector<128xf32>
    %131 = vector.shape_cast %130 : vector<128xf32> to vector<128x1xf32>
    %132 = arith.addf %66, %131 : vector<128x1xf32>
    %c0_116 = arith.constant 0 : index
    %c0_117 = arith.constant 0 : index
    %133 = vector.load %arg5[%c0_116, %c0_117] : memref<128x1xf32, #tpu.memory_space<vmem>>, vector<128x1xf32>
    %134 = arith.mulf %132, %133 : vector<128x1xf32>
    %cst_118 = arith.constant dense<0.000000e+00> : vector<1xf32>
    %135 = vector.multi_reduction <add>, %134, %cst_118 [0] : vector<128x1xf32> to vector<1xf32>
    %136 = vector.shape_cast %135 : vector<1xf32> to vector<1x1xf32>
    %c0_119 = arith.constant 0 : index
    %c0_120 = arith.constant 0 : index
    %137 = vector.load %arg6[%c0_119, %c0_120] : memref<1x1xf32, #tpu.memory_space<vmem>>, vector<1x1xf32>
    %138 = arith.addf %136, %137 : vector<1x1xf32>
    %139 = arith.index_cast %arg0 : i32 to index
    %c0_121 = arith.constant 0 : index
    %140 = vector.load %arg7[%139, %c0_121] : memref<2x1xf32, #tpu.memory_space<vmem>>, vector<1x1xf32>
    tpu.vector_store %arg7[%139, %c0_121], %138 {strides = array<i32>} : memref<2x1xf32, #tpu.memory_space<vmem>>, vector<1x1xf32>,
    return
  }
  func.func @transform_0(%arg0: i32) -> (i32, i32, i32) {
    %c0_i32 = arith.constant 0 : i32
    %c0_i32_0 = arith.constant 0 : i32
    %c0_i32_1 = arith.constant 0 : i32
    return %arg0, %c0_i32, %c0_i32_0 : i32, i32, i32
  }
  func.func @transform_1(%arg0: i32) -> (i32, i32, i32) {
    %c0_i32 = arith.constant 0 : i32
    %c0_i32_0 = arith.constant 0 : i32
    %c0_i32_1 = arith.constant 0 : i32
    %c0_i32_2 = arith.constant 0 : i32
    return %c0_i32, %c0_i32_0, %c0_i32_1 : i32, i32, i32
  }
  func.func @transform_2(%arg0: i32) -> (i32, i32) {
    %c0_i32 = arith.constant 0 : i32
    %c0_i32_0 = arith.constant 0 : i32
    %c0_i32_1 = arith.constant 0 : i32
    return %c0_i32, %c0_i32_0 : i32, i32
  }
  func.func @transform_3(%arg0: i32) -> (i32, i32) {
    %c0_i32 = arith.constant 0 : i32
    %c0_i32_0 = arith.constant 0 : i32
    %c0_i32_1 = arith.constant 0 : i32
    return %c0_i32, %c0_i32_0 : i32, i32
  }
  func.func @transform_4(%arg0: i32) -> (i32, i32) {
    %c0_i32 = arith.constant 0 : i32
    %c0_i32_0 = arith.constant 0 : i32
    %c0_i32_1 = arith.constant 0 : i32
    return %c0_i32, %c0_i32_0 : i32, i32
  }
  func.func @transform_5(%arg0: i32) -> (i32, i32) {
    %c0_i32 = arith.constant 0 : i32
    %c0_i32_0 = arith.constant 0 : i32
    %c0_i32_1 = arith.constant 0 : i32
    return %c0_i32, %c0_i32_0 : i32, i32
  }
  func.func @transform_6(%arg0: i32) -> (i32, i32) {
    %c0_i32 = arith.constant 0 : i32
    %c0_i32_0 = arith.constant 0 : i32
    %c0_i32_1 = arith.constant 0 : i32
    return %c0_i32, %c0_i32_0 : i32, i32
  }
}

</mosaic_0001>

<bundles_post_ra>
// kernel: tpu_custom_call.1
= control target key start
LH: loop header
LB: loop body
LE: loop exit
PB: predicated region body
PF: predicated region fallthrough
CT: control target
= control target key end

     0   :  { %s5001_s23 = smov 0   ;;  %s7755_s0 = inlined_call_operand.vmem [shape: bf16[2,4,384], index: 0, kind: input, shape index: {}]   ;;  %s7756_s1 = inlined_call_operand.vmem [shape: bf16[9,128,4], index: 1, kind: input, shape index: {}]   ;;  %s7757_s2 = inlined_call_operand.vmem [shape: f32[128,1], index: 2, kind: input, shape index: {}]   ;;  %s7758_s3 = inlined_call_operand.vmem [shape: f32[1,288], index: 3, kind: input, shape index: {}]   ;;  %s7759_s4 = inlined_call_operand.vmem [shape: f32[128,1], index: 4, kind: input, shape index: {}]   ;;  %s7760_s5 = inlined_call_operand.<no memory space> [shape: f32[1,1], index: 5, kind: input, shape index: {}]   ;;  %s7761_s6 = inlined_call_operand.vmem [shape: f32[2,1], index: 6, kind: output, shape index: {}]  }
   0x1   :  { %v11_v0 = vstv %s7760_s5 }
   0x2   :  { %12 = vst [vmem:[#allocation2] sm:$0x1] %v11_v0 }
   0x3 LB: > { %s5007_s24 = sadd.s32 4294967295, %s4945_s23   ;;  %p4406_p0 = scmp.ge.s32.totalorder %s4945_s23, 1  ;;  %s4945_s23 = sphi %s5001_s23, %s18_s23  }
   0x4   : > { %p209_p1 = scmp.lt.s32.totalorder %s4945_s23, 3 }
   0x6   : > { %p210_p2 = pnand %p4406_p0, %p209_p1 }
   0x8   : > { %213 = sbr.rel (%p210_p2) target bundleno = 1087 (0x43f), region = 44 }
   0xd   : > { %p234_p3 = scmp.lt.s32.totalorder %s5007_s24, 1  ;;  %v7770_v1 = vmov 0   ;;  %vm354_vm0 = vcmask 1041408   ;;  %s4948_s29 = smov 126   ;;  %vm329_vm1 = vcmask 31744   ;;  %v4815_v5 = vld [vmem:[%s7756_s1] sm:$0xff]  }
   0xe   : > { %576 = vmatprep.mubr.bf16.mxu1 %v7770_v1  ;;  %393 = vmatprep.mubr.bf16.mxu0 %v7770_v1  ;;  %s4949_s30 = smov 127   ;;  %s4950_s9 = smov 110   ;;  %v4817_v6 = vld [vmem:[%s7756_s1 + $0x8] sm:$0xff]   ;;  %v4819_v7 = vld [vmem:[%s7756_s1 + $0x10] sm:$0xff]   ;;  %v4821_v8 = vld [vmem:[%s7756_s1 + $0x18] sm:$0xff]   ;;  %vm728_vm2 = vcmask 1031168  }
   0xf   : > { %s235_s5 = scalar_select %p234_p3, %s5007_s24, 1  ;;  %4813 = vset.pattern.permute.xlu0 %v7770_v1  ;;  %4814 = vset.pattern.permute.xlu1 %v7770_v1  ;;  %v4823_v9 = vld [vmem:[%s7756_s1 + $0x20] sm:$0xff]   ;;  %v4825_v10 = vld [vmem:[%s7756_s1 + $0x28] sm:$0xff]   ;;  %v4827_v11 = vld [vmem:[%s7756_s1 + $0x30] sm:$0xff]   ;;  %vm327_vm3 = vcmask 1039360   ;;  %vm976_vm4 = vcmask 900096  }
  0x10   : > { %s4951_s12 = smov 109   ;;  %s4952_s13 = smov 108   ;;  %v4829_v12 = vld [vmem:[%s7756_s1 + $0x38] sm:$0xff]   ;;  %v5083_v22 = vld [vmem:[%s7756_s1 + $0x40] sm:$0xff]   ;;  %v5105_v31 = vld [vmem:[%s7756_s1 + $0x48] sm:$0xff]   ;;  %vm1472_vm5 = vcmask 883712  }
  0x11   : > { %s4788_s25 = smul.u32 6, %s235_s5  ;;  %s4953_s16 = smov 92   ;;  %v4831_v28 = vld [vmem:[%s7756_s1 + $0xc0] sm:$0xff]   ;;  %v4833_v36 = vld [vmem:[%s7756_s1 + $0xc8] sm:$0xff]   ;;  %vm1720_vm6 = vcmask 752640   ;;  %v5127_v40 = vld [vmem:[%s7756_s1 + $0x50] sm:$0xff]  }
  0x12   : > { %s4954_s17 = smov 91   ;;  %s4956_s7 = smov 111   ;;  %v4835_v42 = vld [vmem:[%s7756_s1 + $0xd0] sm:$0xff]   ;;  %v5145_v43 = vld [vmem:[%s7756_s1 + $0x58] sm:$0xff]   ;;  %v5158_v45 = vld [vmem:[%s7756_s1 + $0x60] sm:$0xff]   ;;  %vm1224_vm7 = vcmask 891904  }
  0x13   : > { %s5020_s28 = scalar_lea.vmem %s7755_s0, %s4788_s25  ;;  %s4957_s18 = smov 112   ;;  %v4837_v44 = vld [vmem:[%s7756_s1 + $0xd8] sm:$0xff]   ;;  %v4839_v46 = vld [vmem:[%s7756_s1 + $0xe0] sm:$0xff]   ;;  %v5171_v47 = vld [vmem:[%s7756_s1 + $0x68] sm:$0xff]   ;;  %vm1968_vm8 = vcmask 744448   ;;  %vm2692_vm9 = vcmask 908288  }
  0x14   : > { %v4483_v2 = vld.sshfl [vmem:[%s5020_s28] sm:$0x33 pattern:$0x76325410]  ;;  %v4841_v48 = vld [vmem:[%s7756_s1 + $0xe8] sm:$0xff]   ;;  %v5184_v49 = vld [vmem:[%s7756_s1 + $0x70] sm:$0xff]  }
  0x15   : > { %724 = vrot.lane.b32.xlu1 %v4483_v2, %s4948_s29  ;;  %v723_v3 = vcombine.high %v4483_v2, %v4483_v2  ;;  %323 = vrot.lane.b32.xlu0 %v4483_v2, %s4949_s30  ;;  %v539_v4 = vsel %vm354_vm0, %v4483_v2, 0  ;;  %v5070_v13 = vld.sshfl [vmem:[%s5020_s28 + $0x2] sm:$0x33 pattern:$0x76325410]  ;;  %v4843_v50 = vld [vmem:[%s7756_s1 + $0xf0] sm:$0xff]  }
  0x16   : > { %v5074_v14 = vcombine.high %v5070_v13, %v5070_v13  ;;  %v5197_v51 = vld [vmem:[%s7756_s1 + $0x78] sm:$0xff]   ;;  %v5212_v54 = vld [vmem:[%s7756_s1 + $0x80] sm:$0xff]   ;;  %v5232_v62 = vld [vmem:[%s7756_s1 + $0x88] sm:$0xff]   ;;  %s4958_s8 = smov 94   ;;  %vm2216_vm10 = vcmask 736256   ;;  %vm2817_vm11 = vcmask 916480  }
  0x17   : > { %4450 = vmatprep.subr.msk.bf16.mxu1 %vm354_vm0, %v723_v3  ;;  %v4845_v52 = vld [vmem:[%s7756_s1 + $0xf8] sm:$0xff]   ;;  %v4847_v59 = vld [vmem:[%s7756_s1 + $0x140] sm:$0xff]   ;;  %v4849_v63 = vld [vmem:[%s7756_s1 + $0x148] sm:$0xff]   ;;  %vm3285_vm12 = vcmask 760832   ;;  %vm3118_vm13 = vcmask 769024   ;;  %vm3618_vm14 = vcmask 621568  }
  0x18   : > { %559 = vmatpush1.bf16.msra.mxu1 %v539_v4  ;;  %vm3952_vm15 = vcmask 605184  }
  0x19   : > { %726 = vrot.lane.b32.xlu1 %v723_v3, %s4948_s29  ;;  %325 = vrot.lane.b32.xlu0 %v723_v3, %s4949_s30  ;;  %s4955_s30 = smov 90  }
  0x1b   : > { %4451 = vmatmul.mubr.msk.bf16.vlgmr.msra.gmra.mxu1 %vm329_vm1, %v4815_v5  ;;  %v4851_v5 = vld [vmem:[%s7756_s1 + $0x150] sm:$0xff]  }
  0x1c   : > { %586 = vmatprep.mubr.bf16.mxu1 %v7770_v1 }
  0x1d   : > { %974 = vrot.lane.b32.xlu1 %v723_v3, %s4950_s9  ;;  %972 = vrot.lane.b32.xlu0 %v4483_v2, %s4950_s9 }
  0x21   : > { %1222 = vrot.lane.b32.xlu1 %v723_v3, %s4951_s12  ;;  %1220 = vrot.lane.b32.xlu0 %v4483_v2, %s4951_s12  ;;  %s4959_s12 = smov 93  }
  0x23   : > { %4452 = vmatmul.mubr.msk.bf16.gmra.mxu1 %vm329_vm1, %v4817_v6 }
  0x24   : > { %596 = vmatprep.mubr.bf16.mxu1 %v7770_v1 }
  0x25   : > { %1470 = vrot.lane.b32.xlu1 %v723_v3, %s4952_s13  ;;  %1468 = vrot.lane.b32.xlu0 %v4483_v2, %s4952_s13 }
  0x29   : > { %1718 = vrot.lane.b32.xlu1 %v723_v3, %s4953_s16  ;;  %1716 = vrot.lane.b32.xlu0 %v4483_v2, %s4953_s16 }
  0x2b   : > { %4453 = vmatmul.mubr.msk.bf16.gmra.mxu1 %vm329_vm1, %v4819_v7  ;;  %v5276_v7 = vld [vmem:[%s7756_s1 + $0x98] sm:$0xff]  }
  0x2c   : > { %606 = vmatprep.mubr.bf16.mxu1 %v7770_v1  ;;  %7811 = vst [vmem:[#allocation3_spill] sm:$0xff] %v5276_v7 }
  0x2d   : > { %1966 = vrot.lane.b32.xlu1 %v723_v3, %s4954_s17  ;;  %1964 = vrot.lane.b32.xlu0 %v4483_v2, %s4954_s17 }
  0x31   : > { %2214 = vrot.lane.b32.xlu1 %v723_v3, %s4955_s30  ;;  %2212 = vrot.lane.b32.xlu0 %v4483_v2, %s4955_s30  ;;  %v5251_v2 = vld [vmem:[%s7756_s1 + $0x90] sm:$0xff]   ;;  %s4961_s30 = smov 75  }
  0x33   : > { %4454 = vmatmul.mubr.msk.bf16.gmra.mxu1 %vm329_vm1, %v4821_v8 }
  0x34   : > { %616 = vmatprep.mubr.bf16.mxu1 %v7770_v1 }
  0x35   : > { %2690 = vrot.lane.b32.xlu1 %v5074_v14, %s4956_s7  ;;  %2688 = vrot.lane.b32.xlu0 %v5070_v13, %s4956_s7 }
  0x39   : > { %2815 = vrot.lane.b32.xlu1 %v5074_v14, %s4957_s18  ;;  %2813 = vrot.lane.b32.xlu0 %v5070_v13, %s4957_s18 }
  0x3b   : > { %4455 = vmatmul.mubr.msk.bf16.gmra.mxu1 %vm329_vm1, %v4823_v9  ;;  %v4853_v9 = vld [vmem:[%s7756_s1 + $0x158] sm:$0xff]  }
  0x3c   : > { %626 = vmatprep.mubr.bf16.mxu1 %v7770_v1 }
  0x3d   : > { %2950 = vrot.lane.b32.xlu1 %v5074_v14, %s4950_s9  ;;  %2948 = vrot.lane.b32.xlu0 %v5070_v13, %s4950_s9  ;;  %s4960_s9 = smov 76  }
  0x41   : > { %3116 = vrot.lane.b32.xlu1 %v5074_v14, %s4958_s8  ;;  %3114 = vrot.lane.b32.xlu0 %v5070_v13, %s4958_s8 }
  0x43   : > { %4456 = vmatmul.mubr.msk.bf16.gmra.mxu1 %vm329_vm1, %v4825_v10 }
  0x44   : > { %636 = vmatprep.mubr.bf16.mxu1 %v7770_v1 }
  0x45   : > { %3283 = vrot.lane.b32.xlu1 %v5074_v14, %s4959_s12  ;;  %3281 = vrot.lane.b32.xlu0 %v5070_v13, %s4959_s12 }
  0x49   : > { %3450 = vrot.lane.b32.xlu1 %v5074_v14, %s4953_s16  ;;  %3448 = vrot.lane.b32.xlu0 %v5070_v13, %s4953_s16 }
  0x4b   : > { %4457 = vmatmul.mubr.msk.bf16.gmra.mxu1 %vm329_vm1, %v4827_v11  ;;  %v5293_v11 = vld [vmem:[%s7756_s1 + $0xa0] sm:$0xff]  }
  0x4c   : > { %646 = vmatprep.mubr.bf16.mxu1 %v7770_v1  ;;  %7812 = vst [vmem:[#allocation4_spill] sm:$0xff] %v5293_v11 }
  0x4d   : > { %3616 = vrot.lane.b32.xlu1 %v5074_v14, %s4960_s9  ;;  %3614 = vrot.lane.b32.xlu0 %v5070_v13, %s4960_s9  ;;  %v4869_v13 = vld [vmem:[%s7756_s1 + $0x1d8] sm:$0xff]  }
  0x53   : > { %4458 = vmatmul.mubr.msk.bf16.gmra.mxu1 %vm329_vm1, %v4829_v12 }
  0x54   : > { %1040 = vmatprep.mubr.bf16.mxu1 %v7770_v1 }
  0x87   : > { %v725_v15 = vpop.permute.xlu1 %724  ;;  %v324_v16 = vpop.permute.xlu0 %323 }
  0x8b   : > { %v727_v17 = vpop.permute.xlu1 %726  ;;  %v326_v18 = vpop.permute.xlu0 %325 }
  0x8c   : > { %v729_v19 = vsel %vm728_vm2, %v725_v15, %v727_v17  ;;  %4433 = vmatprep.subr.msk.bf16.mxu0 %vm354_vm0, %v326_v18  ;;  %v328_v20 = vsel %vm327_vm3, %v324_v16, %v326_v18  ;;  %v4855_v15 = vld [vmem:[%s7756_s1 + $0x160] sm:$0xff]   ;;  %vm3785_vm2 = vcmask 613376   ;;  %vm4372_vm3 = vcmask 0  }
  0x8d   : > { %v356_v21 = vsel %vm354_vm0, %v328_v20, 0  ;;  %v755_v23 = vsel %vm354_vm0, %v729_v19, 0  ;;  %v4857_v19 = vld [vmem:[%s7756_s1 + $0x168] sm:$0xff]  }
  0x8e   : > { %376 = vmatpush1.bf16.msra.mxu0 %v356_v21  ;;  %v5327_v21 = vld [vmem:[%s7756_s1 + $0xb0] sm:$0xff]  }
  0x8f   : > { %4484 = vmatprep.subr.msk.bf16.mxu0 %vm354_vm0, %v727_v17  ;;  %v975_v24 = vpop.permute.xlu1 %974  ;;  %v973_v25 = vpop.permute.xlu0 %972  ;;  %v5310_v17 = vld [vmem:[%s7756_s1 + $0xa8] sm:$0xff]   ;;  %7814 = vst [vmem:[#allocation6_spill] sm:$0xff] %v5327_v21 }
  0x90   : > { %v977_v26 = vsel %vm976_vm4, %v973_v25, %v975_v24  ;;  %4518 = vmatprep.subr.msk.bf16.mxu1 %vm354_vm0, %v975_v24  ;;  %7813 = vst [vmem:[#allocation5_spill] sm:$0xff] %v5310_v17  ;;  %v4859_v24 = vld [vmem:[%s7756_s1 + $0x170] sm:$0xff]  }
  0x91   : > { %4434 = vmatmul.mubr.msk.bf16.vlgmr.msra.gmra.mxu0 %vm329_vm1, %v5083_v22  ;;  %v1003_v27 = vsel %vm354_vm0, %v977_v26, 0  ;;  %v5344_v26 = vld [vmem:[%s7756_s1 + $0xb8] sm:$0xff]  }
  0x92   : > { %775 = vmatpush1.bf16.msra.mxu0 %v755_v23  ;;  %1023 = vmatpush1.bf16.msra.mxu1 %v1003_v27  ;;  %7815 = vst [vmem:[#allocation7_spill] sm:$0xff] %v5344_v26 }
  0x93   : > { %403 = vmatprep.mubr.bf16.mxu0 %v7770_v1  ;;  %v5096_v29 = vpop.permute.xlu1 %1222  ;;  %v5098_v30 = vpop.permute.xlu0 %1220 }
  0x94   : > { %4552 = vmatprep.subr.msk.bf16.mxu0 %vm354_vm0, %v5096_v29  ;;  %v1225_v53 = vsel %vm1224_vm7, %v5098_v30, %v5096_v29  ;;  %v4861_v29 = vld [vmem:[%s7756_s1 + $0x178] sm:$0xff]  }
  0x95   : > { %4519 = vmatmul.mubr.msk.bf16.vlgmr.msra.gmra.mxu1 %vm329_vm1, %v4831_v28  ;;  %v1251_v57 = vsel %vm354_vm0, %v1225_v53, 0 }
  0x96   : > { %1050 = vmatprep.mubr.bf16.mxu1 %v7770_v1 }
  0x97   : > { %v1471_v32 = vpop.permute.xlu1 %1470  ;;  %v1469_v33 = vpop.permute.xlu0 %1468 }
  0x98   : > { %v1473_v34 = vsel %vm1472_vm5, %v1469_v33, %v1471_v32  ;;  %4586 = vmatprep.subr.msk.bf16.mxu1 %vm354_vm0, %v1471_v32  ;;  %v5363_v32 = vld [vmem:[%s7756_s1 + $0x100] sm:$0xff]  }
  0x99   : > { %4435 = vmatmul.mubr.msk.bf16.gmra.mxu0 %vm329_vm1, %v5105_v31  ;;  %v1499_v35 = vsel %vm354_vm0, %v1473_v34, 0  ;;  %7816 = vst [vmem:[#allocation8_spill] sm:$0xff] %v5363_v32 }
  0x9a   : > { %413 = vmatprep.mubr.bf16.mxu0 %v7770_v1  ;;  %1519 = vmatpush1.bf16.msra.mxu1 %v1499_v35 }
  0x9b   : > { %v1719_v37 = vpop.permute.xlu1 %1718  ;;  %v1717_v38 = vpop.permute.xlu0 %1716 }
  0x9c   : > { %v5122_v39 = vsel %vm1720_vm6, %v1717_v38, %v1719_v37  ;;  %v4863_v38 = vld [vmem:[%s7756_s1 + $0x1c0] sm:$0xff]  }
  0x9d   : > { %4520 = vmatmul.mubr.msk.bf16.gmra.mxu1 %vm329_vm1, %v4833_v36  ;;  %v1747_v36 = vsel %vm354_vm0, %v5122_v39, 0 }
  0x9e   : > { %1060 = vmatprep.mubr.bf16.mxu1 %v7770_v1 }
  0x9f   : > { %v1967_v41 = vpop.permute.xlu1 %1966  ;;  %v1965_v55 = vpop.permute.xlu0 %1964 }
  0xa0   : > { %4654 = vmatprep.subr.msk.bf16.mxu1 %vm354_vm0, %v1967_v41  ;;  %v1969_v58 = vsel %vm1968_vm8, %v1965_v55, %v1967_v41  ;;  %v4867_v55 = vld [vmem:[%s7756_s1 + $0x1d0] sm:$0xff]  }
  0xa1   : > { %4436 = vmatmul.mubr.msk.bf16.gmra.mxu0 %vm329_vm1, %v5127_v40  ;;  %v1995_v60 = vsel %vm354_vm0, %v1969_v58, 0  ;;  %v5428_v58 = vld [vmem:[%s7756_s1 + $0x118] sm:$0xff]  }
  0xa2   : > { %423 = vmatprep.mubr.bf16.mxu0 %v7770_v1  ;;  %7825 = vst [vmem:[#allocation17_spill] sm:$0xff] %v5428_v58 }
  0xa3   : > { %v5216_v56 = vpop.permute.xlu1 %2214  ;;  %v5350_v28 = vpop.permute.xlu0 %2212 }
  0xa5   : > { %4521 = vmatmul.mubr.msk.bf16.gmra.mxu1 %vm329_vm1, %v4835_v42 }
  0xa6   : > { %1070 = vmatprep.mubr.bf16.mxu1 %v7770_v1 }
  0xa7   : > { %v5227_v61 = vpop.permute.xlu1 %2690  ;;  %v2689_v33 = vpop.permute.xlu0 %2688 }
  0xa9   : > { %4437 = vmatmul.mubr.msk.bf16.gmra.mxu0 %vm329_vm1, %v5145_v43 }
  0xaa   : > { %433 = vmatprep.mubr.bf16.mxu0 %v7770_v1 }
  0xab   : > { %v5369_v35 = vpop.permute.xlu1 %2815 }
  0xad   : > { %4522 = vmatmul.mubr.msk.bf16.gmra.mxu1 %vm329_vm1, %v4837_v44  ;;  %v5390_v44 = vld [vmem:[%s7756_s1 + $0x108] sm:$0xff]  }
  0xae   : > { %1080 = vmatprep.mubr.bf16.mxu1 %v7770_v1  ;;  %7819 = vst [vmem:[#allocation11_spill] sm:$0xff] %v5390_v44 }
  0xaf   : > { %v5385_v39 = vpop.permute.xlu1 %2950 }
  0xb1   : > { %4438 = vmatmul.mubr.msk.bf16.gmra.mxu0 %vm329_vm1, %v5158_v45 }
  0xb2   : > { %443 = vmatprep.mubr.bf16.mxu0 %v7770_v1 }
  0xb5   : > { %4523 = vmatmul.mubr.msk.bf16.gmra.mxu1 %vm329_vm1, %v4839_v46 }
  0xb6   : > { %1090 = vmatprep.mubr.bf16.mxu1 %v7770_v1 }
  0xb9   : > { %4439 = vmatmul.mubr.msk.bf16.gmra.mxu0 %vm329_vm1, %v5171_v47 }
  0xba   : > { %453 = vmatprep.mubr.bf16.mxu0 %v7770_v1 }
  0xbd   : > { %4524 = vmatmul.mubr.msk.bf16.gmra.mxu1 %vm329_vm1, %v4841_v48  ;;  %v4865_v48 = vld [vmem:[%s7756_s1 + $0x1c8] sm:$0xff]  }
  0xbe   : > { %1100 = vmatprep.mubr.bf16.mxu1 %v7770_v1 }
  0xc1   : > { %4440 = vmatmul.mubr.msk.bf16.gmra.mxu0 %vm329_vm1, %v5184_v49 }
  0xc2   : > { %463 = vmatprep.mubr.bf16.mxu0 %v7770_v1 }
  0xc5   : > { %4525 = vmatmul.mubr.msk.bf16.gmra.mxu1 %vm329_vm1, %v4843_v50 }
  0xc6   : > { %1110 = vmatprep.mubr.bf16.mxu1 %v7770_v1 }
  0xc9   : > { %4441 = vmatmul.mubr.msk.bf16.gmra.mxu0 %vm329_vm1, %v5197_v51 }
  0xca   : > { %792 = vmatprep.mubr.bf16.mxu0 %v7770_v1 }
  0xcd   : > { %4526 = vmatmul.mubr.msk.bf16.gmra.mxu1 %vm329_vm1, %v4845_v52  ;;  %v5409_v52 = vld [vmem:[%s7756_s1 + $0x110] sm:$0xff]  }
  0xce   : > { %1536 = vmatprep.mubr.bf16.mxu1 %v7770_v1  ;;  %7822 = vst [vmem:[#allocation14_spill] sm:$0xff] %v5409_v52 }
  0xd1   : > { %4485 = vmatmul.mubr.msk.bf16.vlgmr.msra.gmra.mxu0 %vm329_vm1, %v5212_v54 }
  0xd2   : > { %1271 = vmatpush1.bf16.msra.mxu0 %v1251_v57  ;;  %802 = vmatprep.mubr.bf16.mxu0 %v7770_v1 }
  0xd3   : > { %4620 = vmatprep.subr.msk.bf16.mxu0 %vm354_vm0, %v1719_v37  ;;  %v2693_v37 = vsel %vm2692_vm9, %v2689_v33, %v5227_v61 }
  0xd4   : > { %v2695_v42 = vsel %vm354_vm0, %v2693_v37, 0 }
  0xd5   : > { %4587 = vmatmul.mubr.msk.bf16.vlgmr.msra.gmra.mxu1 %vm329_vm1, %v4847_v59 }
  0xd6   : > { %2015 = vmatpush1.bf16.msra.mxu1 %v1995_v60  ;;  %1546 = vmatprep.mubr.bf16.mxu1 %v7770_v1  ;;  %v4856_v60 = vld [vmem:[%s7756_s1 + $0x120] sm:$0xff]  }
  0xd7   : > { %4698 = vmatprep.subr.msk.bf16.mxu1 %vm354_vm0, %v5227_v61 }
  0xd9   : > { %4486 = vmatmul.mubr.msk.bf16.gmra.mxu0 %vm329_vm1, %v5232_v62 }
  0xda   : > { %812 = vmatprep.mubr.bf16.mxu0 %v7770_v1 }
  0xdb   : > { %v5244_v0 = vpop.f32.mrf.mxu1 }
  0xdd   : > { %4588 = vmatmul.mubr.msk.bf16.gmra.mxu1 %vm329_vm1, %v4849_v63  ;;  %v5254_v3 = vpop.f32.mrf.mxu1  ;;  %v4871_v63 = vld [vmem:[%s7756_s1 + $0x1e0] sm:$0xff]  }
  0xde   : > { %1556 = vmatprep.mubr.bf16.mxu1 %v7770_v1 }
  0xdf   : > { %v5257_v4 = vpop.f32.mrf.mxu1 }
  0xe1   : > { %4487 = vmatmul.mubr.msk.bf16.gmra.mxu0 %vm329_vm1, %v5251_v2  ;;  %v5266_v6 = vpop.f32.mrf.mxu1 }
  0xe2   : > { %822 = vmatprep.mubr.bf16.mxu0 %v7770_v1 }
  0xe3   : > { %v5279_v8 = vpop.f32.mrf.mxu1 }
  0xe5   : > { %4589 = vmatmul.mubr.msk.bf16.gmra.mxu1 %vm329_vm1, %v4851_v5  ;;  %v5287_v10 = vpop.f32.mrf.mxu1 }
  0xe6   : > { %1566 = vmatprep.mubr.bf16.mxu1 %v7770_v1 }
  0xe7   : > { %v5296_v12 = vpop.f32.mrf.mxu1 }
  0xe9   : > { %4488 = vmatmul.mubr.msk.bf16.gmra.mxu0 %vm329_vm1, %v5276_v7  ;;  %v5304_v16 = vpop.f32.mrf.mxu1 }
  0xea   : > { %832 = vmatprep.mubr.bf16.mxu0 %v7770_v1 }
  0xeb   : > { %v5313_v18 = vpop.f32.mrf.mxu1 }
  0xed   : > { %4590 = vmatmul.mubr.msk.bf16.gmra.mxu1 %vm329_vm1, %v4853_v9  ;;  %v5321_v20 = vpop.f32.mrf.mxu1  ;;  %v4858_v9 = vld [vmem:[%s7756_s1 + $0x128] sm:$0xff]  }
  0xee   : > { %1576 = vmatprep.mubr.bf16.mxu1 %v7770_v1 }
  0xef   : > { %v5330_v23 = vpop.f32.mrf.mxu1 }
  0xf1   : > { %4489 = vmatmul.mubr.msk.bf16.gmra.mxu0 %vm329_vm1, %v5293_v11  ;;  %v5338_v25 = vpop.f32.mrf.mxu1 }
  0xf2   : > { %842 = vmatprep.mubr.bf16.mxu0 %v7770_v1 }
  0xf3   : > { %v5347_v27 = vpop.f32.mrf.mxu1 }
  0xf5   : > { %4591 = vmatmul.mubr.msk.bf16.gmra.mxu1 %vm329_vm1, %v4855_v15  ;;  %v5357_v30 = vpop.f32.mrf.mxu1 }
  0xf6   : > { %1586 = vmatprep.mubr.bf16.mxu1 %v7770_v1 }
  0xf7   : > { %v5366_v34 = vpop.f32.mrf.mxu1 }
  0xf8   : > { %7817 = vst [vmem:[#allocation9_spill] sm:$0xff] %v5366_v34  ;;  %v2399_v34 = vld [vmem:[%s7757_s2 + $0x30] sm:$0xff] }
  0xf9   : > { %4490 = vmatmul.mubr.msk.bf16.gmra.mxu0 %vm329_vm1, %v5310_v17  ;;  %v5379_v41 = vpop.f32.mrf.mxu1 }
  0xfa   : > { %852 = vmatprep.mubr.bf16.mxu0 %v7770_v1  ;;  %7818 = vst [vmem:[#allocation10_spill] sm:$0xff] %v5379_v41  ;;  %v7839_v41 = vmov 0  }
  0xfb   : > { %v5393_v46 = vpop.f32.mrf.mxu1 }
  0xfc   : > { %7820 = vst [vmem:[#allocation12_spill] sm:$0xff] %v5393_v46 }
  0xfd   : > { %4592 = vmatmul.mubr.msk.bf16.gmra.mxu1 %vm329_vm1, %v4857_v19  ;;  %v5403_v50 = vpop.f32.mrf.mxu1  ;;  %v4873_v19 = vld [vmem:[%s7756_s1 + $0x1e8] sm:$0xff]  }
  0xfe   : > { %1596 = vmatprep.mubr.bf16.mxu1 %v7770_v1  ;;  %7821 = vst [vmem:[#allocation13_spill] sm:$0xff] %v5403_v50  ;;  %v2398_v50 = vld [vmem:[%s7757_s2 + $0x28] sm:$0xff] }
  0xff   : > { %v5412_v53 = vpop.f32.mrf.mxu1 }
 0x100   : > { %7823 = vst [vmem:[#allocation15_spill] sm:$0xff] %v5412_v53 }
 0x101   : > { %4491 = vmatmul.mubr.msk.bf16.gmra.mxu0 %vm329_vm1, %v5327_v21  ;;  %v5422_v57 = vpop.f32.mrf.mxu1 }
 0x102   : > { %862 = vmatprep.mubr.bf16.mxu0 %v7770_v1  ;;  %7824 = vst [vmem:[#allocation16_spill] sm:$0xff] %v5422_v57 }
 0x103   : > { %v5431_v14 = vpop.f32.mrf.mxu1 }
 0x104   : > { %7826 = vst [vmem:[#allocation18_spill] sm:$0xff] %v5431_v14 }
 0x105   : > { %4593 = vmatmul.mubr.msk.bf16.gmra.mxu1 %vm329_vm1, %v4859_v24  ;;  %v5439_v59 = vpop.f32.mrf.mxu1 }
 0x106   : > { %1606 = vmatprep.mubr.bf16.mxu1 %v7770_v1  ;;  %7827 = vst [vmem:[#allocation19_spill] sm:$0xff] %v5439_v59 }
 0x107   : > { %v5446_v61 = vpop.f32.mrf.mxu1 }
 0x108   : > { %7828 = vst [vmem:[#allocation20_spill] sm:$0xff] %v5446_v61 }
 0x109   : > { %4492 = vmatmul.mubr.msk.bf16.gmra.mxu0 %vm329_vm1, %v5344_v26  ;;  %v5453_v5 = vpop.f32.mrf.mxu1 }
 0x10a   : > { %1288 = vmatprep.mubr.bf16.mxu0 %v7770_v1  ;;  %7829 = vst [vmem:[#allocation21_spill] sm:$0xff] %v5453_v5 }
 0x10b   : > { %v5460_v15 = vpop.f32.mrf.mxu1 }
 0x10c   : > { %7830 = vst [vmem:[#allocation22_spill] sm:$0xff] %v5460_v15  ;;  %v2555_v15 = vlaneseq }
 0x10d   : > { %4594 = vmatmul.mubr.msk.bf16.gmra.mxu1 %vm329_vm1, %v4861_v29  ;;  %v5467_v24 = vpop.f32.mrf.mxu1  ;;  %v4860_v29 = vld [vmem:[%s7756_s1 + $0x130] sm:$0xff]  }
 0x10e   : > { %2032 = vmatprep.mubr.bf16.mxu1 %v7770_v1  ;;  %7831 = vst [vmem:[#allocation23_spill] sm:$0xff] %v5467_v24  ;;  %v2396_v24 = vld [vmem:[%s7757_s2 + $0x18] sm:$0xff]  ;;  %v5600_v17 = vshrl.u32 %v2555_v15, 7  ;;  %v4169_v15 = vld [vmem:[%s7758_s3 + $0x1] sm:$0x3] }
 0x10f   : > { %v5474_v33 = vpop.f32.mrf.mxu1 }
 0x110   : > { %7832 = vst [vmem:[#allocation24_spill] sm:$0xff] %v5474_v33  ;;  %7837 = vst [vmem:[#allocation29_spill] sm:$0xff] %v5600_v17  ;;  %v7772_v14 = vsub.s32 0, %v5600_v17 }
 0x111   : > { %4553 = vmatmul.mubr.msk.bf16.vlgmr.msra.gmra.mxu0 %vm329_vm1, %v5363_v32  ;;  %v5481_v37 = vpop.f32.mrf.mxu1 }
 0x112   : > { %1767 = vmatpush1.bf16.msra.mxu0 %v1747_v36  ;;  %1298 = vmatprep.mubr.bf16.mxu0 %v7770_v1  ;;  %v4875_v36 = vld [vmem:[%s7756_s1 + $0x1f0] sm:$0xff]   ;;  %7833 = vst [vmem:[#allocation25_spill] sm:$0xff] %v5481_v37  ;;  %v4174_v11 = vrot.slane %v4169_v15, %v7772_v14 }
 0x113   : > { %4688 = vmatprep.subr.msk.bf16.mxu0 %vm354_vm0, %v5216_v56 }
 0x115   : > { %4655 = vmatmul.mubr.msk.bf16.vlgmr.msra.gmra.mxu1 %vm329_vm1, %v4863_v38  ;;  %v4862_v38 = vld [vmem:[%s7756_s1 + $0x138] sm:$0xff]  }
 0x116   : > { %2715 = vmatpush1.bf16.msra.mxu1 %v2695_v42  ;;  %2042 = vmatprep.mubr.bf16.mxu1 %v7770_v1  ;;  %v5488_v42 = vpop.f32.mrf.mxu1 }
 0x117   : > { %4717 = vmatprep.subr.msk.bf16.mxu1 %vm354_vm0, %v5385_v39  ;;  %7834 = vst [vmem:[#allocation26_spill] sm:$0xff] %v5488_v42 }
 0x119   : > { %4554 = vmatmul.mubr.msk.bf16.gmra.mxu0 %vm329_vm1, %v5390_v44 }
 0x11a   : > { %1308 = vmatprep.mubr.bf16.mxu0 %v7770_v1 }
 0x11d   : > { %4656 = vmatmul.mubr.msk.bf16.gmra.mxu1 %vm329_vm1, %v4865_v48  ;;  %v5491_v48 = vpop.permute.xlu0 %2813 }
 0x11e   : > { %2052 = vmatprep.mubr.bf16.mxu1 %v7770_v1 }
 0x121   : > { %4555 = vmatmul.mubr.msk.bf16.gmra.mxu0 %vm329_vm1, %v5409_v52 }
 0x122   : > { %1318 = vmatprep.mubr.bf16.mxu0 %v7770_v1 }
 0x125   : > { %4657 = vmatmul.mubr.msk.bf16.gmra.mxu1 %vm329_vm1, %v4867_v55  ;;  %v4877_v55 = vld [vmem:[%s7756_s1 + $0x1f8] sm:$0xff]  }
 0x126   : > { %2062 = vmatprep.mubr.bf16.mxu1 %v7770_v1 }
 0x129   : > { %4556 = vmatmul.mubr.msk.bf16.gmra.mxu0 %vm329_vm1, %v5428_v58 }
 0x12a   : > { %1328 = vmatprep.mubr.bf16.mxu0 %v7770_v1 }
 0x12d   : > { %4658 = vmatmul.mubr.msk.bf16.gmra.mxu1 %vm329_vm1, %v4869_v13  ;;  %v5497_v13 = vpop.f32.mrf.mxu1 }
 0x12e   : > { %2072 = vmatprep.mubr.bf16.mxu1 %v7770_v1  ;;  %7835 = vst [vmem:[#allocation27_spill] sm:$0xff] %v5497_v13 }
 0x131   : > { %4557 = vmatmul.mubr.msk.bf16.gmra.mxu0 %vm329_vm1, %v4856_v60  ;;  %v2217_v60 = vsel %vm2216_vm10, %v5350_v28, %v5216_v56 }
 0x132   : > { %1338 = vmatprep.mubr.bf16.mxu0 %v7770_v1 }
 0x135   : > { %4659 = vmatmul.mubr.msk.bf16.gmra.mxu1 %vm329_vm1, %v4871_v63  ;;  %v4864_v63 = vld [vmem:[%s7756_s1 + $0x180] sm:$0xff]  }
 0x136   : > { %2082 = vmatprep.mubr.bf16.mxu1 %v7770_v1 }
 0x139   : > { %4558 = vmatmul.mubr.msk.bf16.gmra.mxu0 %vm329_vm1, %v4858_v9  ;;  %v5506_v9 = vpop.f32.mrf.mxu1 }
 0x13a   : > { %1348 = vmatprep.mubr.bf16.mxu0 %v7770_v1  ;;  %7836 = vst [vmem:[#allocation28_spill] sm:$0xff] %v5506_v9 }
 0x13d   : > { %4660 = vmatmul.mubr.msk.bf16.gmra.mxu1 %vm329_vm1, %v4873_v19  ;;  %v2949_v19 = vpop.permute.xlu0 %2948 }
 0x13e   : > { %2092 = vmatprep.mubr.bf16.mxu1 %v7770_v1  ;;  %v2952_v58 = vsel %vm976_vm4, %v2949_v19, %v5385_v39 }
 0x141   : > { %4559 = vmatmul.mubr.msk.bf16.gmra.mxu0 %vm329_vm1, %v4860_v29  ;;  %v5509_v29 = vpop.permute.xlu1 %3116 }
 0x142   : > { %1358 = vmatprep.mubr.bf16.mxu0 %v7770_v1 }
 0x145   : > { %4661 = vmatmul.mubr.msk.bf16.gmra.mxu1 %vm329_vm1, %v4875_v36  ;;  %v2243_v36 = vsel %vm354_vm0, %v2217_v60, 0  ;;  %v2954_v60 = vsel %vm354_vm0, %v2952_v58, 0  ;;  %v5526_v39 = vpop.permute.xlu1 %3283 }
 0x146   : > { %2102 = vmatprep.mubr.bf16.mxu1 %v7770_v1 }
 0x149   : > { %4560 = vmatmul.mubr.msk.bf16.gmra.mxu0 %vm329_vm1, %v4862_v38  ;;  %v4766_v38 = vld.sshfl [vmem:[%s5020_s28 + $0x2] sm:$0x33 pattern:$0x76325410]  ;;  %s4962_s28 = smov 74  }
 0x14a   : > { %1784 = vmatprep.mubr.bf16.mxu0 %v7770_v1  ;;  %v3780_v56 = vcombine.high %v4766_v38, %v4766_v38  ;;  %3781 = vrot.lane.b32.xlu0 %v4766_v38, %s4961_s30 }
 0x14c   : > { %3783 = vrot.lane.b32.xlu1 %v3780_v56, %s4961_s30  ;;  %s4371_s30 = scalar_lea.vmem %s7761_s6, %s5007_s24 }
 0x14d   : > { %4662 = vmatmul.mubr.msk.bf16.gmra.mxu1 %vm329_vm1, %v4877_v55  ;;  %v5518_v55 = vpop.f32.mrf.mxu1 }
 0x14e   : > { %2732 = vmatprep.mubr.bf16.mxu1 %v7770_v1  ;;  %3948 = vrot.lane.b32.xlu0 %v4766_v38, %s4962_s28  ;;  %v2393_v38 = vld [vmem:[%s7757_s2] sm:$0xff] }
 0x150   : > { %3950 = vrot.lane.b32.xlu1 %v3780_v56, %s4962_s28  ;;  %v2394_v56 = vld [vmem:[%s7757_s2 + $0x8] sm:$0xff] }
 0x151   : > { %v5515_v28 = vpop.f32.mrf.mxu0  ;;  %4621 = vmatmul.mubr.msk.bf16.vlgmr.msra.gmra.mxu0 %vm329_vm1, %v4864_v63  ;;  %v4866_v63 = vld [vmem:[%s7756_s1 + $0x188] sm:$0xff]  }
 0x152   : > { %2263 = vmatpush1.bf16.msra.mxu0 %v2243_v36  ;;  %1794 = vmatprep.mubr.bf16.mxu0 %v7770_v1 }
 0x153   : > { %v5521_v52 = vpop.f32.mrf.mxu0  ;;  %4707 = vmatprep.subr.msk.bf16.mxu0 %vm354_vm0, %v5369_v35  ;;  %2411 = vperm.xlu0 %4813, %v2393_v38   ;;  %v4868_v38 = vld [vmem:[%s7756_s1 + $0x190] sm:$0xff]  }
 0x154   : > { %2416 = vperm.xlu1 %4814, %v2394_v56   ;;  %v2395_v56 = vld [vmem:[%s7757_s2 + $0x10] sm:$0xff] }
 0x155   : > { %v5528_v19 = vpop.f32.mrf.mxu0  ;;  %v5533_v36 = vpop.f32.mrf.mxu1  ;;  %4699 = vmatmul.mubr.msk.bf16.vlgmr.msra.gmra.mxu1 %vm329_vm1, %v5083_v22 }
 0x156   : > { %2974 = vmatpush1.bf16.msra.mxu1 %v2954_v60  ;;  %2742 = vmatprep.mubr.bf16.mxu1 %v7770_v1 }
 0x157   : > { %v5538_v58 = vpop.f32.mrf.mxu0  ;;  %v5540_v44 = vpop.f32.mrf.mxu1  ;;  %4737 = vmatprep.subr.msk.bf16.mxu1 %vm354_vm0, %v5526_v39  ;;  %2426 = vperm.xlu0 %4813, %v2396_v24   ;;  %v2397_v24 = vld [vmem:[%s7757_s2 + $0x20] sm:$0xff] }
 0x158   : > { %2421 = vperm.xlu1 %4814, %v2395_v56  }
 0x159   : > { %v5547_v32 = vpop.f32.mrf.mxu0  ;;  %4622 = vmatmul.mubr.msk.bf16.gmra.mxu0 %vm329_vm1, %v4866_v63  ;;  %v5550_v22 = vpop.f32.mrf.mxu1 }
 0x15a   : > { %1804 = vmatprep.mubr.bf16.mxu0 %v7770_v1 }
 0x15b   : > { %v5553_v60 = vpop.f32.mrf.mxu0  ;;  %v5555_v26 = vpop.f32.mrf.mxu1  ;;  %2436 = vperm.xlu0 %4813, %v2398_v50  }
 0x15c   : > { %2431 = vperm.xlu1 %4814, %v2397_v24  }
 0x15d   : > { %v5560_v9 = vpop.f32.mrf.mxu0  ;;  %v5565_v63 = vpop.f32.mrf.mxu1  ;;  %4700 = vmatmul.mubr.msk.bf16.gmra.mxu1 %vm329_vm1, %v5105_v31 }
 0x15e   : > { %2752 = vmatprep.mubr.bf16.mxu1 %v7770_v1 }
 0x15f   : > { %v5570_v13 = vpop.f32.mrf.mxu0  ;;  %v5572_v42 = vpop.f32.mrf.mxu1 }
 0x160   : > { %4179 = vrot.lane.b32.xlu1 %v4174_v11, %s4957_s18 }
 0x161   : > { %v5577_v37 = vpop.f32.mrf.mxu0  ;;  %4623 = vmatmul.mubr.msk.bf16.gmra.mxu0 %vm329_vm1, %v4868_v38  ;;  %v5580_v21 = vpop.f32.mrf.mxu1  ;;  %v4870_v38 = vld [vmem:[%s7756_s1 + $0x198] sm:$0xff]  }
 0x162   : > { %1814 = vmatprep.mubr.bf16.mxu0 %v7770_v1 }
 0x163   : > { %v5583_v31 = vpop.f32.mrf.mxu0  ;;  %v5585_v33 = vpop.f32.mrf.mxu1 }
 0x164   : > { %2441 = vperm.xlu1 %4814, %v2399_v34  }
 0x165   : > { %v5590_v5 = vpop.f32.mrf.mxu0  ;;  %v5595_v56 = vpop.f32.mrf.mxu1  ;;  %4701 = vmatmul.mubr.msk.bf16.gmra.mxu1 %vm329_vm1, %v5127_v40 }
 0x166   : > { %2762 = vmatprep.mubr.bf16.mxu1 %v7770_v1 }
 0x167   : > { %v5602_v61 = vpop.f32.mrf.mxu0  ;;  %v5604_v59 = vpop.f32.mrf.mxu1 }
 0x169   : > { %v5610_v57 = vpop.f32.mrf.mxu0  ;;  %4624 = vmatmul.mubr.msk.bf16.gmra.mxu0 %vm329_vm1, %v4870_v38  ;;  %v5613_v40 = vpop.f32.mrf.mxu1  ;;  %v7774_v38 = vsub.s32 1, %v5600_v17  ;;  %v2400_v17 = vld [vmem:[%s7757_s2 + $0x38] sm:$0xff] }
 0x16a   : > { %1824 = vmatprep.mubr.bf16.mxu0 %v7770_v1  ;;  %v4872_v1 = vld [vmem:[%s7756_s1 + $0x1a0] sm:$0xff]  }
 0x16b   : > { %v5621_v53 = vpop.f32.mrf.mxu0  ;;  %v5623_v24 = vpop.f32.mrf.mxu1  ;;  %v4178_v7 = vrot.slane %v4169_v15, %v7774_v38 }
 0x16d   : > { %v5630_v46 = vpop.f32.mrf.mxu0  ;;  %v5635_v14 = vpop.f32.mrf.mxu1  ;;  %4702 = vmatmul.mubr.msk.bf16.gmra.mxu1 %vm329_vm1, %v5145_v43  ;;  %4181 = vrot.lane.b32.xlu0 %v4178_v7, %s4957_s18  ;;  %v4874_v7 = vld [vmem:[%s7756_s1 + $0x1a8] sm:$0xff]  }
 0x16e   : > { %7838 = vst [vmem:[#allocation30_spill] sm:$0xff] %v5635_v14  ;;  %2772 = vmatprep.mubr.bf16.mxu1 %v7839_v41 }
 0x16f   : > { %v5642_v11 = vpop.f32.mrf.mxu0  ;;  %v5644_v50 = vpop.f32.mrf.mxu1 }
 0x171   : > { %v5650_v14 = vpop.f32.mrf.mxu0  ;;  %4625 = vmatmul.mubr.msk.bf16.gmra.mxu0 %vm329_vm1, %v4872_v1  ;;  %v5653_v43 = vpop.f32.mrf.mxu1  ;;  %2446 = vperm.xlu0 %4813, %v2400_v17   ;;  %v2401_v17 = vld [vmem:[%s7757_s2 + $0x40] sm:$0xff] }
 0x172   : > { %7840 = vst [vmem:[#allocation31_spill] sm:$0xff] %v5653_v43  ;;  %1834 = vmatprep.mubr.bf16.mxu0 %v7839_v41  ;;  %2451 = vperm.xlu1 %4814, %v2401_v17   ;;  %v4876_v17 = vld [vmem:[%s7756_s1 + $0x1b0] sm:$0xff]  }
 0x173   : > { %v5656_v15 = vpop.f32.mrf.mxu0  ;;  %v5658_v38 = vpop.f32.mrf.mxu1 }
 0x174   : > { %7841 = vst [vmem:[#allocation32_spill] sm:$0xff] %v5656_v15  ;;  %7842 = vst [vmem:[#allocation33_spill] sm:$0xff] %v5658_v38 }
 0x175   : > { %v5663_v34 = vpop.f32.mrf.mxu0  ;;  %v5668_v1 = vpop.f32.mrf.mxu1  ;;  %4703 = vmatmul.mubr.msk.bf16.gmra.mxu1 %vm329_vm1, %v5158_v45 }
 0x176   : > { %7843 = vst [vmem:[#allocation34_spill] sm:$0xff] %v5663_v34  ;;  %7844 = vst [vmem:[#allocation35_spill] sm:$0xff] %v5668_v1  ;;  %2782 = vmatprep.mubr.bf16.mxu1 %v7839_v41 }
 0x177   : > { %v5673_v15 = vpop.f32.mrf.mxu0  ;;  %v5675_v38 = vpop.f32.mrf.mxu1 }
 0x178   : > { %7845 = vst [vmem:[#allocation36_spill] sm:$0xff] %v5673_v15  ;;  %7846 = vst [vmem:[#allocation37_spill] sm:$0xff] %v5675_v38  ;;  %v2402_v38 = vld [vmem:[%s7757_s2 + $0x48] sm:$0xff] }
 0x179   : > { %v5680_v34 = vpop.f32.mrf.mxu0  ;;  %4626 = vmatmul.mubr.msk.bf16.gmra.mxu0 %vm329_vm1, %v4874_v7  ;;  %v5683_v43 = vpop.f32.mrf.mxu1  ;;  %2456 = vperm.xlu0 %4813, %v2402_v38   ;;  %v2403_v38 = vld [vmem:[%s7757_s2 + $0x50] sm:$0xff] }
 0x17a   : > { %7847 = vst [vmem:[#allocation38_spill] sm:$0xff] %v5680_v34  ;;  %7848 = vst [vmem:[#allocation39_spill] sm:$0xff] %v5683_v43  ;;  %1844 = vmatprep.mubr.bf16.mxu0 %v7839_v41  ;;  %2461 = vperm.xlu1 %4814, %v2403_v38   ;;  %v4878_v38 = vld [vmem:[%s7756_s1 + $0x1b8] sm:$0xff]  }
 0x17b   : > { %v5686_v45 = vpop.f32.mrf.mxu0  ;;  %v5688_v1 = vpop.f32.mrf.mxu1 }
 0x17c   : > { %7849 = vst [vmem:[#allocation40_spill] sm:$0xff] %v5686_v45  ;;  %7850 = vst [vmem:[#allocation41_spill] sm:$0xff] %v5688_v1 }
 0x17d   : > { %v5693_v15 = vpop.f32.mrf.mxu0  ;;  %v5698_v7 = vpop.f32.mrf.mxu1  ;;  %4704 = vmatmul.mubr.msk.bf16.gmra.mxu1 %vm329_vm1, %v5171_v47 }
 0x17e   : > { %7851 = vst [vmem:[#allocation42_spill] sm:$0xff] %v5693_v15  ;;  %7852 = vst [vmem:[#allocation43_spill] sm:$0xff] %v5698_v7  ;;  %2792 = vmatprep.mubr.bf16.mxu1 %v7839_v41 }
 0x17f   : > { %v5703_v45 = vpop.f32.mrf.mxu0  ;;  %v5705_v1 = vpop.f32.mrf.mxu1 }
 0x180   : > { %7853 = vst [vmem:[#allocation44_spill] sm:$0xff] %v5703_v45  ;;  %7854 = vst [vmem:[#allocation45_spill] sm:$0xff] %v5705_v1  ;;  %v2404_v1 = vld [vmem:[%s7757_s2 + $0x58] sm:$0xff] }
 0x181   : > { %v5710_v15 = vpop.f32.mrf.mxu0  ;;  %4627 = vmatmul.mubr.msk.bf16.gmra.mxu0 %vm329_vm1, %v4876_v17  ;;  %v5713_v43 = vpop.f32.mrf.mxu1  ;;  %2466 = vperm.xlu0 %4813, %v2404_v1   ;;  %v2405_v1 = vld [vmem:[%s7757_s2 + $0x60] sm:$0xff] }
 0x182   : > { %7855 = vst [vmem:[#allocation46_spill] sm:$0xff] %v5710_v15  ;;  %7856 = vst [vmem:[#allocation47_spill] sm:$0xff] %v5713_v43  ;;  %1854 = vmatprep.mubr.bf16.mxu0 %v7839_v41  ;;  %2471 = vperm.xlu1 %4814, %v2405_v1   ;;  %v2818_v1 = vsel %vm2817_vm11, %v5491_v48, %v5369_v35 }
 0x183   : > { %v5716_v47 = vpop.f32.mrf.mxu0  ;;  %v5718_v7 = vpop.f32.mrf.mxu1  ;;  %v2820_v35 = vsel %vm354_vm0, %v2818_v1, 0 }
 0x184   : > { %7857 = vst [vmem:[#allocation48_spill] sm:$0xff] %v5716_v47  ;;  %7858 = vst [vmem:[#allocation49_spill] sm:$0xff] %v5718_v7  ;;  %v5733_v47 = vpop.permute.xlu0 %3114 }
 0x185   : > { %v5723_v45 = vpop.f32.mrf.mxu0  ;;  %v5728_v17 = vpop.f32.mrf.mxu1  ;;  %4705 = vmatmul.mubr.msk.bf16.gmra.mxu1 %vm329_vm1, %v5184_v49  ;;  %7861 = vst [vmem:[#allocation52_spill] sm:$0xff] %v5733_v47 }
 0x186   : > { %7859 = vst [vmem:[#allocation50_spill] sm:$0xff] %v5723_v45  ;;  %7860 = vst [vmem:[#allocation51_spill] sm:$0xff] %v5728_v17  ;;  %2802 = vmatprep.mubr.bf16.mxu1 %v7839_v41 }
 0x187   : > { %v5735_v7 = vpop.f32.mrf.mxu0  ;;  %v5737_v43 = vpop.f32.mrf.mxu1 }
 0x188   : > { %7862 = vst [vmem:[#allocation53_spill] sm:$0xff] %v5735_v7  ;;  %7863 = vst [vmem:[#allocation54_spill] sm:$0xff] %v5737_v43  ;;  %v2406_v43 = vld [vmem:[%s7757_s2 + $0x68] sm:$0xff] }
 0x189   : > { %v5742_v45 = vpop.f32.mrf.mxu0  ;;  %4628 = vmatmul.mubr.msk.bf16.gmra.mxu0 %vm329_vm1, %v4878_v38  ;;  %v5745_v17 = vpop.f32.mrf.mxu1  ;;  %2476 = vperm.xlu0 %4813, %v2406_v43  }
 0x18a   : > { %7864 = vst [vmem:[#allocation55_spill] sm:$0xff] %v5742_v45  ;;  %7865 = vst [vmem:[#allocation56_spill] sm:$0xff] %v5745_v17  ;;  %2280 = vmatprep.mubr.bf16.mxu0 %v7839_v41  ;;  %v3282_v45 = vpop.permute.xlu0 %3281  ;;  %v4879_v17 = vld [vmem:[%s7756_s1 + $0x200] sm:$0xff]  }
 0x18b   : > { %v5748_v49 = vpop.f32.mrf.mxu0  ;;  %v5750_v47 = vpop.f32.mrf.mxu1 }
 0x18c   : > { %7866 = vst [vmem:[#allocation57_spill] sm:$0xff] %v5748_v49  ;;  %7867 = vst [vmem:[#allocation58_spill] sm:$0xff] %v5750_v47  ;;  %v5768_v47 = vpop.permute.xlu1 %3450 }
 0x18d   : > { %v5758_v38 = vpop.f32.mrf.mxu0  ;;  %v5763_v7 = vpop.f32.mrf.mxu1  ;;  %4706 = vmatmul.mubr.msk.bf16.gmra.mxu1 %vm329_vm1, %v5197_v51  ;;  %7870 = vst [vmem:[#allocation61_spill] sm:$0xff] %v5768_v47  ;;  %v3286_v51 = vsel %vm3285_vm12, %v3282_v45, %v5526_v39  ;;  %v581_v47 = vadd.f32 %v5254_v3, %v5521_v52  ;;  %v583_v39 = vadd.f32 %v5257_v4, %v5528_v19 }
 0x18e   : > { %7868 = vst [vmem:[#allocation59_spill] sm:$0xff] %v5758_v38  ;;  %7869 = vst [vmem:[#allocation60_spill] sm:$0xff] %v5763_v7  ;;  %2991 = vmatprep.mubr.bf16.mxu1 %v7839_v41  ;;  %v2407_v38 = vld [vmem:[%s7757_s2 + $0x70] sm:$0xff]  ;;  %v579_v7 = vadd.f32 %v5244_v0, %v5515_v28  ;;  %v3288_v28 = vsel %vm354_vm0, %v3286_v51, 0  ;;  %v585_v4 = vadd.f32 %v5266_v6, %v5538_v58 }
 0x18f   : > { %v471_v48 = vpop.f32.mrf.mxu0  ;;  %v5771_v43 = vpop.f32.mrf.mxu1  ;;  %2481 = vperm.xlu1 %4814, %v2407_v38   ;;  %v589_v38 = vadd.f32 %v5279_v8, %v5547_v32  ;;  %v591_v58 = vadd.f32 %v5287_v10, %v5553_v60  ;;  %v593_v32 = vadd.f32 %v5296_v12, %v5560_v9  ;;  %v4881_v10 = vld [vmem:[%s7756_s1 + $0x210] sm:$0xff]  }
 0x190   : > { %7871 = vst [vmem:[#allocation62_spill] sm:$0xff] %v5771_v43  ;;  %v5779_v49 = vadd.f32 %v5518_v55, %v471_v48  ;;  %v2408_v55 = vld [vmem:[%s7757_s2 + $0x78] sm:$0xff] }
 0x191   : > { %v794_v15 = vpop.f32.mrf.mxu0  ;;  %4689 = vmatmul.mubr.msk.bf16.vlgmr.msra.gmra.mxu0 %vm329_vm1, %v4879_v17  ;;  %v5783_v1 = vpop.f32.mrf.mxu1  ;;  %2486 = vperm.xlu0 %4813, %v2408_v55  }
 0x192   : > { %v873_v43 = vadd.f32 %v794_v15, %v579_v7  ;;  %2840 = vmatpush1.bf16.msra.mxu0 %v2820_v35  ;;  %2290 = vmatprep.mubr.bf16.mxu0 %v7839_v41  ;;  %v5801_v15 = vpop.permute.xlu1 %3616  ;;  %v4880_v7 = vld [vmem:[%s7756_s1 + $0x208] sm:$0xff]  }
 0x193   : > { %v796_v34 = vpop.f32.mrf.mxu0  ;;  %v5788_v0 = vpop.f32.mrf.mxu1  ;;  %4727 = vmatprep.subr.msk.bf16.mxu0 %vm354_vm0, %v5509_v29 }
 0x194   : > { %v874_v3 = vadd.f32 %v796_v34, %v581_v47  ;;  %v5799_v52 = vadd.f32 %v5533_v36, %v873_v43 }
 0x195   : > { %v798_v45 = vpop.f32.mrf.mxu0  ;;  %v5806_v17 = vpop.f32.mrf.mxu1  ;;  %4718 = vmatmul.mubr.msk.bf16.vlgmr.msra.gmra.mxu1 %vm329_vm1, %v5212_v54 }
 0x196   : > { %v875_v19 = vadd.f32 %v798_v45, %v583_v39  ;;  %v5813_v36 = vadd.f32 %v5540_v44, %v874_v3  ;;  %3308 = vmatpush1.bf16.msra.mxu1 %v3288_v28  ;;  %3001 = vmatprep.mubr.bf16.mxu1 %v7839_v41  ;;  %v599_v3 = vadd.f32 %v5313_v18, %v5577_v37 }
 0x197   : > { %v800_v34 = vpop.f32.mrf.mxu0  ;;  %v5816_v47 = vpop.f32.mrf.mxu1  ;;  %4757 = vmatprep.subr.msk.bf16.mxu1 %vm354_vm0, %v5801_v15 }
 0x198   : > { %v876_v54 = vadd.f32 %v800_v34, %v585_v4  ;;  %v5823_v35 = vadd.f32 %v5550_v22, %v875_v19 }
 0x199   : > { %v804_v6 = vpop.f32.mrf.mxu0  ;;  %4690 = vmatmul.mubr.msk.bf16.gmra.mxu0 %vm329_vm1, %v4880_v7  ;;  %v5826_v44 = vpop.f32.mrf.mxu1 }
 0x19a   : > { %v877_v48 = vadd.f32 %v804_v6, %v589_v38  ;;  %2300 = vmatprep.mubr.bf16.mxu0 %v7839_v41  ;;  %v5832_v43 = vadd.f32 %v5555_v26, %v876_v54  ;;  %v595_v26 = vadd.f32 %v5304_v16, %v5570_v13  ;;  %v609_v6 = vadd.f32 %v5347_v27, %v5610_v57  ;;  %v7872_v57 = vld [vmem:[#allocation9_spill] sm:$0xff] }
 0x19b   : > { %v806_v51 = vpop.f32.mrf.mxu0  ;;  %v5834_v8 = vpop.f32.mrf.mxu1 }
 0x19c   : > { %v878_v22 = vadd.f32 %v806_v51, %v591_v58  ;;  %v5839_v28 = vadd.f32 %v5565_v63, %v877_v48 }
 0x19d   : > { %v808_v55 = vpop.f32.mrf.mxu0  ;;  %v5844_v60 = vpop.f32.mrf.mxu1  ;;  %4719 = vmatmul.mubr.msk.bf16.gmra.mxu1 %vm329_vm1, %v5232_v62 }
 0x19e   : > { %v879_v39 = vadd.f32 %v808_v55, %v593_v32  ;;  %v5851_v12 = vadd.f32 %v5572_v42, %v878_v22  ;;  %3011 = vmatprep.mubr.bf16.mxu1 %v7839_v41  ;;  %v601_v42 = vadd.f32 %v5321_v20, %v5583_v31  ;;  %v4882_v20 = vld [vmem:[%s7756_s1 + $0x218] sm:$0xff]  }
 0x19f   : > { %v810_v9 = vpop.f32.mrf.mxu0  ;;  %v5854_v63 = vpop.f32.mrf.mxu1  ;;  %v7873_v55 = vld [vmem:[#allocation30_spill] sm:$0xff] }
 0x1a0   : > { %v880_v45 = vadd.f32 %v810_v9, %v595_v26  ;;  %v5859_v7 = vadd.f32 %v5580_v21, %v879_v39  ;;  %v603_v21 = vadd.f32 %v5330_v23, %v5590_v5  ;;  %v7874_v39 = vld [vmem:[#allocation3_spill] sm:$0xff] }
 0x1a1   : > { %v814_v62 = vpop.f32.mrf.mxu0  ;;  %4691 = vmatmul.mubr.msk.bf16.gmra.mxu0 %vm329_vm1, %v4881_v10  ;;  %v5862_v16 = vpop.f32.mrf.mxu1 }
 0x1a2   : > { %v881_v13 = vadd.f32 %v814_v62, %v599_v3  ;;  %2310 = vmatprep.mubr.bf16.mxu0 %v7839_v41  ;;  %v5868_v4 = vadd.f32 %v5585_v33, %v880_v45  ;;  %v605_v33 = vadd.f32 %v5338_v25, %v5602_v61 }
 0x1a3   : > { %v816_v19 = vpop.f32.mrf.mxu0  ;;  %v5870_v18 = vpop.f32.mrf.mxu1 }
 0x1a4   : > { %v882_v37 = vadd.f32 %v816_v19, %v601_v42  ;;  %v5875_v34 = vadd.f32 %v5595_v56, %v881_v13  ;;  %v7876_v42 = vld [vmem:[#allocation12_spill] sm:$0xff] }
 0x1a5   : > { %v818_v38 = vpop.f32.mrf.mxu0  ;;  %v5880_v31 = vpop.f32.mrf.mxu1  ;;  %4720 = vmatmul.mubr.msk.bf16.gmra.mxu1 %vm329_vm1, %v5251_v2  ;;  %v619_v13 = vadd.f32 %v7876_v42, %v5650_v14 }
 0x1a6   : > { %v883_v54 = vadd.f32 %v818_v38, %v603_v21  ;;  %v5887_v23 = vadd.f32 %v5604_v59, %v882_v37  ;;  %3021 = vmatprep.mubr.bf16.mxu1 %v7839_v41  ;;  %v611_v59 = vadd.f32 %v5357_v30, %v5621_v53  ;;  %v4883_v30 = vld [vmem:[%s7756_s1 + $0x220] sm:$0xff]  }
 0x1a7   : > { %v820_v5 = vpop.f32.mrf.mxu0  ;;  %v5890_v56 = vpop.f32.mrf.mxu1  ;;  %v7877_v21 = vld [vmem:[#allocation31_spill] sm:$0xff] }
 0x1a8   : > { %v884_v58 = vadd.f32 %v820_v5, %v605_v33  ;;  %v5895_v48 = vadd.f32 %v5613_v40, %v883_v54  ;;  %v613_v40 = vadd.f32 %v7872_v57, %v5630_v46  ;;  %v7880_v5 = vld [vmem:[#allocation33_spill] sm:$0xff]  ;;  %v7883_v57 = vld [vmem:[#allocation35_spill] sm:$0xff] }
 0x1a9   : > { %v824_v2 = vpop.f32.mrf.mxu0  ;;  %4692 = vmatmul.mubr.msk.bf16.gmra.mxu0 %vm329_vm1, %v4882_v20  ;;  %v5898_v25 = vpop.f32.mrf.mxu1  ;;  %v7878_v20 = vld [vmem:[#allocation32_spill] sm:$0xff] }
 0x1aa   : > { %v885_v61 = vadd.f32 %v824_v2, %v609_v6  ;;  %2320 = vmatprep.mubr.bf16.mxu0 %v7839_v41  ;;  %v5904_v51 = vadd.f32 %v5623_v24, %v884_v58  ;;  %v7875_v24 = vld [vmem:[#allocation10_spill] sm:$0xff] }
 0x1ab   : > { %v826_v32 = vpop.f32.mrf.mxu0  ;;  %v5906_v27 = vpop.f32.mrf.mxu1  ;;  %v615_v9 = vadd.f32 %v7875_v24, %v5642_v11  ;;  %v7881_v2 = vld [vmem:[#allocation34_spill] sm:$0xff]  ;;  %v7886_v24 = vld [vmem:[#allocation16_spill] sm:$0xff] }
 0x1ac   : > { %v886_v22 = vadd.f32 %v826_v32, %v611_v59  ;;  %v5911_v10 = vadd.f32 %v7873_v55, %v885_v61  ;;  %v7882_v59 = vld [vmem:[#allocation15_spill] sm:$0xff] }
 0x1ad   : > { %v828_v26 = vpop.f32.mrf.mxu0  ;;  %v5916_v53 = vpop.f32.mrf.mxu1  ;;  %4721 = vmatmul.mubr.msk.bf16.gmra.mxu1 %vm329_vm1, %v7874_v39  ;;  %v623_v61 = vadd.f32 %v7882_v59, %v7881_v2  ;;  %v4884_v55 = vld [vmem:[%s7756_s1 + $0x228] sm:$0xff]  }
 0x1ae   : > { %v887_v3 = vadd.f32 %v828_v26, %v613_v40  ;;  %v5923_v46 = vadd.f32 %v5644_v50, %v886_v22  ;;  %3031 = vmatprep.mubr.bf16.mxu1 %v7839_v41  ;;  %v7879_v50 = vld [vmem:[#allocation13_spill] sm:$0xff]  ;;  %v7885_v39 = vld [vmem:[#allocation36_spill] sm:$0xff]  ;;  %v7893_v59 = vld [vmem:[#allocation19_spill] sm:$0xff] }
 0x1af   : > { %v830_v45 = vpop.f32.mrf.mxu0  ;;  %v5926_v62 = vpop.f32.mrf.mxu1  ;;  %v621_v33 = vadd.f32 %v7879_v50, %v7878_v20  ;;  %v7892_v2 = vld [vmem:[#allocation40_spill] sm:$0xff] }
 0x1b0   : > { %v888_v19 = vadd.f32 %v830_v45, %v615_v9  ;;  %v5931_v37 = vadd.f32 %v7877_v21, %v887_v3  ;;  %v625_v9 = vadd.f32 %v7886_v24, %v7885_v39  ;;  %v7887_v45 = vld [vmem:[#allocation37_spill] sm:$0xff]  ;;  %v7888_v21 = vld [vmem:[#allocation38_spill] sm:$0xff] }
 0x1b1   : > { %v834_v38 = vpop.f32.mrf.mxu0  ;;  %4693 = vmatmul.mubr.msk.bf16.gmra.mxu0 %vm329_vm1, %v4883_v30  ;;  %v5934_v11 = vpop.f32.mrf.mxu1  ;;  %v7884_v30 = vld [vmem:[#allocation4_spill] sm:$0xff]  ;;  %v7896_v24 = vld [vmem:[#allocation42_spill] sm:$0xff] }
 0x1b2   : > { %v889_v54 = vadd.f32 %v834_v38, %v619_v13  ;;  %2330 = vmatprep.mubr.bf16.mxu0 %v7839_v41  ;;  %v5940_v6 = vadd.f32 %v7880_v5, %v888_v19  ;;  %v7889_v38 = vld [vmem:[#allocation18_spill] sm:$0xff] }
 0x1b3   : > { %v836_v58 = vpop.f32.mrf.mxu0  ;;  %v5942_v14 = vpop.f32.mrf.mxu1  ;;  %v629_v20 = vadd.f32 %v7889_v38, %v7888_v21  ;;  %v4885_v38 = vld [vmem:[%s7756_s1 + $0x230] sm:$0xff]  }
 0x1b4   : > { %v890_v32 = vadd.f32 %v836_v58, %v621_v33  ;;  %v5947_v40 = vadd.f32 %v7883_v57, %v889_v54  ;;  %v7890_v33 = vld [vmem:[#allocation39_spill] sm:$0xff]  ;;  %v7894_v57 = vld [vmem:[#allocation41_spill] sm:$0xff] }
 0x1b5   : > { %v838_v22 = vpop.f32.mrf.mxu0  ;;  %v5952_v26 = vpop.f32.mrf.mxu1  ;;  %4722 = vmatmul.mubr.msk.bf16.gmra.mxu1 %vm329_vm1, %v7884_v30 }
 0x1b6   : > { %v891_v3 = vadd.f32 %v838_v22, %v623_v61  ;;  %v5959_v42 = vadd.f32 %v7887_v45, %v890_v32  ;;  %3041 = vmatprep.mubr.bf16.mxu1 %v7839_v41  ;;  %v631_v61 = vadd.f32 %v7893_v59, %v7892_v2 }
 0x1b7   : > { %v840_v13 = vpop.f32.mrf.mxu0  ;;  %v5962_v19 = vpop.f32.mrf.mxu1 }
 0x1b8   : > { %v892_v50 = vadd.f32 %v840_v13, %v625_v9  ;;  %v5967_v54 = vadd.f32 %v7890_v33, %v891_v3  ;;  %v7897_v9 = vld [vmem:[#allocation20_spill] sm:$0xff]  ;;  %v7898_v13 = vld [vmem:[#allocation43_spill] sm:$0xff]  ;;  %v7901_v33 = vld [vmem:[#allocation5_spill] sm:$0xff] }
 0x1b9   : > { %v844_v5 = vpop.f32.mrf.mxu0  ;;  %4694 = vmatmul.mubr.msk.bf16.gmra.mxu0 %vm329_vm1, %v4884_v55  ;;  %v5970_v58 = vpop.f32.mrf.mxu1  ;;  %v633_v3 = vadd.f32 %v7897_v9, %v7896_v24  ;;  %v7908_v9 = vld [vmem:[#allocation22_spill] sm:$0xff] }
 0x1ba   : > { %7891 = vst [vmem:[#allocation9_spill] sm:$0xff] %v5970_v58  ;;  %v893_v32 = vadd.f32 %v844_v5, %v629_v20  ;;  %2340 = vmatprep.mubr.bf16.mxu0 %v7839_v41  ;;  %v5976_v22 = vadd.f32 %v7894_v57, %v892_v50  ;;  %v7902_v50 = vld [vmem:[#allocation44_spill] sm:$0xff]  ;;  %v7903_v5 = vld [vmem:[#allocation21_spill] sm:$0xff] }
 0x1bb   : > { %v846_v30 = vpop.f32.mrf.mxu0  ;;  %v5978_v39 = vpop.f32.mrf.mxu1  ;;  %v635_v2 = vadd.f32 %v7903_v5, %v7902_v50  ;;  %v7904_v57 = vld [vmem:[#allocation45_spill] sm:$0xff] }
 0x1bc   : > { %7895 = vst [vmem:[#allocation30_spill] sm:$0xff] %v5978_v39  ;;  %v894_v45 = vadd.f32 %v846_v30, %v631_v61  ;;  %v5983_v55 = vadd.f32 %v7898_v13, %v893_v32  ;;  %v7907_v30 = vld [vmem:[#allocation46_spill] sm:$0xff] }
 0x1bd   : > { %v848_v21 = vpop.f32.mrf.mxu0  ;;  %v5988_v20 = vpop.f32.mrf.mxu1  ;;  %4723 = vmatmul.mubr.msk.bf16.gmra.mxu1 %vm329_vm1, %v7901_v33  ;;  %v639_v13 = vadd.f32 %v7908_v9, %v7907_v30  ;;  %v7919_v9 = vld [vmem:[#allocation51_spill] sm:$0xff] }
 0x1be   : > { %7899 = vst [vmem:[#allocation3_spill] sm:$0xff] %v5983_v55  ;;  %7900 = vst [vmem:[#allocation10_spill] sm:$0xff] %v5988_v20  ;;  %v895_v59 = vadd.f32 %v848_v21, %v633_v3  ;;  %v5995_v24 = vadd.f32 %v7904_v57, %v894_v45  ;;  %3051 = vmatprep.mubr.bf16.mxu1 %v7839_v41  ;;  %v7909_v20 = vld [vmem:[#allocation47_spill] sm:$0xff]  ;;  %v7912_v3 = vld [vmem:[#allocation48_spill] sm:$0xff] }
 0x1bf   : > { %v850_v61 = vpop.f32.mrf.mxu0  ;;  %v5998_v32 = vpop.f32.mrf.mxu1  ;;  %v7913_v45 = vld [vmem:[#allocation23_spill] sm:$0xff]  ;;  %v7914_v57 = vld [vmem:[#allocation49_spill] sm:$0xff] }
 0x1c0   : > { %7905 = vst [vmem:[#allocation12_spill] sm:$0xff] %v5995_v24  ;;  %7906 = vst [vmem:[#allocation31_spill] sm:$0xff] %v5998_v32  ;;  %v896_v39 = vadd.f32 %v850_v61, %v635_v2  ;;  %v6003_v55 = vadd.f32 %v7909_v20, %v895_v59  ;;  %v641_v21 = vadd.f32 %v7913_v45, %v7912_v3  ;;  %v7917_v2 = vld [vmem:[#allocation50_spill] sm:$0xff]  ;;  %v7918_v20 = vld [vmem:[#allocation24_spill] sm:$0xff] }
 0x1c1   : > { %v854_v33 = vpop.f32.mrf.mxu0  ;;  %4695 = vmatmul.mubr.msk.bf16.gmra.mxu0 %vm329_vm1, %v4885_v38  ;;  %v6006_v50 = vpop.f32.mrf.mxu1  ;;  %v643_v59 = vadd.f32 %v7918_v20, %v7917_v2  ;;  %v7922_v3 = vld [vmem:[#allocation6_spill] sm:$0xff]  ;;  %v7924_v45 = vld [vmem:[#allocation25_spill] sm:$0xff]  ;;  %v7928_v20 = vld [vmem:[#allocation55_spill] sm:$0xff] }
 0x1c2   : > { %7910 = vst [vmem:[#allocation32_spill] sm:$0xff] %v6003_v55  ;;  %7911 = vst [vmem:[#allocation13_spill] sm:$0xff] %v6006_v50  ;;  %v897_v5 = vadd.f32 %v854_v33, %v639_v13  ;;  %2350 = vmatprep.mubr.bf16.mxu0 %v7839_v41  ;;  %v6012_v32 = vadd.f32 %v7914_v57, %v896_v39  ;;  %v4886_v13 = vld [vmem:[%s7756_s1 + $0x238] sm:$0xff]   ;;  %v7930_v55 = vld [vmem:[#allocation56_spill] sm:$0xff] }
 0x1c3   : > { %v856_v24 = vpop.f32.mrf.mxu0  ;;  %v6014_v30 = vpop.f32.mrf.mxu1  ;;  %v7923_v39 = vld [vmem:[#allocation53_spill] sm:$0xff] }
 0x1c4   : > { %7915 = vst [vmem:[#allocation33_spill] sm:$0xff] %v6012_v32  ;;  %7916 = vst [vmem:[#allocation34_spill] sm:$0xff] %v6014_v30  ;;  %v898_v61 = vadd.f32 %v856_v24, %v641_v21  ;;  %v6019_v38 = vadd.f32 %v7919_v9, %v897_v5  ;;  %v645_v57 = vadd.f32 %v7924_v45, %v7923_v39  ;;  %v7925_v32 = vld [vmem:[#allocation54_spill] sm:$0xff]  ;;  %v6034_v24 = vpop.permute.xlu0 %3448 }
 0x1c5   : > { %v858_v50 = vpop.f32.mrf.mxu0  ;;  %v6024_v33 = vpop.f32.mrf.mxu1  ;;  %4724 = vmatmul.mubr.msk.bf16.gmra.mxu1 %vm329_vm1, %v7922_v3  ;;  %7926 = vst [vmem:[#allocation4_spill] sm:$0xff] %v6034_v24  ;;  %v7929_v9 = vld [vmem:[#allocation26_spill] sm:$0xff] }
 0x1c6   : > { %7920 = vst [vmem:[#allocation15_spill] sm:$0xff] %v6019_v38  ;;  %7921 = vst [vmem:[#allocation35_spill] sm:$0xff] %v6024_v33  ;;  %v899_v30 = vadd.f32 %v858_v50, %v643_v59  ;;  %v6031_v2 = vadd.f32 %v7925_v32, %v898_v61  ;;  %3061 = vmatprep.mubr.bf16.mxu1 %v7839_v41  ;;  %v649_v33 = vadd.f32 %v7929_v9, %v7928_v20  ;;  %v7933_v50 = vld [vmem:[#allocation57_spill] sm:$0xff]  ;;  %v7934_v59 = vld [vmem:[#allocation27_spill] sm:$0xff] }
 0x1c7   : > { %v860_v21 = vpop.f32.mrf.mxu0  ;;  %v6036_v5 = vpop.f32.mrf.mxu1  ;;  %v651_v61 = vadd.f32 %v7934_v59, %v7933_v50  ;;  %v7935_v45 = vld [vmem:[#allocation58_spill] sm:$0xff]  ;;  %v7941_v59 = vld [vmem:[#allocation7_spill] sm:$0xff] }
 0x1c8   : > { %7927 = vst [vmem:[#allocation36_spill] sm:$0xff] %v6036_v5  ;;  %v900_v38 = vadd.f32 %v860_v21, %v645_v57  ;;  %v6041_v3 = vadd.f32 %v7930_v55, %v899_v30  ;;  %v7937_v55 = vld [vmem:[#allocation59_spill] sm:$0xff]  ;;  %v7938_v30 = vld [vmem:[#allocation28_spill] sm:$0xff]  ;;  %v3615_v50 = vpop.permute.xlu0 %3614 }
 0x1c9   : > { %v864_v58 = vpop.f32.mrf.mxu0  ;;  %4696 = vmatmul.mubr.msk.bf16.gmra.mxu0 %vm329_vm1, %v4886_v13  ;;  %v6044_v32 = vpop.f32.mrf.mxu1  ;;  %v653_v21 = vadd.f32 %v7938_v30, %v7937_v55  ;;  %v7939_v13 = vld [vmem:[#allocation52_spill] sm:$0xff]  ;;  %v3619_v55 = vsel %vm3618_vm14, %v3615_v50, %v5801_v15  ;;  %v7943_v50 = vld [vmem:[#allocation61_spill] sm:$0xff] }
 0x1ca   : > { %7931 = vst [vmem:[#allocation16_spill] sm:$0xff] %v6041_v3  ;;  %7932 = vst [vmem:[#allocation37_spill] sm:$0xff] %v6044_v32  ;;  %v901_v39 = vadd.f32 %v864_v58, %v649_v33  ;;  %2857 = vmatprep.mubr.bf16.mxu0 %v7839_v41  ;;  %v6050_v24 = vadd.f32 %v7935_v45, %v900_v38  ;;  %v3119_v5 = vsel %vm3118_vm13, %v7939_v13, %v5509_v29  ;;  %v7940_v32 = vld [vmem:[#allocation60_spill] sm:$0xff]  ;;  %v7942_v45 = vld [vmem:[#allocation62_spill] sm:$0xff]  ;;  %v6077_v30 = vpop.permute.xlu1 %3783 }
 0x1cb   : > { %v866_v20 = vpop.f32.mrf.mxu0  ;;  %v6052_v57 = vpop.f32.mrf.mxu1 }
 0x1cc   : > { %7936 = vst [vmem:[#allocation38_spill] sm:$0xff] %v6052_v57  ;;  %v902_v9 = vadd.f32 %v866_v20, %v651_v61  ;;  %v6059_v3 = vadd.f32 %v7940_v32, %v901_v39  ;;  %v3121_v61 = vsel %vm354_vm0, %v3119_v5, 0 }
 0x1cd   : > { %v868_v58 = vpop.f32.mrf.mxu0  ;;  %v6061_v33 = vpop.f32.mrf.mxu1  ;;  %4725 = vmatmul.mubr.msk.bf16.gmra.mxu1 %vm329_vm1, %v7941_v59 }
 0x1ce   : > { %v903_v38 = vadd.f32 %v868_v58, %v653_v21  ;;  %v6066_v57 = vadd.f32 %v7942_v45, %v902_v9  ;;  %3325 = vmatprep.mubr.bf16.mxu1 %v7839_v41  ;;  %v4887_v9 = vld [vmem:[%s7756_s1] sm:$0xff]   ;;  %v3621_v58 = vsel %vm354_vm0, %v3619_v55, 0 }
 0x1cf   : > { %v870_v29 = vpop.f32.mrf.mxu0  ;;  %v6070_v20 = vpop.f32.mrf.mxu1 }
 0x1d0   : > { %v904_v32 = vadd.f32 %v870_v29, %v5779_v49  ;;  %v6074_v39 = vadd.f32 %v5783_v1, %v903_v38 }
 0x1d1   : > { %v1290_v21 = vpop.f32.mrf.mxu0  ;;  %4708 = vmatmul.mubr.msk.bf16.vlgmr.msra.gmra.mxu0 %vm329_vm1, %v4887_v9  ;;  %v6083_v5 = vpop.f32.mrf.mxu1 }
 0x1d2   : > { %v1369_v13 = vadd.f32 %v1290_v21, %v5799_v52  ;;  %3141 = vmatpush1.bf16.msra.mxu0 %v3121_v61  ;;  %2867 = vmatprep.mubr.bf16.mxu0 %v7839_v41  ;;  %v6088_v49 = vadd.f32 %v5788_v0, %v904_v32  ;;  %v7944_v61 = vld [vmem:[#allocation8_spill] sm:$0xff]  ;;  %v6108_v32 = vpop.permute.xlu1 %3950 }
 0x1d3   : > { %v1292_v1 = vpop.f32.mrf.mxu0  ;;  %v6090_v15 = vpop.f32.mrf.mxu1  ;;  %4747 = vmatprep.subr.msk.bf16.mxu0 %vm354_vm0, %v7943_v50 }
 0x1d4   : > { %v1370_v59 = vadd.f32 %v1292_v1, %v5813_v36  ;;  %v6097_v38 = vadd.f32 %v5806_v17, %v1369_v13 }
 0x1d5   : > { %v1294_v52 = vpop.f32.mrf.mxu0  ;;  %v6099_v45 = vpop.f32.mrf.mxu1  ;;  %4738 = vmatmul.mubr.msk.bf16.vlgmr.msra.gmra.mxu1 %vm329_vm1, %v7944_v61 }
 0x1d6   : > { %v1371_v0 = vadd.f32 %v1294_v52, %v5823_v35  ;;  %v6105_v29 = vadd.f32 %v5816_v47, %v1370_v59  ;;  %3641 = vmatpush1.bf16.msra.mxu1 %v3621_v58  ;;  %3335 = vmatprep.mubr.bf16.mxu1 %v7839_v41  ;;  %v4888_v47 = vld [vmem:[%s7756_s1 + $0x8] sm:$0xff]  }
 0x1d7   : > { %v1296_v36 = vpop.f32.mrf.mxu0  ;;  %v6110_v55 = vpop.f32.mrf.mxu1  ;;  %4777 = vmatprep.subr.msk.bf16.mxu1 %vm354_vm0, %v6108_v32 }
 0x1d8   : > { %v1372_v17 = vadd.f32 %v1296_v36, %v5832_v43  ;;  %v6116_v21 = vadd.f32 %v5826_v44, %v1371_v0  ;;  %v7945_v0 = vld [vmem:[#allocation11_spill] sm:$0xff] }
 0x1d9   : > { %v1300_v35 = vpop.f32.mrf.mxu0  ;;  %4709 = vmatmul.mubr.msk.bf16.gmra.mxu0 %vm329_vm1, %v4888_v47  ;;  %v6122_v9 = vpop.f32.mrf.mxu1  ;;  %v4889_v47 = vld [vmem:[%s7756_s1 + $0x10] sm:$0xff]  }
 0x1da   : > { %v1373_v13 = vadd.f32 %v1300_v35, %v5839_v28  ;;  %2877 = vmatprep.mubr.bf16.mxu0 %v7839_v41  ;;  %v6127_v1 = vadd.f32 %v5834_v8, %v1372_v17 }
 0x1db   : > { %v1302_v43 = vpop.f32.mrf.mxu0  ;;  %v6129_v58 = vpop.f32.mrf.mxu1 }
 0x1dc   : > { %v1374_v44 = vadd.f32 %v1302_v43, %v5851_v12  ;;  %v6133_v59 = vadd.f32 %v5844_v60, %v1373_v13 }
 0x1dd   : > { %v1304_v52 = vpop.f32.mrf.mxu0  ;;  %v6135_v61 = vpop.f32.mrf.mxu1  ;;  %4739 = vmatmul.mubr.msk.bf16.gmra.mxu1 %vm329_vm1, %v7945_v0 }
 0x1de   : > { %v1375_v28 = vadd.f32 %v1304_v52, %v5859_v7  ;;  %v6141_v36 = vadd.f32 %v5854_v63, %v1374_v44  ;;  %3345 = vmatprep.mubr.bf16.mxu1 %v7839_v41 }
 0x1df   : > { %v1306_v8 = vpop.f32.mrf.mxu0  ;;  %v6144_v17 = vpop.f32.mrf.mxu1 }
 0x1e0   : > { %v1376_v12 = vadd.f32 %v1306_v8, %v5868_v4  ;;  %v6148_v60 = vadd.f32 %v5862_v16, %v1375_v28  ;;  %v7946_v28 = vld [vmem:[#allocation14_spill] sm:$0xff] }
 0x1e1   : > { %v1310_v35 = vpop.f32.mrf.mxu0  ;;  %4710 = vmatmul.mubr.msk.bf16.gmra.mxu0 %vm329_vm1, %v4889_v47  ;;  %v6154_v7 = vpop.f32.mrf.mxu1  ;;  %v4890_v47 = vld [vmem:[%s7756_s1 + $0x18] sm:$0xff]  }
 0x1e2   : > { %v1377_v63 = vadd.f32 %v1310_v35, %v5875_v34  ;;  %2887 = vmatprep.mubr.bf16.mxu0 %v7839_v41  ;;  %v6159_v13 = vadd.f32 %v5870_v18, %v1376_v12 }
 0x1e3   : > { %v1312_v4 = vpop.f32.mrf.mxu0  ;;  %v6161_v43 = vpop.f32.mrf.mxu1 }
 0x1e4   : > { %v1378_v16 = vadd.f32 %v1312_v4, %v5887_v23  ;;  %v6165_v44 = vadd.f32 %v5880_v31, %v1377_v63 }
 0x1e5   : > { %v1314_v52 = vpop.f32.mrf.mxu0  ;;  %v6167_v0 = vpop.f32.mrf.mxu1  ;;  %4740 = vmatmul.mubr.msk.bf16.gmra.mxu1 %vm329_vm1, %v7946_v28 }
 0x1e6   : > { %v1379_v34 = vadd.f32 %v1314_v52, %v5895_v48  ;;  %v6173_v8 = vadd.f32 %v5890_v56, %v1378_v16  ;;  %3355 = vmatprep.mubr.bf16.mxu1 %v7839_v41 }
 0x1e7   : > { %v1316_v18 = vpop.f32.mrf.mxu0  ;;  %v6176_v12 = vpop.f32.mrf.mxu1 }
 0x1e8   : > { %v1380_v23 = vadd.f32 %v1316_v18, %v5904_v51  ;;  %v6180_v31 = vadd.f32 %v5898_v25, %v1379_v34  ;;  %v7947_v34 = vld [vmem:[#allocation17_spill] sm:$0xff] }
 0x1e9   : > { %v1320_v35 = vpop.f32.mrf.mxu0  ;;  %4711 = vmatmul.mubr.msk.bf16.gmra.mxu0 %vm329_vm1, %v4890_v47  ;;  %v6186_v48 = vpop.f32.mrf.mxu1  ;;  %v4891_v47 = vld [vmem:[%s7756_s1 + $0x20] sm:$0xff]  }
 0x1ea   : > { %v1381_v56 = vadd.f32 %v1320_v35, %v5911_v10  ;;  %2897 = vmatprep.mubr.bf16.mxu0 %v7839_v41  ;;  %v6191_v63 = vadd.f32 %v5906_v27, %v1380_v23 }
 0x1eb   : > { %v1322_v51 = vpop.f32.mrf.mxu0  ;;  %v6193_v4 = vpop.f32.mrf.mxu1 }
 0x1ec   : > { %v1382_v25 = vadd.f32 %v1322_v51, %v5923_v46  ;;  %v6197_v16 = vadd.f32 %v5916_v53, %v1381_v56 }
 0x1ed   : > { %v1324_v52 = vpop.f32.mrf.mxu0  ;;  %v6199_v28 = vpop.f32.mrf.mxu1  ;;  %4741 = vmatmul.mubr.msk.bf16.gmra.mxu1 %vm329_vm1, %v7947_v34 }
 0x1ee   : > { %v1383_v10 = vadd.f32 %v1324_v52, %v5931_v37  ;;  %v6205_v18 = vadd.f32 %v5926_v62, %v1382_v25  ;;  %3365 = vmatprep.mubr.bf16.mxu1 %v7839_v41 }
 0x1ef   : > { %v1326_v27 = vpop.f32.mrf.mxu0  ;;  %v6208_v23 = vpop.f32.mrf.mxu1 }
 0x1f0   : > { %v1384_v46 = vadd.f32 %v1326_v27, %v5940_v6  ;;  %v6212_v53 = vadd.f32 %v5934_v11, %v1383_v10 }
 0x1f1   : > { %v1330_v35 = vpop.f32.mrf.mxu0  ;;  %4712 = vmatmul.mubr.msk.bf16.gmra.mxu0 %vm329_vm1, %v4891_v47  ;;  %v6218_v37 = vpop.f32.mrf.mxu1 }
 0x1f2   : > { %v1385_v62 = vadd.f32 %v1330_v35, %v5947_v40  ;;  %2907 = vmatprep.mubr.bf16.mxu0 %v7839_v41  ;;  %v6223_v56 = vadd.f32 %v5942_v14, %v1384_v46  ;;  %v4892_v40 = vld [vmem:[%s7756_s1 + $0x120] sm:$0xff]   ;;  %v7950_v46 = vld [vmem:[#allocation9_spill] sm:$0xff] }
 0x1f3   : > { %v1332_v6 = vpop.f32.mrf.mxu0  ;;  %v6225_v51 = vpop.f32.mrf.mxu1 }
 0x1f4   : > { %v1386_v11 = vadd.f32 %v1332_v6, %v5959_v42  ;;  %v6229_v25 = vadd.f32 %v5952_v26, %v1385_v62  ;;  %v4893_v62 = vld [vmem:[%s7756_s1 + $0x28] sm:$0xff]  }
 0x1f5   : > { %v1334_v52 = vpop.f32.mrf.mxu0  ;;  %v6231_v34 = vpop.f32.mrf.mxu1  ;;  %4742 = vmatmul.mubr.msk.bf16.gmra.mxu1 %vm329_vm1, %v4892_v40 }
 0x1f6   : > { %7948 = vst [vmem:[#allocation18_spill] sm:$0xff] %v6231_v34  ;;  %v1387_v14 = vadd.f32 %v1334_v52, %v5967_v54  ;;  %v6239_v10 = vadd.f32 %v5962_v19, %v1386_v11  ;;  %3375 = vmatprep.mubr.bf16.mxu1 %v7839_v41  ;;  %v7953_v19 = vld [vmem:[#allocation3_spill] sm:$0xff]  ;;  %v7954_v11 = vld [vmem:[#allocation30_spill] sm:$0xff] }
 0x1f7   : > { %v1336_v42 = vpop.f32.mrf.mxu0  ;;  %v6242_v27 = vpop.f32.mrf.mxu1 }
 0x1f8   : > { %7949 = vst [vmem:[#allocation39_spill] sm:$0xff] %v6242_v27  ;;  %v1388_v26 = vadd.f32 %v1336_v42, %v5976_v22  ;;  %v6246_v35 = vadd.f32 %v7950_v46, %v1387_v14  ;;  %v7956_v14 = vld [vmem:[#allocation12_spill] sm:$0xff]  ;;  %v7957_v46 = vld [vmem:[#allocation10_spill] sm:$0xff] }
 0x1f9   : > { %v1340_v47 = vpop.f32.mrf.mxu0  ;;  %4713 = vmatmul.mubr.msk.bf16.gmra.mxu0 %vm329_vm1, %v4893_v62  ;;  %v6252_v54 = vpop.f32.mrf.mxu1  ;;  %v7960_v62 = vld [vmem:[#allocation32_spill] sm:$0xff] }
 0x1fa   : > { %7951 = vst [vmem:[#allocation40_spill] sm:$0xff] %v6246_v35  ;;  %7952 = vst [vmem:[#allocation19_spill] sm:$0xff] %v6252_v54  ;;  %v1389_v6 = vadd.f32 %v1340_v47, %v7953_v19  ;;  %2917 = vmatprep.mubr.bf16.mxu0 %v7839_v41  ;;  %v6257_v52 = vadd.f32 %v7954_v11, %v1388_v26  ;;  %v4894_v47 = vld [vmem:[%s7756_s1 + $0x128] sm:$0xff]  }
 0x1fb   : > { %v1342_v22 = vpop.f32.mrf.mxu0  ;;  %v6259_v40 = vpop.f32.mrf.mxu1  ;;  %v7961_v19 = vld [vmem:[#allocation31_spill] sm:$0xff] }
 0x1fc   : > { %7955 = vst [vmem:[#allocation41_spill] sm:$0xff] %v6259_v40  ;;  %v1390_v42 = vadd.f32 %v1342_v22, %v7956_v14  ;;  %v6263_v27 = vadd.f32 %v7957_v46, %v1389_v6  ;;  %v7964_v6 = vld [vmem:[#allocation33_spill] sm:$0xff] }
 0x1fd   : > { %v1344_v35 = vpop.f32.mrf.mxu0  ;;  %v6265_v34 = vpop.f32.mrf.mxu1  ;;  %4743 = vmatmul.mubr.msk.bf16.gmra.mxu1 %vm329_vm1, %v4894_v47  ;;  %v7965_v40 = vld [vmem:[#allocation13_spill] sm:$0xff] }
 0x1fe   : > { %7958 = vst [vmem:[#allocation42_spill] sm:$0xff] %v6263_v27  ;;  %7959 = vst [vmem:[#allocation20_spill] sm:$0xff] %v6265_v34  ;;  %v1391_v26 = vadd.f32 %v1344_v35, %v7960_v62  ;;  %v6273_v11 = vadd.f32 %v7961_v19, %v1390_v42  ;;  %3385 = vmatprep.mubr.bf16.mxu1 %v7839_v41  ;;  %v4895_v47 = vld [vmem:[%s7756_s1 + $0x30] sm:$0xff]   ;;  %v7967_v42 = vld [vmem:[#allocation15_spill] sm:$0xff] }
 0x1ff   : > { %v1346_v22 = vpop.f32.mrf.mxu0  ;;  %v6276_v14 = vpop.f32.mrf.mxu1  ;;  %v7968_v19 = vld [vmem:[#allocation34_spill] sm:$0xff] }
 0x200   : > { %7962 = vst [vmem:[#allocation43_spill] sm:$0xff] %v6273_v11  ;;  %7963 = vst [vmem:[#allocation5_spill] sm:$0xff] %v6276_v14  ;;  %v1392_v46 = vadd.f32 %v1346_v22, %v7964_v6  ;;  %v6280_v34 = vadd.f32 %v7965_v40, %v1391_v26  ;;  %v7970_v26 = vld [vmem:[#allocation35_spill] sm:$0xff] }
 0x201   : > { %v1350_v27 = vpop.f32.mrf.mxu0  ;;  %4714 = vmatmul.mubr.msk.bf16.gmra.mxu0 %vm329_vm1, %v4895_v47  ;;  %v6286_v35 = vpop.f32.mrf.mxu1  ;;  %v7973_v47 = vld [vmem:[#allocation16_spill] sm:$0xff] }
 0x202   : > { %7966 = vst [vmem:[#allocation44_spill] sm:$0xff] %v6280_v34  ;;  %v1393_v62 = vadd.f32 %v1350_v27, %v7967_v42  ;;  %2927 = vmatprep.mubr.bf16.mxu0 %v7839_v41  ;;  %v6291_v14 = vadd.f32 %v7968_v19, %v1392_v46  ;;  %v4896_v27 = vld [vmem:[%s7756_s1 + $0x130] sm:$0xff]  }
 0x203   : > { %v1352_v22 = vpop.f32.mrf.mxu0  ;;  %v6293_v6 = vpop.f32.mrf.mxu1  ;;  %v7974_v42 = vld [vmem:[#allocation36_spill] sm:$0xff] }
 0x204   : > { %7969 = vst [vmem:[#allocation21_spill] sm:$0xff] %v6293_v6  ;;  %v1394_v40 = vadd.f32 %v1352_v22, %v6031_v2  ;;  %v6297_v34 = vadd.f32 %v7970_v26, %v1393_v62  ;;  %v7976_v26 = vld [vmem:[#allocation37_spill] sm:$0xff]  ;;  %v6316_v6 = vpop.permute.xlu0 %3781 }
 0x205   : > { %v1354_v11 = vpop.f32.mrf.mxu0  ;;  %v6299_v54 = vpop.f32.mrf.mxu1  ;;  %4744 = vmatmul.mubr.msk.bf16.gmra.mxu1 %vm329_vm1, %v4896_v27  ;;  %7977 = vst [vmem:[#allocation47_spill] sm:$0xff] %v6316_v6 }
 0x206   : > { %7971 = vst [vmem:[#allocation45_spill] sm:$0xff] %v6297_v34  ;;  %7972 = vst [vmem:[#allocation46_spill] sm:$0xff] %v6299_v54  ;;  %v1395_v46 = vadd.f32 %v1354_v11, %v7973_v47  ;;  %v6307_v19 = vadd.f32 %v7974_v42, %v1394_v40  ;;  %3395 = vmatprep.mubr.bf16.mxu1 %v7839_v41  ;;  %v4897_v11 = vld [vmem:[%s7756_s1 + $0x38] sm:$0xff]  }
 0x207   : > { %v1356_v2 = vpop.f32.mrf.mxu0  ;;  %v6310_v22 = vpop.f32.mrf.mxu1  ;;  %v7979_v47 = vld [vmem:[#allocation38_spill] sm:$0xff] }
 0x208   : > { %7975 = vst [vmem:[#allocation22_spill] sm:$0xff] %v6310_v22  ;;  %v1396_v62 = vadd.f32 %v1356_v2, %v6050_v24  ;;  %v6314_v54 = vadd.f32 %v7976_v26, %v1395_v46  ;;  %v7980_v26 = vld [vmem:[#allocation4_spill] sm:$0xff] }
 0x209   : > { %v1360_v34 = vpop.f32.mrf.mxu0  ;;  %4715 = vmatmul.mubr.msk.bf16.gmra.mxu0 %vm329_vm1, %v4897_v11  ;;  %v6322_v40 = vpop.f32.mrf.mxu1  ;;  %v3452_v6 = vsel %vm1720_vm6, %v7980_v26, %v7943_v50 }
 0x20a   : > { %7978 = vst [vmem:[#allocation48_spill] sm:$0xff] %v6322_v40  ;;  %v1397_v27 = vadd.f32 %v1360_v34, %v6059_v3  ;;  %3158 = vmatprep.mubr.bf16.mxu0 %v7839_v41  ;;  %v6327_v24 = vadd.f32 %v7979_v47, %v1396_v62  ;;  %v4898_v3 = vld [vmem:[%s7756_s1 + $0x138] sm:$0xff]   ;;  %v3949_v50 = vpop.permute.xlu0 %3948 }
 0x20b   : > { %v1362_v46 = vpop.f32.mrf.mxu0  ;;  %v6329_v42 = vpop.f32.mrf.mxu1  ;;  %v3953_v26 = vsel %vm3952_vm15, %v3949_v50, %v6108_v32 }
 0x20c   : > { %v1398_v2 = vadd.f32 %v1362_v46, %v6066_v57  ;;  %v6336_v11 = vadd.f32 %v6061_v33, %v1397_v27  ;;  %v3454_v33 = vsel %vm354_vm0, %v3452_v6, 0  ;;  %v3955_v32 = vsel %vm354_vm0, %v3953_v26, 0 }
 0x20d   : > { %v1364_v40 = vpop.f32.mrf.mxu0  ;;  %v6338_v22 = vpop.f32.mrf.mxu1  ;;  %4745 = vmatmul.mubr.msk.bf16.gmra.mxu1 %vm329_vm1, %v4898_v3 }
 0x20e   : > { %v1399_v34 = vadd.f32 %v1364_v40, %v6074_v39  ;;  %v6346_v57 = vadd.f32 %v6070_v20, %v1398_v2  ;;  %3658 = vmatprep.mubr.bf16.mxu1 %v7839_v41  ;;  %v4899_v20 = vld [vmem:[%s7756_s1 + $0xc0] sm:$0xff]  }
 0x20f   : > { %v1366_v62 = vpop.f32.mrf.mxu0  ;;  %v6350_v27 = vpop.f32.mrf.mxu1 }
 0x210   : > { %v1400_v47 = vadd.f32 %v1366_v62, %v6088_v49  ;;  %v6354_v46 = vadd.f32 %v6083_v5, %v1399_v34 }
 0x211   : > { %v1786_v3 = vpop.f32.mrf.mxu0  ;;  %4728 = vmatmul.mubr.msk.bf16.vlgmr.msra.gmra.mxu0 %vm329_vm1, %v4899_v20  ;;  %v6361_v39 = vpop.f32.mrf.mxu1  ;;  %v4901_v20 = vld [vmem:[%s7756_s1 + $0xc8] sm:$0xff]  }
 0x212   : > { %v1865_v6 = vadd.f32 %v1786_v3, %v6097_v38  ;;  %3474 = vmatpush1.bf16.msra.mxu0 %v3454_v33  ;;  %3168 = vmatprep.mubr.bf16.mxu0 %v7839_v41  ;;  %v6366_v49 = vadd.f32 %v6090_v15, %v1400_v47  ;;  %v4900_v15 = vld [vmem:[%s7756_s1 + $0x180] sm:$0xff]  }
 0x213   : > { %v1788_v5 = vpop.f32.mrf.mxu0  ;;  %v6368_v40 = vpop.f32.mrf.mxu1  ;;  %4767 = vmatprep.subr.msk.bf16.mxu0 %vm354_vm0, %v6077_v30 }
 0x214   : > { %v1866_v2 = vadd.f32 %v1788_v5, %v6105_v29  ;;  %v6375_v34 = vadd.f32 %v6099_v45, %v1865_v6 }
 0x215   : > { %v1790_v38 = vpop.f32.mrf.mxu0  ;;  %v6377_v50 = vpop.f32.mrf.mxu1  ;;  %4758 = vmatmul.mubr.msk.bf16.vlgmr.msra.gmra.mxu1 %vm329_vm1, %v4900_v15 }
 0x216   : > { %v1867_v33 = vadd.f32 %v1790_v38, %v6116_v21  ;;  %v6385_v62 = vadd.f32 %v6110_v55, %v1866_v2  ;;  %3975 = vmatpush1.bf16.msra.mxu1 %v3955_v32  ;;  %3668 = vmatprep.mubr.bf16.mxu1 %v7839_v41 }
 0x217   : > { %v1792_v29 = vpop.f32.mrf.mxu0  ;;  %v6388_v45 = vpop.f32.mrf.mxu1 }
 0x218   : > { %v1868_v47 = vadd.f32 %v1792_v29, %v6127_v1  ;;  %v6392_v26 = vadd.f32 %v6122_v9, %v1867_v33 }
 0x219   : > { %v1796_v3 = vpop.f32.mrf.mxu0  ;;  %4729 = vmatmul.mubr.msk.bf16.gmra.mxu0 %vm329_vm1, %v4901_v20  ;;  %v6398_v55 = vpop.f32.mrf.mxu1 }
 0x21a   : > { %v1869_v21 = vadd.f32 %v1796_v3, %v6133_v59  ;;  %3178 = vmatprep.mubr.bf16.mxu0 %v7839_v41  ;;  %v6403_v6 = vadd.f32 %v6129_v58, %v1868_v47  ;;  %v4902_v59 = vld [vmem:[%s7756_s1 + $0x188] sm:$0xff]   ;;  %v4903_v3 = vld [vmem:[%s7756_s1 + $0xd0] sm:$0xff]  }
 0x21b   : > { %v1798_v1 = vpop.f32.mrf.mxu0  ;;  %v6405_v5 = vpop.f32.mrf.mxu1 }
 0x21c   : > { %v1870_v9 = vadd.f32 %v1798_v1, %v6141_v36  ;;  %v6409_v32 = vadd.f32 %v6135_v61, %v1869_v21 }
 0x21d   : > { %v1800_v2 = vpop.f32.mrf.mxu0  ;;  %v6411_v38 = vpop.f32.mrf.mxu1  ;;  %4759 = vmatmul.mubr.msk.bf16.gmra.mxu1 %vm329_vm1, %v4902_v59 }
 0x21e   : > { %v1871_v58 = vadd.f32 %v1800_v2, %v6148_v60  ;;  %v6419_v15 = vadd.f32 %v6144_v17, %v1870_v9  ;;  %3678 = vmatprep.mubr.bf16.mxu1 %v7839_v41 }
 0x21f   : > { %v1802_v36 = vpop.f32.mrf.mxu0  ;;  %v6422_v33 = vpop.f32.mrf.mxu1 }
 0x220   : > { %v1872_v61 = vadd.f32 %v1802_v36, %v6159_v13  ;;  %v6426_v29 = vadd.f32 %v6154_v7, %v1871_v58 }
 0x221   : > { %v1806_v47 = vpop.f32.mrf.mxu0  ;;  %4730 = vmatmul.mubr.msk.bf16.gmra.mxu0 %vm329_vm1, %v4903_v3  ;;  %v6432_v60 = vpop.f32.mrf.mxu1 }
 0x222   : > { %v1873_v17 = vadd.f32 %v1806_v47, %v6165_v44  ;;  %3188 = vmatprep.mubr.bf16.mxu0 %v7839_v41  ;;  %v6437_v20 = vadd.f32 %v6161_v43, %v1872_v61  ;;  %v4904_v44 = vld [vmem:[%s7756_s1 + $0x190] sm:$0xff]   ;;  %v4905_v47 = vld [vmem:[%s7756_s1 + $0xd8] sm:$0xff]  }
 0x223   : > { %v1808_v13 = vpop.f32.mrf.mxu0  ;;  %v6439_v21 = vpop.f32.mrf.mxu1 }
 0x224   : > { %v1874_v7 = vadd.f32 %v1808_v13, %v6173_v8  ;;  %v6443_v1 = vadd.f32 %v6167_v0, %v1873_v17 }
 0x225   : > { %v1810_v9 = vpop.f32.mrf.mxu0  ;;  %v6445_v2 = vpop.f32.mrf.mxu1  ;;  %4760 = vmatmul.mubr.msk.bf16.gmra.mxu1 %vm329_vm1, %v4904_v44 }
 0x226   : > { %v1875_v43 = vadd.f32 %v1810_v9, %v6180_v31  ;;  %v6453_v59 = vadd.f32 %v6176_v12, %v1874_v7  ;;  %3688 = vmatprep.mubr.bf16.mxu1 %v7839_v41 }
 0x227   : > { %v1812_v8 = vpop.f32.mrf.mxu0  ;;  %v6456_v58 = vpop.f32.mrf.mxu1 }
 0x228   : > { %v1876_v0 = vadd.f32 %v1812_v8, %v6191_v63  ;;  %v6460_v36 = vadd.f32 %v6186_v48, %v1875_v43 }
 0x229   : > { %v1816_v61 = vpop.f32.mrf.mxu0  ;;  %4731 = vmatmul.mubr.msk.bf16.gmra.mxu0 %vm329_vm1, %v4905_v47  ;;  %v6466_v31 = vpop.f32.mrf.mxu1 }
 0x22a   : > { %7981 = vst [vmem:[#allocation23_spill] sm:$0xff] %v6466_v31  ;;  %v1877_v12 = vadd.f32 %v1816_v61, %v6197_v16  ;;  %3198 = vmatprep.mubr.bf16.mxu0 %v7839_v41  ;;  %v6471_v3 = vadd.f32 %v6193_v4, %v1876_v0  ;;  %v4906_v16 = vld [vmem:[%s7756_s1 + $0x198] sm:$0xff]   ;;  %v4907_v61 = vld [vmem:[%s7756_s1 + $0xe0] sm:$0xff]  }
 0x22b   : > { %v1818_v63 = vpop.f32.mrf.mxu0  ;;  %v6473_v17 = vpop.f32.mrf.mxu1 }
 0x22c   : > { %7982 = vst [vmem:[#allocation49_spill] sm:$0xff] %v6473_v17  ;;  %v1878_v48 = vadd.f32 %v1818_v63, %v6205_v18  ;;  %v6477_v13 = vadd.f32 %v6199_v28, %v1877_v12  ;;  %v7987_v63 = vld [vmem:[#allocation18_spill] sm:$0xff] }
 0x22d   : > { %v1820_v7 = vpop.f32.mrf.mxu0  ;;  %v6479_v9 = vpop.f32.mrf.mxu1  ;;  %4761 = vmatmul.mubr.msk.bf16.gmra.mxu1 %vm329_vm1, %v4906_v16 }
 0x22e   : > { %7983 = vst [vmem:[#allocation50_spill] sm:$0xff] %v6479_v9  ;;  %v1879_v4 = vadd.f32 %v1820_v7, %v6212_v53  ;;  %v6487_v44 = vadd.f32 %v6208_v23, %v1878_v48  ;;  %3698 = vmatprep.mubr.bf16.mxu1 %v7839_v41 }
 0x22f   : > { %v1822_v18 = vpop.f32.mrf.mxu0  ;;  %v6490_v43 = vpop.f32.mrf.mxu1 }
 0x230   : > { %7984 = vst [vmem:[#allocation24_spill] sm:$0xff] %v6490_v43  ;;  %v1880_v28 = vadd.f32 %v1822_v18, %v6223_v56  ;;  %v6494_v8 = vadd.f32 %v6218_v37, %v1879_v4  ;;  %v7989_v4 = vld [vmem:[#allocation40_spill] sm:$0xff]  ;;  %v7990_v18 = vld [vmem:[#allocation39_spill] sm:$0xff] }
 0x231   : > { %v1826_v0 = vpop.f32.mrf.mxu0  ;;  %4732 = vmatmul.mubr.msk.bf16.gmra.mxu0 %vm329_vm1, %v4907_v61  ;;  %v6500_v53 = vpop.f32.mrf.mxu1 }
 0x232   : > { %7985 = vst [vmem:[#allocation51_spill] sm:$0xff] %v6500_v53  ;;  %v1881_v23 = vadd.f32 %v1826_v0, %v6229_v25  ;;  %3208 = vmatprep.mubr.bf16.mxu0 %v7839_v41  ;;  %v6505_v47 = vadd.f32 %v6225_v51, %v1880_v28  ;;  %v4908_v25 = vld [vmem:[%s7756_s1 + $0x1a0] sm:$0xff]  }
 0x233   : > { %v1828_v56 = vpop.f32.mrf.mxu0  ;;  %v6507_v12 = vpop.f32.mrf.mxu1 }
 0x234   : > { %7986 = vst [vmem:[#allocation6_spill] sm:$0xff] %v6507_v12  ;;  %v1882_v37 = vadd.f32 %v1828_v56, %v6239_v10  ;;  %v6511_v48 = vadd.f32 %v7987_v63, %v1881_v23  ;;  %v7992_v23 = vld [vmem:[#allocation19_spill] sm:$0xff] }
 0x235   : > { %v1830_v7 = vpop.f32.mrf.mxu0  ;;  %v6513_v16 = vpop.f32.mrf.mxu1  ;;  %4762 = vmatmul.mubr.msk.bf16.gmra.mxu1 %vm329_vm1, %v4908_v25  ;;  %v4909_v25 = vld [vmem:[%s7756_s1 + $0xe8] sm:$0xff]  }
 0x236   : > { %7988 = vst [vmem:[#allocation53_spill] sm:$0xff] %v6513_v16  ;;  %v1883_v51 = vadd.f32 %v1830_v7, %v7989_v4  ;;  %v6521_v28 = vadd.f32 %v7990_v18, %v1882_v37  ;;  %3708 = vmatprep.mubr.bf16.mxu1 %v7839_v41  ;;  %v7994_v37 = vld [vmem:[#allocation42_spill] sm:$0xff]  ;;  %v7995_v18 = vld [vmem:[#allocation41_spill] sm:$0xff]  ;;  %v7998_v16 = vld [vmem:[#allocation20_spill] sm:$0xff] }
 0x237   : > { %v1832_v10 = vpop.f32.mrf.mxu0  ;;  %v6524_v0 = vpop.f32.mrf.mxu1 }
 0x238   : > { %7991 = vst [vmem:[#allocation25_spill] sm:$0xff] %v6524_v0  ;;  %v1884_v61 = vadd.f32 %v1832_v10, %v6257_v52  ;;  %v6528_v56 = vadd.f32 %v7992_v23, %v1883_v51  ;;  %v7997_v51 = vld [vmem:[#allocation43_spill] sm:$0xff] }
 0x239   : > { %v1836_v63 = vpop.f32.mrf.mxu0  ;;  %4733 = vmatmul.mubr.msk.bf16.gmra.mxu0 %vm329_vm1, %v4909_v25  ;;  %v6534_v7 = vpop.f32.mrf.mxu1  ;;  %v8000_v25 = vld [vmem:[#allocation44_spill] sm:$0xff] }
 0x23a   : > { %7993 = vst [vmem:[#allocation54_spill] sm:$0xff] %v6534_v7  ;;  %v1885_v4 = vadd.f32 %v1836_v63, %v7994_v37  ;;  %3218 = vmatprep.mubr.bf16.mxu0 %v7839_v41  ;;  %v6539_v0 = vadd.f32 %v7995_v18, %v1884_v61  ;;  %v4910_v63 = vld [vmem:[%s7756_s1 + $0x1a8] sm:$0xff]   ;;  %v8001_v37 = vld [vmem:[#allocation5_spill] sm:$0xff] }
 0x23b   : > { %v1838_v52 = vpop.f32.mrf.mxu0  ;;  %v6541_v10 = vpop.f32.mrf.mxu1 }
 0x23c   : > { %7996 = vst [vmem:[#allocation55_spill] sm:$0xff] %v6541_v10  ;;  %v1886_v23 = vadd.f32 %v1838_v52, %v7997_v51  ;;  %v6545_v12 = vadd.f32 %v7998_v16, %v1885_v4 }
 0x23d   : > { %v1840_v53 = vpop.f32.mrf.mxu0  ;;  %v6547_v43 = vpop.f32.mrf.mxu1  ;;  %4763 = vmatmul.mubr.msk.bf16.gmra.mxu1 %vm329_vm1, %v4910_v63  ;;  %v4911_v63 = vld [vmem:[%s7756_s1 + $0xf0] sm:$0xff]  }
 0x23e   : > { %7999 = vst [vmem:[#allocation26_spill] sm:$0xff] %v6547_v43  ;;  %v1887_v61 = vadd.f32 %v1840_v53, %v8000_v25  ;;  %v6555_v18 = vadd.f32 %v8001_v37, %v1886_v23  ;;  %3718 = vmatprep.mubr.bf16.mxu1 %v7839_v41  ;;  %v8004_v23 = vld [vmem:[#allocation45_spill] sm:$0xff] }
 0x23f   : > { %v1842_v52 = vpop.f32.mrf.mxu0  ;;  %v6558_v51 = vpop.f32.mrf.mxu1  ;;  %v8005_v37 = vld [vmem:[#allocation21_spill] sm:$0xff] }
 0x240   : > { %8002 = vst [vmem:[#allocation56_spill] sm:$0xff] %v6558_v51  ;;  %v1888_v16 = vadd.f32 %v1842_v52, %v6291_v14  ;;  %v6562_v4 = vadd.f32 %v6286_v35, %v1887_v61  ;;  %v8007_v61 = vld [vmem:[#allocation46_spill] sm:$0xff] }
 0x241   : > { %v1846_v43 = vpop.f32.mrf.mxu0  ;;  %4734 = vmatmul.mubr.msk.bf16.gmra.mxu0 %vm329_vm1, %v4911_v63  ;;  %v6568_v53 = vpop.f32.mrf.mxu1  ;;  %v8009_v63 = vld [vmem:[#allocation22_spill] sm:$0xff] }
 0x242   : > { %8003 = vst [vmem:[#allocation57_spill] sm:$0xff] %v6568_v53  ;;  %v1889_v25 = vadd.f32 %v1846_v43, %v8004_v23  ;;  %3228 = vmatprep.mubr.bf16.mxu0 %v7839_v41  ;;  %v6573_v51 = vadd.f32 %v8005_v37, %v1888_v16  ;;  %v4912_v43 = vld [vmem:[%s7756_s1 + $0x1b0] sm:$0xff]  }
 0x243   : > { %v1848_v14 = vpop.f32.mrf.mxu0  ;;  %v6575_v52 = vpop.f32.mrf.mxu1 }
 0x244   : > { %8006 = vst [vmem:[#allocation27_spill] sm:$0xff] %v6575_v52  ;;  %v1890_v35 = vadd.f32 %v1848_v14, %v6307_v19  ;;  %v6579_v10 = vadd.f32 %v8007_v61, %v1889_v25  ;;  %v8011_v14 = vld [vmem:[#allocation48_spill] sm:$0xff] }
 0x245   : > { %v1850_v7 = vpop.f32.mrf.mxu0  ;;  %v6581_v9 = vpop.f32.mrf.mxu1  ;;  %4764 = vmatmul.mubr.msk.bf16.gmra.mxu1 %vm329_vm1, %v4912_v43  ;;  %v4913_v43 = vld [vmem:[%s7756_s1 + $0xf8] sm:$0xff]  }
 0x246   : > { %8008 = vst [vmem:[#allocation58_spill] sm:$0xff] %v6581_v9  ;;  %v1891_v16 = vadd.f32 %v1850_v7, %v6314_v54  ;;  %v6589_v23 = vadd.f32 %v8009_v63, %v1890_v35  ;;  %3728 = vmatprep.mubr.bf16.mxu1 %v7839_v41 }
 0x247   : > { %v1852_v19 = vpop.f32.mrf.mxu0  ;;  %v6592_v37 = vpop.f32.mrf.mxu1 }
 0x248   : > { %8010 = vst [vmem:[#allocation59_spill] sm:$0xff] %v6592_v37  ;;  %v1892_v25 = vadd.f32 %v1852_v19, %v6327_v24  ;;  %v6596_v61 = vadd.f32 %v8011_v14, %v1891_v16  ;;  %v8014_v19 = vld [vmem:[#allocation47_spill] sm:$0xff] }
 0x249   : > { %v1856_v9 = vpop.f32.mrf.mxu0  ;;  %4735 = vmatmul.mubr.msk.bf16.gmra.mxu0 %vm329_vm1, %v4913_v43  ;;  %v6602_v54 = vpop.f32.mrf.mxu1  ;;  %v3786_v14 = vsel %vm3785_vm2, %v8014_v19, %v6077_v30 }
 0x24a   : > { %8012 = vst [vmem:[#allocation28_spill] sm:$0xff] %v6602_v54  ;;  %v1893_v7 = vadd.f32 %v1856_v9, %v6336_v11  ;;  %3491 = vmatprep.mubr.bf16.mxu0 %v7839_v41  ;;  %v6607_v35 = vadd.f32 %v6329_v42, %v1892_v25  ;;  %v4914_v11 = vld [vmem:[%s7756_s1 + $0x1b8] sm:$0xff]   ;;  %v3788_v30 = vsel %vm354_vm0, %v3786_v14, 0  ;;  %v6647_v19 = vpop.permute.xlu1 %2416  ;;  %vm2597_vm0 = vcmask 130048  }
 0x24b   : > { %v1858_v24 = vpop.f32.mrf.mxu0  ;;  %v6609_v16 = vpop.f32.mrf.mxu1  ;;  %8019 = vst [vmem:[#allocation8_spill] sm:$0xff] %v6647_v19 }
 0x24c   : > { %8013 = vst [vmem:[#allocation52_spill] sm:$0xff] %v6609_v16  ;;  %v1894_v63 = vadd.f32 %v1858_v24, %v6346_v57  ;;  %v6615_v43 = vadd.f32 %v6338_v22, %v1893_v7  ;;  %v6632_v7 = vpop.permute.xlu0 %2411 }
 0x24d   : > { %v1860_v37 = vpop.f32.mrf.mxu0  ;;  %v6617_v54 = vpop.f32.mrf.mxu1  ;;  %4765 = vmatmul.mubr.msk.bf16.gmra.mxu1 %vm329_vm1, %v4914_v11  ;;  %8017 = vst [vmem:[#allocation62_spill] sm:$0xff] %v6632_v7 }
 0x24e   : > { %8015 = vst [vmem:[#allocation60_spill] sm:$0xff] %v6617_v54  ;;  %v1895_v42 = vadd.f32 %v1860_v37, %v6354_v46  ;;  %v6625_v9 = vadd.f32 %v6350_v27, %v1894_v63  ;;  %3992 = vmatprep.mubr.bf16.mxu1 %v7839_v41  ;;  %v2553_v46 = vld [vmem:[%s7758_s3] sm:$0x3] }
 0x24f   : > { %v1862_v22 = vpop.f32.mrf.mxu0  ;;  %v6629_v57 = vpop.f32.mrf.mxu1  ;;  %v4915_v37 = vld [vmem:[%s7756_s1 + $0x140] sm:$0xff]  }
 0x250   : > { %8016 = vst [vmem:[#allocation7_spill] sm:$0xff] %v6629_v57  ;;  %v1896_v25 = vadd.f32 %v1862_v22, %v6366_v49  ;;  %v6635_v24 = vadd.f32 %v6361_v39, %v1895_v42  ;;  %v8021_v42 = vld [vmem:[#allocation29_spill] sm:$0xff] }
 0x251   : > { %v2282_v27 = vpop.f32.mrf.mxu0  ;;  %4748 = vmatmul.mubr.msk.bf16.vlgmr.msra.gmra.mxu0 %vm329_vm1, %v4915_v37  ;;  %v6644_v63 = vpop.f32.mrf.mxu1  ;;  %v8022_v22 = vsub.s32 0, %v8021_v42 }
 0x252   : > { %8018 = vst [vmem:[#allocation61_spill] sm:$0xff] %v6644_v63  ;;  %v2361_v49 = vadd.f32 %v2282_v27, %v6375_v34  ;;  %3808 = vmatpush1.bf16.msra.mxu0 %v3788_v30  ;;  %3501 = vmatprep.mubr.bf16.mxu0 %v7839_v41  ;;  %v6651_v39 = vadd.f32 %v6368_v40, %v1896_v25  ;;  %v4916_v27 = vld [vmem:[%s7756_s1 + $0x200] sm:$0xff]   ;;  %v8023_v40 = vsub.s32 1, %v8021_v42 }
 0x253   : > { %v2284_v14 = vpop.f32.mrf.mxu0  ;;  %v6653_v11 = vpop.f32.mrf.mxu1  ;;  %v6657_v57 = vrot.slane %v2553_v46, %v8022_v22 }
 0x254   : > { %8020 = vst [vmem:[#allocation11_spill] sm:$0xff] %v6653_v11  ;;  %v2362_v37 = vadd.f32 %v2284_v14, %v6385_v62  ;;  %v2489_v63 = vadd.f32 %v6632_v7, %v2361_v49  ;;  %v6669_v25 = vrot.slane %v2553_v46, %v8023_v40 }
 0x255   : > { %v2286_v34 = vpop.f32.mrf.mxu0  ;;  %v6661_v30 = vpop.f32.mrf.mxu1  ;;  %4778 = vmatmul.mubr.msk.bf16.vlgmr.msra.gmra.mxu1 %vm329_vm1, %v4916_v27 }
 0x256   : > { %v2490_v22 = vadd.f32 %v6632_v7, %v2362_v37  ;;  %v2363_v11 = vadd.f32 %v2286_v34, %v6392_v26  ;;  %v2521_v62 = vmax.f32 %v2489_v63, 0.0  ;;  %4002 = vmatprep.mubr.bf16.mxu1 %v7839_v41  ;;  %v6678_v27 = vpop.permute.xlu1 %2421  ;;  %v4917_v26 = vld [vmem:[%s7756_s1 + $0x148] sm:$0xff]   ;;  %v6695_v7 = vpop.permute.xlu0 %2426 }
 0x257   : > { %v2288_v49 = vpop.f32.mrf.mxu0  ;;  %v6674_v14 = vpop.f32.mrf.mxu1  ;;  %8024 = vst [vmem:[#allocation14_spill] sm:$0xff] %v6678_v27  ;;  %8025 = vst [vmem:[#allocation17_spill] sm:$0xff] %v6695_v7 }
 0x258   : > { %v2522_v54 = vmax.f32 %v2490_v22, 0.0  ;;  %v2491_v16 = vadd.f32 %v6647_v19, %v2363_v11  ;;  %v2364_v52 = vadd.f32 %v2288_v49, %v6403_v6  ;;  %v2565_v46 = vmul.f32 %v6657_v57, %v2521_v62 }
 0x259   : > { %v2292_v42 = vpop.f32.mrf.mxu0  ;;  %4749 = vmatmul.mubr.msk.bf16.gmra.mxu0 %vm329_vm1, %v4917_v26  ;;  %v6685_v63 = vpop.f32.mrf.mxu1 }
 0x25a   : > { %v2492_v37 = vadd.f32 %v6647_v19, %v2364_v52  ;;  %v2365_v11 = vadd.f32 %v2292_v42, %v6409_v32  ;;  %v2566_v6 = vmul.f32 %v6669_v25, %v2522_v54  ;;  %3511 = vmatprep.mubr.bf16.mxu0 %v7839_v41  ;;  %v2523_v34 = vmax.f32 %v2491_v16, 0.0  ;;  %v6698_v52 = vpop.permute.xlu1 %2431  ;;  %v4918_v16 = vld [vmem:[%s7756_s1 + $0x208] sm:$0xff]   ;;  %v6716_v31 = vpop.permute.xlu0 %2436 }
 0x25b   : > { %v2294_v40 = vpop.f32.mrf.mxu0  ;;  %v6691_v22 = vpop.f32.mrf.mxu1  ;;  %8026 = vst [vmem:[#allocation9_spill] sm:$0xff] %v6698_v52  ;;  %8027 = vst [vmem:[#allocation3_spill] sm:$0xff] %v6716_v31 }
 0x25c   : > { %v2524_v62 = vmax.f32 %v2492_v37, 0.0  ;;  %v2493_v49 = vadd.f32 %v6678_v27, %v2365_v11  ;;  %v2366_v26 = vadd.f32 %v2294_v40, %v6419_v15  ;;  %v2598_v53 = vsel %vm2597_vm0, %v2566_v6, 0.0 }
 0x25d   : > { %v2296_v32 = vpop.f32.mrf.mxu0  ;;  %v2599_v42 = vadd.f32 %v2598_v53, %v2565_v46  ;;  %v2567_v54 = vmul.f32 %v6657_v57, %v2523_v34  ;;  %v6701_v19 = vpop.f32.mrf.mxu1  ;;  %4779 = vmatmul.mubr.msk.bf16.gmra.mxu1 %vm329_vm1, %v4918_v16 }
 0x25e   : > { %v2494_v15 = vadd.f32 %v6678_v27, %v2366_v26  ;;  %v2367_v37 = vadd.f32 %v2296_v32, %v6426_v29  ;;  %v2568_v11 = vmul.f32 %v6669_v25, %v2524_v62  ;;  %v2525_v6 = vmax.f32 %v2493_v49, 0.0  ;;  %4012 = vmatprep.mubr.bf16.mxu1 %v7839_v41  ;;  %v4919_v29 = vld [vmem:[%s7756_s1 + $0x150] sm:$0xff]  }
 0x25f   : > { %v2298_v53 = vpop.f32.mrf.mxu0  ;;  %2600 = vadd.xlane.f32.xlu1 %v2599_v42  ;;  %v6711_v46 = vpop.f32.mrf.mxu1 }
 0x260   : > { %v2526_v34 = vmax.f32 %v2494_v15, 0.0  ;;  %v2368_v40 = vadd.f32 %v2298_v53, %v6437_v20  ;;  %v2495_v17 = vadd.f32 %v6695_v7, %v2367_v37  ;;  %v2602_v16 = vsel %vm2597_vm0, %v2568_v11, 0.0  ;;  %v6727_v15 = vpop.permute.xlu1 %4179 }
 0x261   : > { %v2302_v26 = vpop.f32.mrf.mxu0  ;;  %4750 = vmatmul.mubr.msk.bf16.gmra.mxu0 %vm329_vm1, %v4919_v29  ;;  %v2603_v62 = vadd.f32 %v2602_v16, %v2567_v54  ;;  %v2569_v49 = vmul.f32 %v6657_v57, %v2525_v6  ;;  %v6723_v32 = vpop.f32.mrf.mxu1  ;;  %8028 = vst [vmem:[#allocation30_spill] sm:$0xff] %v6727_v15 }
 0x262   : > { %v2496_v20 = vadd.f32 %v6695_v7, %v2368_v40  ;;  %v2369_v42 = vadd.f32 %v2302_v26, %v6443_v1  ;;  %v2570_v37 = vmul.f32 %v6669_v25, %v2526_v34  ;;  %3521 = vmatprep.mubr.bf16.mxu0 %v7839_v41  ;;  %v2527_v11 = vmax.f32 %v2495_v17, 0.0  ;;  %v4920_v17 = vld [vmem:[%s7756_s1 + $0x210] sm:$0xff]  }
 0x263   : > { %v2304_v53 = vpop.f32.mrf.mxu0  ;;  %2604 = vadd.xlane.f32.xlu0 %v2603_v62  ;;  %v6731_v27 = vpop.f32.mrf.mxu1 }
 0x264   : > { %v2528_v54 = vmax.f32 %v2496_v20, 0.0  ;;  %v2497_v6 = vadd.f32 %v6698_v52, %v2369_v42  ;;  %v2370_v16 = vadd.f32 %v2304_v53, %v6453_v59  ;;  %v2606_v40 = vsel %vm2597_vm0, %v2570_v37, 0.0  ;;  %v6745_v20 = vpop.permute.xlu0 %4181 }
 0x265   : > { %v2306_v29 = vpop.f32.mrf.mxu0  ;;  %v2607_v1 = vadd.f32 %v2606_v40, %v2569_v49  ;;  %v2571_v26 = vmul.f32 %v6657_v57, %v2527_v11  ;;  %v6737_v7 = vpop.f32.mrf.mxu1  ;;  %4780 = vmatmul.mubr.msk.bf16.gmra.mxu1 %vm329_vm1, %v4920_v17  ;;  %8029 = vst [vmem:[#allocation12_spill] sm:$0xff] %v6745_v20 }
 0x266   : > { %v2498_v34 = vadd.f32 %v6698_v52, %v2370_v16  ;;  %v2371_v62 = vadd.f32 %v2306_v29, %v6460_v36  ;;  %v2572_v59 = vmul.f32 %v6669_v25, %v2528_v54  ;;  %v2529_v42 = vmax.f32 %v2497_v6, 0.0  ;;  %4022 = vmatprep.mubr.bf16.mxu1 %v7839_v41  ;;  %v6753_v17 = vpop.permute.xlu1 %2441  ;;  %v4921_v54 = vld [vmem:[%s7756_s1 + $0x158] sm:$0xff]  }
 0x267   : > { %v2308_v49 = vpop.f32.mrf.mxu0  ;;  %2608 = vadd.xlane.f32.xlu0 %v2607_v1  ;;  %v6749_v37 = vpop.f32.mrf.mxu1  ;;  %8030 = vst [vmem:[#allocation10_spill] sm:$0xff] %v6753_v17 }
 0x268   : > { %v2530_v11 = vmax.f32 %v2498_v34, 0.0  ;;  %v2372_v53 = vadd.f32 %v2308_v49, %v6471_v3  ;;  %v2499_v40 = vadd.f32 %v6716_v31, %v2371_v62  ;;  %v2610_v36 = vsel %vm2597_vm0, %v2572_v59, 0.0 }
 0x269   : > { %v2312_v16 = vpop.f32.mrf.mxu0  ;;  %4751 = vmatmul.mubr.msk.bf16.gmra.mxu0 %vm329_vm1, %v4921_v54  ;;  %v2611_v6 = vadd.f32 %v2610_v36, %v2571_v26  ;;  %v2573_v29 = vmul.f32 %v6657_v57, %v2529_v42  ;;  %v6761_v1 = vpop.f32.mrf.mxu1 }
 0x26a   : > { %v2500_v3 = vadd.f32 %v6716_v31, %v2372_v53  ;;  %v2373_v34 = vadd.f32 %v2312_v16, %v6477_v13  ;;  %v2574_v62 = vmul.f32 %v6669_v25, %v2530_v11  ;;  %3531 = vmatprep.mubr.bf16.mxu0 %v7839_v41  ;;  %v2531_v59 = vmax.f32 %v2499_v40, 0.0  ;;  %v6771_v36 = vpop.permute.xlu0 %2446  ;;  %v4922_v40 = vld [vmem:[%s7756_s1 + $0x218] sm:$0xff]   ;;  %v6789_v31 = vpop.permute.xlu1 %2451 }
 0x26b   : > { %v2314_v49 = vpop.f32.mrf.mxu0  ;;  %2612 = vadd.xlane.f32.xlu0 %v2611_v6  ;;  %v6767_v52 = vpop.f32.mrf.mxu1  ;;  %8031 = vst [vmem:[#allocation32_spill] sm:$0xff] %v6771_v36  ;;  %8032 = vst [vmem:[#allocation31_spill] sm:$0xff] %v6789_v31 }
 0x26c   : > { %v2532_v15 = vmax.f32 %v2500_v3, 0.0  ;;  %v2501_v26 = vadd.f32 %v6753_v17, %v2373_v34  ;;  %v2374_v42 = vadd.f32 %v2314_v49, %v6487_v44  ;;  %v2614_v53 = vsel %vm2597_vm0, %v2574_v62, 0.0 }
 0x26d   : > { %v2316_v54 = vpop.f32.mrf.mxu0  ;;  %v2615_v13 = vadd.f32 %v2614_v53, %v2573_v29  ;;  %v2575_v11 = vmul.f32 %v6657_v57, %v2531_v59  ;;  %v6775_v16 = vpop.f32.mrf.mxu1  ;;  %4781 = vmatmul.mubr.msk.bf16.gmra.mxu1 %vm329_vm1, %v4922_v40 }
 0x26e   : > { %v2502_v6 = vadd.f32 %v6753_v17, %v2374_v42  ;;  %v2375_v44 = vadd.f32 %v2316_v54, %v6494_v8  ;;  %v2576_v3 = vmul.f32 %v6669_v25, %v2532_v15  ;;  %v2533_v34 = vmax.f32 %v2501_v26, 0.0  ;;  %4032 = vmatprep.mubr.bf16.mxu1 %v7839_v41  ;;  %v4923_v8 = vld [vmem:[%s7756_s1 + $0x160] sm:$0xff]  }
 0x26f   : > { %v2318_v29 = vpop.f32.mrf.mxu0  ;;  %2616 = vadd.xlane.f32.xlu0 %v2615_v13  ;;  %v6785_v62 = vpop.f32.mrf.mxu1 }
 0x270   : > { %v2534_v59 = vmax.f32 %v2502_v6, 0.0  ;;  %v2376_v49 = vadd.f32 %v2318_v29, %v6505_v47  ;;  %v2503_v53 = vadd.f32 %v6771_v36, %v2375_v44  ;;  %v2618_v42 = vsel %vm2597_vm0, %v2576_v3, 0.0 }
 0x271   : > { %v2322_v40 = vpop.f32.mrf.mxu0  ;;  %4752 = vmatmul.mubr.msk.bf16.gmra.mxu0 %vm329_vm1, %v4923_v8  ;;  %v2619_v15 = vadd.f32 %v2618_v42, %v2575_v11  ;;  %v2577_v26 = vmul.f32 %v6657_v57, %v2533_v34  ;;  %v6797_v54 = vpop.f32.mrf.mxu1 }
 0x272   : > { %v2504_v47 = vadd.f32 %v6771_v36, %v2376_v49  ;;  %v2377_v13 = vadd.f32 %v2322_v40, %v6511_v48  ;;  %v2578_v6 = vmul.f32 %v6669_v25, %v2534_v59  ;;  %3541 = vmatprep.mubr.bf16.mxu0 %v7839_v41  ;;  %v2535_v44 = vmax.f32 %v2503_v53, 0.0  ;;  %v6807_v42 = vpop.permute.xlu0 %2456  ;;  %v4924_v53 = vld [vmem:[%s7756_s1 + $0x220] sm:$0xff]   ;;  %v6825_v36 = vpop.permute.xlu1 %2461 }
 0x273   : > { %v2324_v3 = vpop.f32.mrf.mxu0  ;;  %2620 = vadd.xlane.f32.xlu0 %v2619_v15  ;;  %v6803_v29 = vpop.f32.mrf.mxu1  ;;  %8033 = vst [vmem:[#allocation33_spill] sm:$0xff] %v6807_v42  ;;  %8034 = vst [vmem:[#allocation13_spill] sm:$0xff] %v6825_v36 }
 0x274   : > { %v2536_v17 = vmax.f32 %v2504_v47, 0.0  ;;  %v2505_v11 = vadd.f32 %v6789_v31, %v2377_v13  ;;  %v2378_v34 = vadd.f32 %v2324_v3, %v6521_v28  ;;  %v2622_v49 = vsel %vm2597_vm0, %v2578_v6, 0.0 }
 0x275   : > { %v2326_v8 = vpop.f32.mrf.mxu0  ;;  %v2623_v48 = vadd.f32 %v2622_v49, %v2577_v26  ;;  %v2579_v59 = vmul.f32 %v6657_v57, %v2535_v44  ;;  %v6811_v40 = vpop.f32.mrf.mxu1  ;;  %4782 = vmatmul.mubr.msk.bf16.gmra.mxu1 %vm329_vm1, %v4924_v53 }
 0x276   : > { %v2506_v15 = vadd.f32 %v6789_v31, %v2378_v34  ;;  %v2379_v28 = vadd.f32 %v2326_v8, %v6528_v56  ;;  %v2580_v47 = vmul.f32 %v6669_v25, %v2536_v17  ;;  %v2537_v13 = vmax.f32 %v2505_v11, 0.0  ;;  %4042 = vmatprep.mubr.bf16.mxu1 %v7839_v41  ;;  %v4925_v56 = vld [vmem:[%s7756_s1 + $0x168] sm:$0xff]  }
 0x277   : > { %v2328_v26 = vpop.f32.mrf.mxu0  ;;  %2624 = vadd.xlane.f32.xlu0 %v2623_v48  ;;  %v6821_v6 = vpop.f32.mrf.mxu1 }
 0x278   : > { %v2538_v44 = vmax.f32 %v2506_v15, 0.0  ;;  %v2380_v3 = vadd.f32 %v2328_v26, %v6539_v0  ;;  %v2507_v49 = vadd.f32 %v6807_v42, %v2379_v28  ;;  %v2626_v34 = vsel %vm2597_vm0, %v2580_v47, 0.0 }
 0x279   : > { %v2332_v53 = vpop.f32.mrf.mxu0  ;;  %4753 = vmatmul.mubr.msk.bf16.gmra.mxu0 %vm329_vm1, %v4925_v56  ;;  %v2627_v17 = vadd.f32 %v2626_v34, %v2579_v59  ;;  %v2581_v11 = vmul.f32 %v6657_v57, %v2537_v13  ;;  %v6833_v8 = vpop.f32.mrf.mxu1 }
 0x27a   : > { %v2508_v0 = vadd.f32 %v6807_v42, %v2380_v3  ;;  %v2381_v48 = vadd.f32 %v2332_v53, %v6545_v12  ;;  %v2582_v15 = vmul.f32 %v6669_v25, %v2538_v44  ;;  %3551 = vmatprep.mubr.bf16.mxu0 %v7839_v41  ;;  %v2539_v28 = vmax.f32 %v2507_v49, 0.0  ;;  %v6843_v34 = vpop.permute.xlu0 %2466  ;;  %v4926_v44 = vld [vmem:[%s7756_s1 + $0x228] sm:$0xff]   ;;  %v6861_v42 = vpop.permute.xlu1 %2471 }
 0x27b   : > { %v2334_v47 = vpop.f32.mrf.mxu0  ;;  %2628 = vadd.xlane.f32.xlu0 %v2627_v17  ;;  %v6839_v26 = vpop.f32.mrf.mxu1  ;;  %8035 = vst [vmem:[#allocation15_spill] sm:$0xff] %v6843_v34  ;;  %8036 = vst [vmem:[#allocation34_spill] sm:$0xff] %v6861_v42 }
 0x27c   : > { %v2540_v31 = vmax.f32 %v2508_v0, 0.0  ;;  %v2509_v59 = vadd.f32 %v6825_v36, %v2381_v48  ;;  %v2382_v13 = vadd.f32 %v2334_v47, %v6555_v18  ;;  %v2630_v3 = vsel %vm2597_vm0, %v2582_v15, 0.0 }
 0x27d   : > { %v2336_v56 = vpop.f32.mrf.mxu0  ;;  %v2631_v12 = vadd.f32 %v2630_v3, %v2581_v11  ;;  %v6846_v53 = vpop.f32.mrf.mxu1  ;;  %4783 = vmatmul.mubr.msk.bf16.gmra.mxu1 %vm329_vm1, %v4926_v44  ;;  %v2583_v49 = vmul.f32 %v6657_v57, %v2539_v28 }
 0x27e   : > { %v2510_v17 = vadd.f32 %v6825_v36, %v2382_v13  ;;  %v2383_v18 = vadd.f32 %v2336_v56, %v6562_v4  ;;  %4052 = vmatprep.mubr.bf16.mxu1 %v7839_v41  ;;  %v2584_v0 = vmul.f32 %v6669_v25, %v2540_v31  ;;  %v2541_v48 = vmax.f32 %v2509_v59, 0.0  ;;  %v4927_v4 = vld [vmem:[%s7756_s1 + $0x170] sm:$0xff]  }
 0x27f   : > { %v2338_v11 = vpop.f32.mrf.mxu0  ;;  %2632 = vadd.xlane.f32.xlu0 %v2631_v12  ;;  %v6857_v15 = vpop.f32.mrf.mxu1 }
 0x280   : > { %v2542_v47 = vmax.f32 %v2510_v17, 0.0  ;;  %v2384_v3 = vadd.f32 %v2338_v11, %v6573_v51  ;;  %v2511_v44 = vadd.f32 %v6843_v34, %v2383_v18  ;;  %v2634_v28 = vsel %vm2597_vm0, %v2584_v0, 0.0 }
 0x281   : > { %v2342_v13 = vpop.f32.mrf.mxu0  ;;  %4754 = vmatmul.mubr.msk.bf16.gmra.mxu0 %vm329_vm1, %v4927_v4  ;;  %v6868_v31 = vpop.f32.mrf.mxu1  ;;  %v6870_v59 = vadd.f32 %v2634_v28, %v2583_v49  ;;  %v2585_v56 = vmul.f32 %v6657_v57, %v2541_v48 }
 0x282   : > { %v2512_v51 = vadd.f32 %v6843_v34, %v2384_v3  ;;  %v2385_v12 = vadd.f32 %v2342_v13, %v6579_v10  ;;  %3561 = vmatprep.mubr.bf16.mxu0 %v7839_v41  ;;  %v2586_v17 = vmul.f32 %v6669_v25, %v2542_v47  ;;  %v2543_v18 = vmax.f32 %v2511_v44, 0.0  ;;  %v6881_v28 = vpop.permute.xlu0 %2476  ;;  %v4928_v10 = vld [vmem:[%s7756_s1 + $0x230] sm:$0xff]  }
 0x283   : > { %8037 = vst [vmem:[#allocation35_spill] sm:$0xff] %v6870_v59  ;;  %v2344_v0 = vpop.f32.mrf.mxu0  ;;  %v6877_v11 = vpop.f32.mrf.mxu1  ;;  %8038 = vst [vmem:[#allocation16_spill] sm:$0xff] %v6881_v28 }
 0x284   : > { %v2544_v36 = vmax.f32 %v2512_v51, 0.0  ;;  %v2513_v4 = vadd.f32 %v6861_v42, %v2385_v12  ;;  %v2386_v49 = vadd.f32 %v2344_v0, %v6589_v23  ;;  %v2638_v48 = vsel %vm2597_vm0, %v2586_v17, 0.0 }
 0x285   : > { %v2346_v3 = vpop.f32.mrf.mxu0  ;;  %v6884_v34 = vpop.f32.mrf.mxu1  ;;  %4784 = vmatmul.mubr.msk.bf16.gmra.mxu1 %vm329_vm1, %v4928_v10  ;;  %v6890_v47 = vadd.f32 %v2638_v48, %v2585_v56  ;;  %v2587_v44 = vmul.f32 %v6657_v57, %v2543_v18 }
 0x286   : > { %v2514_v13 = vadd.f32 %v6861_v42, %v2386_v49  ;;  %v2387_v23 = vadd.f32 %v2346_v3, %v6596_v61  ;;  %4062 = vmatprep.mubr.bf16.mxu1 %v7839_v41  ;;  %v2588_v51 = vmul.f32 %v6669_v25, %v2544_v36  ;;  %v2545_v12 = vmax.f32 %v2513_v4, 0.0  ;;  %v6901_v48 = vpop.permute.xlu1 %2481  ;;  %v4929_v61 = vld [vmem:[%s7756_s1 + $0x178] sm:$0xff]  }
 0x287   : > { %8039 = vst [vmem:[#allocation36_spill] sm:$0xff] %v6890_v47  ;;  %v2348_v17 = vpop.f32.mrf.mxu0  ;;  %v6897_v0 = vpop.f32.mrf.mxu1  ;;  %8040 = vst [vmem:[#allocation37_spill] sm:$0xff] %v6901_v48 }
 0x288   : > { %v2546_v59 = vmax.f32 %v2514_v13, 0.0  ;;  %v2388_v20 = vadd.f32 %v2348_v17, %v6607_v35  ;;  %v2515_v56 = vadd.f32 %v6881_v28, %v2387_v23  ;;  %v2642_v18 = vsel %vm2597_vm0, %v2588_v51, 0.0 }
 0x289   : > { %v2352_v49 = vpop.f32.mrf.mxu0  ;;  %4755 = vmatmul.mubr.msk.bf16.gmra.mxu0 %vm329_vm1, %v4929_v61  ;;  %v6908_v36 = vpop.f32.mrf.mxu1  ;;  %v6910_v4 = vadd.f32 %v2642_v18, %v2587_v44  ;;  %v2589_v3 = vmul.f32 %v6657_v57, %v2545_v12 }
 0x28a   : > { %v2516_v35 = vadd.f32 %v6881_v28, %v2388_v20  ;;  %v2389_v10 = vadd.f32 %v2352_v49, %v6615_v43  ;;  %3825 = vmatprep.mubr.bf16.mxu0 %v7839_v41  ;;  %v2590_v13 = vmul.f32 %v6669_v25, %v2546_v59  ;;  %v2547_v23 = vmax.f32 %v2515_v56, 0.0  ;;  %v6921_v18 = vpop.permute.xlu0 %2486  ;;  %v4930_v43 = vld [vmem:[%s7756_s1 + $0x238] sm:$0xff]  }
 0x28b   : > { %8041 = vst [vmem:[#allocation38_spill] sm:$0xff] %v6910_v4  ;;  %v2354_v51 = vpop.f32.mrf.mxu0  ;;  %v6917_v17 = vpop.f32.mrf.mxu1  ;;  %8042 = vst [vmem:[#allocation4_spill] sm:$0xff] %v6921_v18 }
 0x28c   : > { %v2548_v42 = vmax.f32 %v2516_v35, 0.0  ;;  %v2517_v61 = vadd.f32 %v6901_v48, %v2389_v10  ;;  %v2390_v44 = vadd.f32 %v2354_v51, %v6625_v9  ;;  %v2646_v12 = vsel %vm2597_vm0, %v2590_v13, 0.0 }
 0x28d   : > { %v2356_v20 = vpop.f32.mrf.mxu0  ;;  %v6924_v28 = vpop.f32.mrf.mxu1  ;;  %4785 = vmatmul.mubr.msk.bf16.gmra.mxu1 %vm329_vm1, %v4930_v43  ;;  %v6930_v59 = vadd.f32 %v2646_v12, %v2589_v3  ;;  %v2591_v56 = vmul.f32 %v6657_v57, %v2547_v23  ;;  %v4931_v23 = vld [vmem:[%s7756_s1 + $0x1c0] sm:$0xff]  }
 0x28e   : > { %8043 = vst [vmem:[#allocation18_spill] sm:$0xff] %v6924_v28  ;;  %v2518_v49 = vadd.f32 %v6901_v48, %v2390_v44  ;;  %v2391_v9 = vadd.f32 %v2356_v20, %v6635_v24  ;;  %v2592_v35 = vmul.f32 %v6669_v25, %v2548_v42  ;;  %v2549_v10 = vmax.f32 %v2517_v61, 0.0 }
 0x28f   : > { %8044 = vst [vmem:[#allocation40_spill] sm:$0xff] %v6930_v59  ;;  %v2358_v13 = vpop.f32.mrf.mxu0  ;;  %v6936_v51 = vpop.f32.mrf.mxu1 }
 0x290   : > { %v2550_v4 = vmax.f32 %v2518_v49, 0.0  ;;  %v2392_v47 = vadd.f32 %v2358_v13, %v6651_v39  ;;  %v2519_v28 = vadd.f32 %v6921_v18, %v2391_v9  ;;  %v2650_v3 = vsel %vm2597_vm0, %v2592_v35, 0.0 }
 0x291   : > { %v2859_v12 = vpop.f32.mrf.mxu0  ;;  %4768 = vmatmul.mubr.msk.bf16.vlgmr.msra.gmra.mxu0 %vm329_vm1, %v4931_v23  ;;  %v6945_v24 = vpop.f32.mrf.mxu1  ;;  %v6947_v42 = vadd.f32 %v2650_v3, %v2591_v56  ;;  %v2593_v61 = vmul.f32 %v6657_v57, %v2549_v10 }
 0x292   : > { %v2520_v44 = vadd.f32 %v6921_v18, %v2392_v47  ;;  %v2860_v39 = vadd.f32 %v2859_v12, %v6377_v50  ;;  %3835 = vmatprep.mubr.bf16.mxu0 %v7839_v41  ;;  %v2594_v20 = vmul.f32 %v6669_v25, %v2550_v4  ;;  %v2551_v43 = vmax.f32 %v2519_v28, 0.0 }
 0x293   : > { %8045 = vst [vmem:[#allocation39_spill] sm:$0xff] %v6947_v42  ;;  %v2861_v49 = vpop.f32.mrf.mxu0  ;;  %v6954_v9 = vpop.f32.mrf.mxu1 }
 0x294   : > { %v2552_v35 = vmax.f32 %v2520_v44, 0.0  ;;  %v2862_v13 = vadd.f32 %v2861_v49, %v6388_v45  ;;  %v6958_v56 = vadd.f32 %v6661_v30, %v2860_v39  ;;  %v2654_v10 = vsel %vm2597_vm0, %v2594_v20, 0.0 }
 0x295   : > { %v2863_v3 = vpop.f32.mrf.mxu0  ;;  %v6961_v47 = vpop.f32.mrf.mxu1  ;;  %v6963_v50 = vadd.f32 %v2654_v10, %v2593_v61  ;;  %v2595_v12 = vmul.f32 %v6657_v57, %v2551_v43 }
 0x296   : > { %v2864_v28 = vadd.f32 %v2863_v3, %v6398_v55  ;;  %v6968_v4 = vadd.f32 %v6674_v14, %v2862_v13  ;;  %v2596_v23 = vmul.f32 %v6669_v25, %v2552_v35  ;;  %v4932_v55 = vld [vmem:[%s7756_s1 + $0x1c8] sm:$0xff]  }
 0x297   : > { %8046 = vst [vmem:[#allocation19_spill] sm:$0xff] %v6963_v50  ;;  %v2865_v45 = vpop.f32.mrf.mxu0  ;;  %v6971_v44 = vpop.f32.mrf.mxu1 }
 0x298   : > { %v2866_v30 = vadd.f32 %v2865_v45, %v6405_v5  ;;  %v6975_v39 = vadd.f32 %v6685_v63, %v2864_v28  ;;  %v2658_v61 = vsel %vm2597_vm0, %v2596_v23, 0.0 }
 0x299   : > { %v2869_v20 = vpop.f32.mrf.mxu0  ;;  %4769 = vmatmul.mubr.msk.bf16.gmra.mxu0 %vm329_vm1, %v4932_v55  ;;  %v6982_v57 = vpop.f32.mrf.mxu1  ;;  %v6984_v25 = vadd.f32 %v2658_v61, %v2595_v12 }
 0x29a   : > { %v2870_v14 = vadd.f32 %v2869_v20, %v6411_v38  ;;  %3845 = vmatprep.mubr.bf16.mxu0 %v7839_v41  ;;  %v6989_v5 = vadd.f32 %v6691_v22, %v2866_v30 }
 0x29b   : > { %8047 = vst [vmem:[#allocation42_spill] sm:$0xff] %v6984_v25  ;;  %v2871_v63 = vpop.f32.mrf.mxu0  ;;  %v6991_v43 = vpop.f32.mrf.mxu1 }
 0x29c   : > { %v2872_v49 = vadd.f32 %v2871_v63, %v6422_v33  ;;  %v6995_v35 = vadd.f32 %v6701_v19, %v2870_v14  ;;  %v4933_v19 = vld [vmem:[%s7756_s1 + $0x1d0] sm:$0xff]   ;;  %v8048_v14 = vld [vmem:[#allocation23_spill] sm:$0xff] }
 0x29d   : > { %v2873_v13 = vpop.f32.mrf.mxu0  ;;  %v6997_v10 = vpop.f32.mrf.mxu1 }
 0x29e   : > { %v2874_v3 = vadd.f32 %v2873_v13, %v6432_v60  ;;  %v7001_v38 = vadd.f32 %v6711_v46, %v2872_v49 }
 0x29f   : > { %v2875_v12 = vpop.f32.mrf.mxu0  ;;  %v7003_v28 = vpop.f32.mrf.mxu1 }
 0x2a0   : > { %v2876_v22 = vadd.f32 %v2875_v12, %v6439_v21  ;;  %v7007_v23 = vadd.f32 %v6723_v32, %v2874_v3 }
 0x2a1   : > { %v2879_v33 = vpop.f32.mrf.mxu0  ;;  %4770 = vmatmul.mubr.msk.bf16.gmra.mxu0 %vm329_vm1, %v4933_v19  ;;  %v7013_v45 = vpop.f32.mrf.mxu1 }
 0x2a2   : > { %v2880_v60 = vadd.f32 %v2879_v33, %v6445_v2  ;;  %3855 = vmatprep.mubr.bf16.mxu0 %v7839_v41  ;;  %v7018_v46 = vadd.f32 %v6731_v27, %v2876_v22  ;;  %v8049_v27 = vld [vmem:[#allocation49_spill] sm:$0xff]  ;;  %v8050_v33 = vld [vmem:[#allocation50_spill] sm:$0xff] }
 0x2a3   : > { %v2881_v21 = vpop.f32.mrf.mxu0  ;;  %v7020_v30 = vpop.f32.mrf.mxu1 }
 0x2a4   : > { %v2882_v32 = vadd.f32 %v2881_v21, %v6456_v58  ;;  %v7024_v61 = vadd.f32 %v6737_v7, %v2880_v60  ;;  %v4934_v7 = vld [vmem:[%s7756_s1 + $0x1d8] sm:$0xff]  }
 0x2a5   : > { %v2883_v20 = vpop.f32.mrf.mxu0  ;;  %v7026_v55 = vpop.f32.mrf.mxu1 }
 0x2a6   : > { %v2884_v63 = vadd.f32 %v2883_v20, %v8048_v14  ;;  %v7030_v2 = vadd.f32 %v6749_v37, %v2882_v32 }
 0x2a7   : > { %v2885_v49 = vpop.f32.mrf.mxu0  ;;  %v7032_v13 = vpop.f32.mrf.mxu1 }
 0x2a8   : > { %v2886_v3 = vadd.f32 %v2885_v49, %v8049_v27  ;;  %v7036_v12 = vadd.f32 %v6761_v1, %v2884_v63  ;;  %v8051_v1 = vld [vmem:[#allocation24_spill] sm:$0xff]  ;;  %v8052_v49 = vld [vmem:[#allocation51_spill] sm:$0xff] }
 0x2a9   : > { %v2889_v58 = vpop.f32.mrf.mxu0  ;;  %4771 = vmatmul.mubr.msk.bf16.gmra.mxu0 %vm329_vm1, %v4934_v7  ;;  %v7042_v22 = vpop.f32.mrf.mxu1 }
 0x2aa   : > { %v2890_v37 = vadd.f32 %v2889_v58, %v8050_v33  ;;  %3865 = vmatprep.mubr.bf16.mxu0 %v7839_v41  ;;  %v7047_v19 = vadd.f32 %v6767_v52, %v2886_v3  ;;  %v8053_v52 = vld [vmem:[#allocation6_spill] sm:$0xff] }
 0x2ab   : > { %v2891_v60 = vpop.f32.mrf.mxu0  ;;  %v7049_v21 = vpop.f32.mrf.mxu1 }
 0x2ac   : > { %v2892_v32 = vadd.f32 %v2891_v60, %v8051_v1  ;;  %v7053_v20 = vadd.f32 %v6775_v16, %v2890_v37  ;;  %v4935_v16 = vld [vmem:[%s7756_s1 + $0x1e0] sm:$0xff]   ;;  %v8054_v1 = vld [vmem:[#allocation53_spill] sm:$0xff] }
 0x2ad   : > { %v2893_v14 = vpop.f32.mrf.mxu0  ;;  %v7055_v63 = vpop.f32.mrf.mxu1 }
 0x2ae   : > { %v2894_v27 = vadd.f32 %v2893_v14, %v8052_v49  ;;  %v7059_v58 = vadd.f32 %v6785_v62, %v2892_v32 }
 0x2af   : > { %v2895_v7 = vpop.f32.mrf.mxu0  ;;  %v7061_v33 = vpop.f32.mrf.mxu1 }
 0x2b0   : > { %v2896_v3 = vadd.f32 %v2895_v7, %v8053_v52  ;;  %v7065_v18 = vadd.f32 %v6797_v54, %v2894_v27  ;;  %v8055_v54 = vld [vmem:[#allocation25_spill] sm:$0xff] }
 0x2b1   : > { %v2899_v60 = vpop.f32.mrf.mxu0  ;;  %4772 = vmatmul.mubr.msk.bf16.gmra.mxu0 %vm329_vm1, %v4935_v16  ;;  %v7071_v37 = vpop.f32.mrf.mxu1  ;;  %v8056_v16 = vld [vmem:[#allocation54_spill] sm:$0xff] }
 0x2b2   : > { %v2900_v62 = vadd.f32 %v2899_v60, %v8054_v1  ;;  %3875 = vmatprep.mubr.bf16.mxu0 %v7839_v41  ;;  %v7076_v32 = vadd.f32 %v6803_v29, %v2896_v3  ;;  %v8058_v29 = vld [vmem:[#allocation55_spill] sm:$0xff] }
 0x2b3   : > { %v2901_v14 = vpop.f32.mrf.mxu0  ;;  %v7078_v49 = vpop.f32.mrf.mxu1 }
 0x2b4   : > { %v2902_v27 = vadd.f32 %v2901_v14, %v8055_v54  ;;  %v7082_v7 = vadd.f32 %v6811_v40, %v2900_v62  ;;  %v4936_v40 = vld [vmem:[%s7756_s1 + $0x1e8] sm:$0xff]   ;;  %v8060_v54 = vld [vmem:[#allocation26_spill] sm:$0xff] }
 0x2b5   : > { %v2903_v52 = vpop.f32.mrf.mxu0  ;;  %v7084_v48 = vpop.f32.mrf.mxu1 }
 0x2b6   : > { %v2904_v25 = vadd.f32 %v2903_v52, %v8056_v16  ;;  %v7088_v60 = vadd.f32 %v6821_v6, %v2902_v27 }
 0x2b7   : > { %v2905_v1 = vpop.f32.mrf.mxu0  ;;  %v7090_v50 = vpop.f32.mrf.mxu1 }
 0x2b8   : > { %8057 = vst [vmem:[#allocation41_spill] sm:$0xff] %v7090_v50  ;;  %v2906_v3 = vadd.f32 %v2905_v1, %v8058_v29  ;;  %v7094_v42 = vadd.f32 %v6833_v8, %v2904_v25  ;;  %v8062_v8 = vld [vmem:[#allocation56_spill] sm:$0xff] }
 0x2b9   : > { %v2909_v14 = vpop.f32.mrf.mxu0  ;;  %4773 = vmatmul.mubr.msk.bf16.gmra.mxu0 %vm329_vm1, %v4936_v40  ;;  %v7100_v62 = vpop.f32.mrf.mxu1  ;;  %v8063_v40 = vld [vmem:[#allocation57_spill] sm:$0xff] }
 0x2ba   : > { %8059 = vst [vmem:[#allocation43_spill] sm:$0xff] %v7100_v62  ;;  %v2910_v6 = vadd.f32 %v2909_v14, %v8060_v54  ;;  %3885 = vmatprep.mubr.bf16.mxu0 %v7839_v41  ;;  %v7105_v27 = vadd.f32 %v6839_v26, %v2906_v3  ;;  %v8065_v26 = vld [vmem:[#allocation27_spill] sm:$0xff] }
 0x2bb   : > { %v2911_v52 = vpop.f32.mrf.mxu0  ;;  %v7107_v16 = vpop.f32.mrf.mxu1 }
 0x2bc   : > { %8061 = vst [vmem:[#allocation20_spill] sm:$0xff] %v7107_v16  ;;  %v2912_v25 = vadd.f32 %v2911_v52, %v8062_v8  ;;  %v7111_v1 = vadd.f32 %v6846_v53, %v2910_v6  ;;  %v4937_v53 = vld [vmem:[%s7756_s1 + $0x1f0] sm:$0xff]   ;;  %v8067_v8 = vld [vmem:[#allocation58_spill] sm:$0xff] }
 0x2bd   : > { %v2913_v29 = vpop.f32.mrf.mxu0  ;;  %v7113_v59 = vpop.f32.mrf.mxu1 }
 0x2be   : > { %v2914_v62 = vadd.f32 %v2913_v29, %v8063_v40  ;;  %v7117_v14 = vadd.f32 %v6857_v15, %v2912_v25 }
 0x2bf   : > { %v2915_v54 = vpop.f32.mrf.mxu0  ;;  %v7119_v50 = vpop.f32.mrf.mxu1 }
 0x2c0   : > { %8064 = vst [vmem:[#allocation44_spill] sm:$0xff] %v7119_v50  ;;  %v2916_v3 = vadd.f32 %v2915_v54, %v8065_v26  ;;  %v7123_v16 = vadd.f32 %v6868_v31, %v2914_v62  ;;  %v8069_v31 = vld [vmem:[#allocation59_spill] sm:$0xff] }
 0x2c1   : > { %v2919_v52 = vpop.f32.mrf.mxu0  ;;  %4774 = vmatmul.mubr.msk.bf16.gmra.mxu0 %vm329_vm1, %v4937_v53  ;;  %v7129_v6 = vpop.f32.mrf.mxu1  ;;  %v8071_v53 = vld [vmem:[#allocation28_spill] sm:$0xff] }
 0x2c2   : > { %8066 = vst [vmem:[#allocation5_spill] sm:$0xff] %v7129_v6  ;;  %v2920_v15 = vadd.f32 %v2919_v52, %v8067_v8  ;;  %3895 = vmatprep.mubr.bf16.mxu0 %v7839_v41  ;;  %v7134_v25 = vadd.f32 %v6877_v11, %v2916_v3  ;;  %v8073_v11 = vld [vmem:[#allocation52_spill] sm:$0xff] }
 0x2c3   : > { %v2921_v29 = vpop.f32.mrf.mxu0  ;;  %v7136_v40 = vpop.f32.mrf.mxu1 }
 0x2c4   : > { %8068 = vst [vmem:[#allocation45_spill] sm:$0xff] %v7136_v40  ;;  %v2922_v62 = vadd.f32 %v2921_v29, %v8069_v31  ;;  %v7140_v54 = vadd.f32 %v6884_v34, %v2920_v15  ;;  %v4938_v34 = vld [vmem:[%s7756_s1 + $0x1f8] sm:$0xff]   ;;  %v8076_v31 = vld [vmem:[#allocation60_spill] sm:$0xff] }
 0x2c5   : > { %v2923_v26 = vpop.f32.mrf.mxu0  ;;  %v7142_v50 = vpop.f32.mrf.mxu1 }
 0x2c6   : > { %8070 = vst [vmem:[#allocation21_spill] sm:$0xff] %v7142_v50  ;;  %v2924_v6 = vadd.f32 %v2923_v26, %v8071_v53  ;;  %v7146_v52 = vadd.f32 %v6897_v0, %v2922_v62  ;;  %v8080_v50 = vld [vmem:[#allocation61_spill] sm:$0xff] }
 0x2c7   : > { %v2925_v41 = vpop.f32.mrf.mxu0  ;;  %v7148_v8 = vpop.f32.mrf.mxu1 }
 0x2c8   : > { %8072 = vst [vmem:[#allocation46_spill] sm:$0xff] %v7148_v8  ;;  %v2926_v3 = vadd.f32 %v2925_v41, %v8073_v11  ;;  %v7152_v40 = vadd.f32 %v6908_v36, %v2924_v6  ;;  %v8078_v41 = vld [vmem:[#allocation7_spill] sm:$0xff]  ;;  %v8079_v6 = vld [vmem:[#allocation18_spill] sm:$0xff] }
 0x2c9   : > { %v2929_v29 = vpop.f32.mrf.mxu0  ;;  %4775 = vmatmul.mubr.msk.bf16.gmra.mxu0 %vm329_vm1, %v4938_v34  ;;  %v7158_v15 = vpop.f32.mrf.mxu1  ;;  %vm4331_vm1 = vcmask 7168  }
 0x2ca   : > { %8074 = vst [vmem:[#allocation22_spill] sm:$0xff] %v7152_v40  ;;  %8075 = vst [vmem:[#allocation48_spill] sm:$0xff] %v7158_v15  ;;  %v2930_v0 = vadd.f32 %v2929_v29, %v8076_v31  ;;  %v7162_v62 = vadd.f32 %v6917_v17, %v2926_v3  ;;  %v8081_v17 = vld [vmem:[#allocation11_spill] sm:$0xff] }
 0x2cb   : > { %v2931_v26 = vpop.f32.mrf.mxu0  ;;  %v7164_v53 = vpop.f32.mrf.mxu1 }
 0x2cc   : > { %8077 = vst [vmem:[#allocation47_spill] sm:$0xff] %v7164_v53  ;;  %v2932_v36 = vadd.f32 %v2931_v26, %v8078_v41  ;;  %v7168_v11 = vadd.f32 %v8079_v6, %v2930_v0 }
 0x2cd   : > { %v2933_v8 = vpop.f32.mrf.mxu0  ;;  %v7170_v40 = vpop.f32.mrf.mxu1 }
 0x2ce   : > { %v2934_v34 = vadd.f32 %v2933_v8, %v8080_v50  ;;  %v7174_v15 = vadd.f32 %v6936_v51, %v2932_v36 }
 0x2cf   : > { %v2935_v29 = vpop.f32.mrf.mxu0  ;;  %v7176_v31 = vpop.f32.mrf.mxu1 }
 0x2d0   : > { %v2936_v3 = vadd.f32 %v2935_v29, %v8081_v17  ;;  %v7180_v53 = vadd.f32 %v6945_v24, %v2934_v34 }
 0x2d1   : > { %v3160_v26 = vpop.f32.mrf.mxu0  ;;  %v7182_v41 = vpop.f32.mrf.mxu1 }
 0x2d2   : > { %v3239_v0 = vadd.f32 %v3160_v26, %v6958_v56  ;;  %v7186_v6 = vadd.f32 %v6954_v9, %v2936_v3 }
 0x2d3   : > { %v3162_v50 = vpop.f32.mrf.mxu0  ;;  %v7188_v8 = vpop.f32.mrf.mxu1 }
 0x2d4   : > { %v3240_v51 = vadd.f32 %v3162_v50, %v6968_v4  ;;  %v7192_v36 = vadd.f32 %v6961_v47, %v3239_v0 }
 0x2d5   : > { %v3164_v29 = vpop.f32.mrf.mxu0  ;;  %v7194_v17 = vpop.f32.mrf.mxu1 }
 0x2d6   : > { %v3241_v24 = vadd.f32 %v3164_v29, %v6975_v39  ;;  %v7198_v34 = vadd.f32 %v6971_v44, %v3240_v51 }
 0x2d7   : > { %v3166_v56 = vpop.f32.mrf.mxu0  ;;  %v7200_v26 = vpop.f32.mrf.mxu1 }
 0x2d8   : > { %v3242_v9 = vadd.f32 %v3166_v56, %v6989_v5  ;;  %v7204_v3 = vadd.f32 %v6982_v57, %v3241_v24 }
 0x2d9   : > { %v3170_v4 = vpop.f32.mrf.mxu0  ;;  %v7206_v50 = vpop.f32.mrf.mxu1 }
 0x2da   : > { %v3243_v47 = vadd.f32 %v3170_v4, %v6995_v35  ;;  %v7210_v0 = vadd.f32 %v6991_v43, %v3242_v9 }
 0x2db   : > { %v3172_v39 = vpop.f32.mrf.mxu0  ;;  %v7212_v29 = vpop.f32.mrf.mxu1 }
 0x2dc   : > { %v3244_v44 = vadd.f32 %v3172_v39, %v7001_v38  ;;  %v7216_v51 = vadd.f32 %v6997_v10, %v3243_v47 }
 0x2dd   : > { %v3174_v5 = vpop.f32.mrf.mxu0  ;;  %v7218_v56 = vpop.f32.mrf.mxu1 }
 0x2de   : > { %v3245_v57 = vadd.f32 %v3174_v5, %v7007_v23  ;;  %v7222_v24 = vadd.f32 %v7003_v28, %v3244_v44 }
 0x2df   : > { %v3176_v35 = vpop.f32.mrf.mxu0  ;;  %v7224_v4 = vpop.f32.mrf.mxu1 }
 0x2e0   : > { %v3246_v43 = vadd.f32 %v3176_v35, %v7018_v46  ;;  %v7228_v9 = vadd.f32 %v7013_v45, %v3245_v57 }
 0x2e1   : > { %v3180_v38 = vpop.f32.mrf.mxu0  ;;  %v7230_v39 = vpop.f32.mrf.mxu1 }
 0x2e2   : > { %v3247_v10 = vadd.f32 %v3180_v38, %v7024_v61  ;;  %v7234_v47 = vadd.f32 %v7020_v30, %v3246_v43 }
 0x2e3   : > { %v3182_v23 = vpop.f32.mrf.mxu0  ;;  %v7236_v5 = vpop.f32.mrf.mxu1 }
 0x2e4   : > { %v3248_v28 = vadd.f32 %v3182_v23, %v7030_v2  ;;  %v7240_v44 = vadd.f32 %v7026_v55, %v3247_v10 }
 0x2e5   : > { %v3184_v46 = vpop.f32.mrf.mxu0  ;;  %v7242_v35 = vpop.f32.mrf.mxu1 }
 0x2e6   : > { %v3249_v45 = vadd.f32 %v3184_v46, %v7036_v12  ;;  %v7246_v57 = vadd.f32 %v7032_v13, %v3248_v28 }
 0x2e7   : > { %v3186_v61 = vpop.f32.mrf.mxu0  ;;  %v7248_v38 = vpop.f32.mrf.mxu1 }
 0x2e8   : > { %v3250_v30 = vadd.f32 %v3186_v61, %v7047_v19  ;;  %v7252_v43 = vadd.f32 %v7042_v22, %v3249_v45 }
 0x2e9   : > { %v3190_v2 = vpop.f32.mrf.mxu0  ;;  %v7254_v23 = vpop.f32.mrf.mxu1 }
 0x2ea   : > { %v3251_v55 = vadd.f32 %v3190_v2, %v7053_v20  ;;  %v7258_v10 = vadd.f32 %v7049_v21, %v3250_v30 }
 0x2eb   : > { %v3192_v12 = vpop.f32.mrf.mxu0  ;;  %v7260_v46 = vpop.f32.mrf.mxu1 }
 0x2ec   : > { %v3252_v13 = vadd.f32 %v3192_v12, %v7059_v58  ;;  %v7264_v28 = vadd.f32 %v7055_v63, %v3251_v55 }
 0x2ed   : > { %v3194_v19 = vpop.f32.mrf.mxu0  ;;  %v7266_v61 = vpop.f32.mrf.mxu1 }
 0x2ee   : > { %v3253_v22 = vadd.f32 %v3194_v19, %v7065_v18  ;;  %v7270_v45 = vadd.f32 %v7061_v33, %v3252_v13 }
 0x2ef   : > { %v3196_v20 = vpop.f32.mrf.mxu0  ;;  %v7272_v2 = vpop.f32.mrf.mxu1 }
 0x2f0   : > { %8082 = vst [vmem:[#allocation29_spill] sm:$0xff] %v7272_v2  ;;  %v3254_v21 = vadd.f32 %v3196_v20, %v7076_v32  ;;  %v7276_v30 = vadd.f32 %v7071_v37, %v3253_v22  ;;  %v8088_v22 = vld [vmem:[#allocation41_spill] sm:$0xff] }
 0x2f1   : > { %v3200_v58 = vpop.f32.mrf.mxu0  ;;  %v7278_v12 = vpop.f32.mrf.mxu1 }
 0x2f2   : > { %8083 = vst [vmem:[#allocation23_spill] sm:$0xff] %v7278_v12  ;;  %v3255_v63 = vadd.f32 %v3200_v58, %v7082_v7  ;;  %v7282_v55 = vadd.f32 %v7078_v49, %v3254_v21  ;;  %v8091_v21 = vld [vmem:[#allocation43_spill] sm:$0xff] }
 0x2f3   : > { %v3202_v18 = vpop.f32.mrf.mxu0  ;;  %v7284_v19 = vpop.f32.mrf.mxu1 }
 0x2f4   : > { %8084 = vst [vmem:[#allocation49_spill] sm:$0xff] %v7282_v55  ;;  %8085 = vst [vmem:[#allocation50_spill] sm:$0xff] %v7284_v19  ;;  %v3256_v33 = vadd.f32 %v3202_v18, %v7088_v60  ;;  %v7288_v13 = vadd.f32 %v7084_v48, %v3255_v63  ;;  %v8094_v63 = vld [vmem:[#allocation20_spill] sm:$0xff] }
 0x2f5   : > { %v3204_v32 = vpop.f32.mrf.mxu0  ;;  %v7290_v20 = vpop.f32.mrf.mxu1 }
 0x2f6   : > { %8086 = vst [vmem:[#allocation24_spill] sm:$0xff] %v7288_v13  ;;  %8087 = vst [vmem:[#allocation51_spill] sm:$0xff] %v7290_v20  ;;  %v3257_v37 = vadd.f32 %v3204_v32, %v7094_v42  ;;  %v7294_v12 = vadd.f32 %v8088_v22, %v3256_v33 }
 0x2f7   : > { %v3206_v7 = vpop.f32.mrf.mxu0  ;;  %v7296_v58 = vpop.f32.mrf.mxu1 }
 0x2f8   : > { %8089 = vst [vmem:[#allocation6_spill] sm:$0xff] %v7294_v12  ;;  %8090 = vst [vmem:[#allocation53_spill] sm:$0xff] %v7296_v58  ;;  %v3258_v49 = vadd.f32 %v3206_v7, %v7105_v27  ;;  %v7300_v19 = vadd.f32 %v8091_v21, %v3257_v37  ;;  %v8099_v21 = vld [vmem:[#allocation44_spill] sm:$0xff] }
 0x2f9   : > { %v3210_v60 = vpop.f32.mrf.mxu0  ;;  %v7302_v18 = vpop.f32.mrf.mxu1 }
 0x2fa   : > { %8092 = vst [vmem:[#allocation25_spill] sm:$0xff] %v7300_v19  ;;  %8093 = vst [vmem:[#allocation54_spill] sm:$0xff] %v7302_v18  ;;  %v3259_v48 = vadd.f32 %v3210_v60, %v7111_v1  ;;  %v7306_v20 = vadd.f32 %v8094_v63, %v3258_v49  ;;  %v8102_v63 = vld [vmem:[#allocation5_spill] sm:$0xff] }
 0x2fb   : > { %v3212_v42 = vpop.f32.mrf.mxu0  ;;  %v7308_v32 = vpop.f32.mrf.mxu1 }
 0x2fc   : > { %8095 = vst [vmem:[#allocation55_spill] sm:$0xff] %v7306_v20  ;;  %8096 = vst [vmem:[#allocation26_spill] sm:$0xff] %v7308_v32  ;;  %v3260_v33 = vadd.f32 %v3212_v42, %v7117_v14  ;;  %v7312_v22 = vadd.f32 %v7113_v59, %v3259_v48  ;;  %v8105_v48 = vld [vmem:[#allocation45_spill] sm:$0xff] }
 0x2fd   : > { %v3214_v27 = vpop.f32.mrf.mxu0  ;;  %v7314_v7 = vpop.f32.mrf.mxu1 }
 0x2fe   : > { %8097 = vst [vmem:[#allocation56_spill] sm:$0xff] %v7312_v22  ;;  %8098 = vst [vmem:[#allocation57_spill] sm:$0xff] %v7314_v7  ;;  %v3261_v37 = vadd.f32 %v3214_v27, %v7123_v16  ;;  %v7318_v18 = vadd.f32 %v8099_v21, %v3260_v33  ;;  %v8108_v21 = vld [vmem:[#allocation21_spill] sm:$0xff] }
 0x2ff   : > { %v3216_v1 = vpop.f32.mrf.mxu0  ;;  %v7320_v60 = vpop.f32.mrf.mxu1 }
 0x300   : > { %8100 = vst [vmem:[#allocation27_spill] sm:$0xff] %v7318_v18  ;;  %8101 = vst [vmem:[#allocation58_spill] sm:$0xff] %v7320_v60  ;;  %v3262_v49 = vadd.f32 %v3216_v1, %v7134_v25  ;;  %v7324_v32 = vadd.f32 %v8102_v63, %v3261_v37  ;;  %v8111_v37 = vld [vmem:[#allocation22_spill] sm:$0xff] }
 0x301   : > { %v3220_v14 = vpop.f32.mrf.mxu0  ;;  %v7326_v42 = vpop.f32.mrf.mxu1 }
 0x302   : > { %8103 = vst [vmem:[#allocation59_spill] sm:$0xff] %v7324_v32  ;;  %8104 = vst [vmem:[#allocation28_spill] sm:$0xff] %v7326_v42  ;;  %v3263_v59 = vadd.f32 %v3220_v14, %v7140_v54  ;;  %v7330_v7 = vadd.f32 %v8105_v48, %v3262_v49  ;;  %v8112_v32 = vld [vmem:[#allocation46_spill] sm:$0xff]  ;;  %v8115_v48 = vld [vmem:[#allocation48_spill] sm:$0xff] }
 0x303   : > { %v3222_v16 = vpop.f32.mrf.mxu0  ;;  %v7332_v27 = vpop.f32.mrf.mxu1 }
 0x304   : > { %8106 = vst [vmem:[#allocation52_spill] sm:$0xff] %v7330_v7  ;;  %8107 = vst [vmem:[#allocation60_spill] sm:$0xff] %v7332_v27  ;;  %v3264_v33 = vadd.f32 %v3222_v16, %v7146_v52  ;;  %v7336_v60 = vadd.f32 %v8108_v21, %v3263_v59  ;;  %v8118_v21 = vld [vmem:[#allocation47_spill] sm:$0xff] }
 0x305   : > { %v3224_v25 = vpop.f32.mrf.mxu0  ;;  %v7338_v1 = vpop.f32.mrf.mxu1 }
 0x306   : > { %8109 = vst [vmem:[#allocation7_spill] sm:$0xff] %v7336_v60  ;;  %8110 = vst [vmem:[#allocation18_spill] sm:$0xff] %v7338_v1  ;;  %v3265_v63 = vadd.f32 %v3224_v25, %v8111_v37  ;;  %v7342_v42 = vadd.f32 %v8112_v32, %v3264_v33 }
 0x307   : > { %v3226_v54 = vpop.f32.mrf.mxu0  ;;  %v7344_v14 = vpop.f32.mrf.mxu1 }
 0x308   : > { %8113 = vst [vmem:[#allocation61_spill] sm:$0xff] %v7342_v42  ;;  %8114 = vst [vmem:[#allocation11_spill] sm:$0xff] %v7344_v14  ;;  %v3266_v49 = vadd.f32 %v3226_v54, %v7162_v62  ;;  %v7348_v27 = vadd.f32 %v8115_v48, %v3265_v63 }
 0x309   : > { %v3230_v52 = vpop.f32.mrf.mxu0  ;;  %v7350_v16 = vpop.f32.mrf.mxu1 }
 0x30a   : > { %8116 = vst [vmem:[#allocation41_spill] sm:$0xff] %v7348_v27  ;;  %8117 = vst [vmem:[#allocation43_spill] sm:$0xff] %v7350_v16  ;;  %v3267_v59 = vadd.f32 %v3230_v52, %v7168_v11  ;;  %v7354_v1 = vadd.f32 %v8118_v21, %v3266_v49 }
 0x30b   : > { %v3232_v25 = vpop.f32.mrf.mxu0  ;;  %v7356_v37 = vpop.f32.mrf.mxu1 }
 0x30c   : > { %8119 = vst [vmem:[#allocation20_spill] sm:$0xff] %v7354_v1  ;;  %8120 = vst [vmem:[#allocation44_spill] sm:$0xff] %v7356_v37  ;;  %v3268_v32 = vadd.f32 %v3232_v25, %v7174_v15  ;;  %v7360_v33 = vadd.f32 %v7170_v40, %v3267_v59 }
 0x30d   : > { %v3234_v62 = vpop.f32.mrf.mxu0  ;;  %v7362_v54 = vpop.f32.mrf.mxu1 }
 0x30e   : > { %8121 = vst [vmem:[#allocation5_spill] sm:$0xff] %v7360_v33  ;;  %8122 = vst [vmem:[#allocation45_spill] sm:$0xff] %v7362_v54  ;;  %v3269_v63 = vadd.f32 %v3234_v62, %v7180_v53  ;;  %v7366_v48 = vadd.f32 %v7176_v31, %v3268_v32 }
 0x30f   : > { %v3236_v11 = vpop.f32.mrf.mxu0  ;;  %v7368_v52 = vpop.f32.mrf.mxu1 }
 0x310   : > { %8123 = vst [vmem:[#allocation21_spill] sm:$0xff] %v7366_v48  ;;  %8124 = vst [vmem:[#allocation22_spill] sm:$0xff] %v7368_v52  ;;  %v3270_v49 = vadd.f32 %v3236_v11, %v7186_v6  ;;  %v7372_v21 = vadd.f32 %v7182_v41, %v3269_v63 }
 0x311   : > { %v3493_v15 = vpop.f32.mrf.mxu0  ;;  %v7374_v25 = vpop.f32.mrf.mxu1 }
 0x312   : > { %8125 = vst [vmem:[#allocation46_spill] sm:$0xff] %v7372_v21  ;;  %8126 = vst [vmem:[#allocation48_spill] sm:$0xff] %v7374_v25  ;;  %v7377_v40 = vadd.f32 %v7188_v8, %v3270_v49 }
 0x313   : > { %v3495_v59 = vpop.f32.mrf.mxu0  ;;  %v7379_v54 = vpop.f32.mrf.mxu1 }
 0x314   : > { %8127 = vst [vmem:[#allocation47_spill] sm:$0xff] %v7377_v40  ;;  %8128 = vst [vmem:[#allocation63_spill] sm:$0xff] %v7379_v54 }
 0x315   : > { %v3497_v53 = vpop.f32.mrf.mxu0  ;;  %v3994_v31 = vpop.f32.mrf.mxu1 }
 0x317   : > { %v3499_v32 = vpop.f32.mrf.mxu0  ;;  %v3996_v37 = vpop.f32.mrf.mxu1 }
 0x319   : > { %v3503_v62 = vpop.f32.mrf.mxu0  ;;  %v7381_v6 = vpop.f32.mrf.mxu1 }
 0x31b   : > { %v3505_v52 = vpop.f32.mrf.mxu0  ;;  %v7387_v11 = vpop.f32.mrf.mxu1 }
 0x31d   : > { %v3507_v48 = vpop.f32.mrf.mxu0  ;;  %v7393_v54 = vpop.f32.mrf.mxu1 }
 0x31f   : > { %v7383_v41 = vpop.f32.mrf.mxu0  ;;  %v7399_v21 = vpop.f32.mrf.mxu1 }
 0x321   : > { %v7385_v63 = vpop.f32.mrf.mxu0  ;;  %v7405_v14 = vpop.f32.mrf.mxu1 }
 0x323   : > { %v7389_v8 = vpop.f32.mrf.mxu0  ;;  %v7411_v42 = vpop.f32.mrf.mxu1 }
 0x325   : > { %v7391_v49 = vpop.f32.mrf.mxu0  ;;  %v7417_v18 = vpop.f32.mrf.mxu1 }
 0x327   : > { %v7395_v25 = vpop.f32.mrf.mxu0  ;;  %v7423_v20 = vpop.f32.mrf.mxu1 }
 0x329   : > { %v7397_v40 = vpop.f32.mrf.mxu0  ;;  %v7429_v13 = vpop.f32.mrf.mxu1 }
 0x32a   : > { %8138 = vst [vmem:[#allocation73_spill] sm:$0xff] %v7429_v13 }
 0x32b   : > { %v7401_v16 = vpop.f32.mrf.mxu0 }
 0x32d   : > { %v7403_v33 = vpop.f32.mrf.mxu0 }
 0x32e   : > { %8129 = vst [vmem:[#allocation64_spill] sm:$0xff] %v7403_v33 }
 0x32f   : > { %v7407_v1 = vpop.f32.mrf.mxu0 }
 0x330   : > { %8130 = vst [vmem:[#allocation65_spill] sm:$0xff] %v7407_v1 }
 0x331   : > { %v7409_v27 = vpop.f32.mrf.mxu0 }
 0x332   : > { %8131 = vst [vmem:[#allocation66_spill] sm:$0xff] %v7409_v27 }
 0x333   : > { %v7413_v60 = vpop.f32.mrf.mxu0 }
 0x334   : > { %8132 = vst [vmem:[#allocation67_spill] sm:$0xff] %v7413_v60  ;;  %v7435_v60 = vpop.f32.mrf.mxu1 }
 0x335   : > { %v7415_v7 = vpop.f32.mrf.mxu0  ;;  %8141 = vst [vmem:[#allocation76_spill] sm:$0xff] %v7435_v60 }
 0x336   : > { %8133 = vst [vmem:[#allocation68_spill] sm:$0xff] %v7415_v7 }
 0x337   : > { %v7419_v22 = vpop.f32.mrf.mxu0 }
 0x338   : > { %8134 = vst [vmem:[#allocation69_spill] sm:$0xff] %v7419_v22  ;;  %v7441_v22 = vpop.f32.mrf.mxu1 }
 0x339   : > { %v7421_v58 = vpop.f32.mrf.mxu0  ;;  %8144 = vst [vmem:[#allocation79_spill] sm:$0xff] %v7441_v22 }
 0x33a   : > { %8135 = vst [vmem:[#allocation70_spill] sm:$0xff] %v7421_v58 }
 0x33b   : > { %v7425_v19 = vpop.f32.mrf.mxu0 }
 0x33c   : > { %8136 = vst [vmem:[#allocation71_spill] sm:$0xff] %v7425_v19  ;;  %v7447_v19 = vpop.f32.mrf.mxu1 }
 0x33d   : > { %v7427_v12 = vpop.f32.mrf.mxu0  ;;  %8147 = vst [vmem:[#allocation82_spill] sm:$0xff] %v7447_v19  ;;  %v3575_v19 = vadd.f32 %v3499_v32, %v7210_v0  ;;  %v8152_v0 = vld [vmem:[#allocation62_spill] sm:$0xff] }
 0x33e   : > { %8137 = vst [vmem:[#allocation72_spill] sm:$0xff] %v7427_v12 }
 0x33f   : > { %v7431_v27 = vpop.f32.mrf.mxu0 }
 0x340   : > { %8139 = vst [vmem:[#allocation74_spill] sm:$0xff] %v7431_v27  ;;  %v3572_v27 = vadd.f32 %v3493_v15, %v7192_v36  ;;  %v3576_v15 = vadd.f32 %v3503_v62, %v7216_v51  ;;  %v3578_v51 = vadd.f32 %v3507_v48, %v7228_v9 }
 0x341   : > { %v7433_v2 = vpop.f32.mrf.mxu0 }
 0x342   : > { %8140 = vst [vmem:[#allocation75_spill] sm:$0xff] %v7433_v2  ;;  %v7454_v2 = vpop.f32.mrf.mxu1 }
 0x343   : > { %v7437_v7 = vpop.f32.mrf.mxu0  ;;  %8150 = vst [vmem:[#allocation85_spill] sm:$0xff] %v7454_v2 }
 0x344   : > { %8142 = vst [vmem:[#allocation77_spill] sm:$0xff] %v7437_v7  ;;  %v3573_v7 = vadd.f32 %v3495_v59, %v7198_v34  ;;  %v3577_v59 = vadd.f32 %v3505_v52, %v7222_v24  ;;  %v3579_v24 = vadd.f32 %v7383_v41, %v7234_v47 }
 0x345   : > { %v7439_v1 = vpop.f32.mrf.mxu0 }
 0x346   : > { %8143 = vst [vmem:[#allocation78_spill] sm:$0xff] %v7439_v1  ;;  %v3574_v1 = vadd.f32 %v3497_v53, %v7204_v3  ;;  %v3740_v36 = vadd.f32 %v7200_v26, %v3573_v7  ;;  %v3743_v26 = vadd.f32 %v7218_v56, %v3576_v15 }
 0x347   : > { %v7443_v58 = vpop.f32.mrf.mxu0 }
 0x348   : > { %8145 = vst [vmem:[#allocation80_spill] sm:$0xff] %v7443_v58  ;;  %v3739_v58 = vadd.f32 %v7194_v17, %v3572_v27  ;;  %v3741_v34 = vadd.f32 %v7206_v50, %v3574_v1  ;;  %v3744_v1 = vadd.f32 %v7224_v4, %v3577_v59 }
 0x349   : > { %v7445_v55 = vpop.f32.mrf.mxu0 }
 0x34a   : > { %8146 = vst [vmem:[#allocation81_spill] sm:$0xff] %v7445_v55  ;;  %v7461_v55 = vpop.f32.mrf.mxu1 }
 0x34b   : > { %v7449_v12 = vpop.f32.mrf.mxu0 }
 0x34c   : > { %8148 = vst [vmem:[#allocation83_spill] sm:$0xff] %v7449_v12  ;;  %v7468_v53 = vpop.f32.mrf.mxu1 }
 0x34d   : > { %v7452_v13 = vpop.f32.mrf.mxu0 }
 0x34e   : > { %8149 = vst [vmem:[#allocation84_spill] sm:$0xff] %v7452_v13 }
 0x34f   : > { %v7457_v60 = vpop.f32.mrf.mxu0 }
 0x350   : > { %8151 = vst [vmem:[#allocation86_spill] sm:$0xff] %v7457_v60  ;;  %v3742_v60 = vadd.f32 %v7212_v29, %v3575_v19  ;;  %v3580_v29 = vadd.f32 %v7385_v63, %v7240_v44  ;;  %v3745_v44 = vadd.f32 %v7230_v39, %v3578_v51  ;;  %v3746_v63 = vadd.f32 %v7236_v5, %v3579_v24 }
 0x351   : > { %v3827_v22 = vpop.f32.mrf.mxu0  ;;  %v3582_v5 = vadd.f32 %v7391_v49, %v7252_v43 }
 0x352   : > { %v3906_v12 = vadd.f32 %v3827_v22, %v3739_v58 }
 0x353   : > { %v3829_v13 = vpop.f32.mrf.mxu0 }
 0x354   : > { %v4073_v2 = vadd.f32 %v3994_v31, %v3906_v12  ;;  %v3907_v33 = vadd.f32 %v3829_v13, %v3740_v36  ;;  %v8155_v31 = vld [vmem:[#allocation30_spill] sm:$0xff] }
 0x355   : > { %v3831_v3 = vpop.f32.mrf.mxu0 }
 0x356   : > { %v4074_v17 = vadd.f32 %v3996_v37, %v3907_v33  ;;  %v3908_v27 = vadd.f32 %v3831_v3, %v3741_v34  ;;  %v4105_v58 = vadd.f32 %v4073_v2, %v8152_v0  ;;  %v7479_v37 = vpop.f32.mrf.mxu1  ;;  %v8153_v33 = vld [vmem:[#allocation8_spill] sm:$0xff]  ;;  %v3747_v3 = vadd.f32 %v7242_v35, %v3580_v29 }
 0x357   : > { %v3833_v22 = vpop.f32.mrf.mxu0 }
 0x358   : > { %v4106_v12 = vadd.f32 %v4074_v17, %v8152_v0  ;;  %v4075_v50 = vadd.f32 %v7381_v6, %v3908_v27  ;;  %v3909_v13 = vadd.f32 %v3833_v22, %v3742_v60  ;;  %v4137_v19 = vmax.f32 %v4105_v58, 0.0  ;;  %v8154_v60 = vld [vmem:[#allocation12_spill] sm:$0xff]  ;;  %v7497_v36 = vpop.f32.mrf.mxu1  ;;  %v8156_v17 = vld [vmem:[#allocation14_spill] sm:$0xff] }
 0x359   : > { %v3837_v7 = vpop.f32.mrf.mxu0  ;;  %v7488_v47 = vsel %vm2817_vm11, %v8155_v31, %v8154_v60  ;;  %v3581_v6 = vadd.f32 %v7389_v8, %v7246_v57 }
 0x35a   : > { %v4138_v2 = vmax.f32 %v4106_v12, 0.0  ;;  %v4076_v56 = vadd.f32 %v7387_v11, %v3909_v13  ;;  %v3910_v9 = vadd.f32 %v3837_v7, %v3743_v26  ;;  %v4107_v48 = vadd.f32 %v4075_v50, %v8153_v33  ;;  %v7512_v50 = vpop.f32.mrf.mxu1  ;;  %v8157_v7 = vld [vmem:[#allocation17_spill] sm:$0xff] }
 0x35b   : > { %v3839_v52 = vpop.f32.mrf.mxu0  ;;  %v4187_v0 = vmul.f32 %v7488_v47, %v4137_v19  ;;  %v3748_v51 = vadd.f32 %v7248_v38, %v3581_v6  ;;  %v3584_v13 = vadd.f32 %v7397_v40, %v7264_v28  ;;  %v3749_v28 = vadd.f32 %v7254_v23, %v3582_v5  ;;  %v8160_v6 = vld [vmem:[#allocation64_spill] sm:$0xff]  ;;  %v8166_v5 = vld [vmem:[#allocation66_spill] sm:$0xff] }
 0x35c   : > { %v4108_v4 = vadd.f32 %v4076_v56, %v8153_v33  ;;  %v4077_v32 = vadd.f32 %v7393_v54, %v3910_v9  ;;  %v3911_v62 = vadd.f32 %v3839_v52, %v3744_v1  ;;  %v4188_v11 = vmul.f32 %v8154_v60, %v4138_v2 }
 0x35d   : > { %v3841_v41 = vpop.f32.mrf.mxu0  ;;  %v4139_v54 = vmax.f32 %v4107_v48, 0.0  ;;  %v7527_v48 = vpop.f32.mrf.mxu1 }
 0x35e   : > { %v4140_v15 = vmax.f32 %v4108_v4, 0.0  ;;  %v4078_v34 = vadd.f32 %v7399_v21, %v3911_v62  ;;  %v3912_v59 = vadd.f32 %v3841_v41, %v3745_v44  ;;  %v4109_v27 = vadd.f32 %v4077_v32, %v8156_v17  ;;  %v8158_v62 = vld [vmem:[#allocation9_spill] sm:$0xff]  ;;  %v8159_v44 = vld [vmem:[#allocation35_spill] sm:$0xff] }
 0x35f   : > { %v3843_v39 = vpop.f32.mrf.mxu0  ;;  %v4219_v57 = vsel %vm2597_vm0, %v4188_v11, 0.0  ;;  %v3583_v21 = vadd.f32 %v7395_v25, %v7258_v10  ;;  %v4189_v25 = vmul.f32 %v7488_v47, %v4139_v54  ;;  %v3586_v41 = vadd.f32 %v8160_v6, %v7276_v30 }
 0x360   : > { %v4110_v8 = vadd.f32 %v4078_v34, %v8156_v17  ;;  %v4079_v58 = vadd.f32 %v7405_v14, %v3912_v59  ;;  %v3913_v22 = vadd.f32 %v3843_v39, %v3746_v63  ;;  %v4220_v26 = vadd.f32 %v4219_v57, %v4187_v0  ;;  %v8163_v34 = vld [vmem:[#allocation65_spill] sm:$0xff]  ;;  %v7543_v0 = vpop.f32.mrf.mxu1  ;;  %v8165_v57 = vld [vmem:[#allocation24_spill] sm:$0xff] }
 0x361   : > { %v3847_v35 = vpop.f32.mrf.mxu0  ;;  %v4190_v12 = vmul.f32 %v8154_v60, %v4140_v15  ;;  %v4141_v14 = vmax.f32 %v4109_v27, 0.0  ;;  %v3750_v19 = vadd.f32 %v7260_v46, %v3583_v21  ;;  %v8164_v17 = vld [vmem:[#allocation29_spill] sm:$0xff] }
 0x362   : > { %v4142_v43 = vmax.f32 %v4110_v8, 0.0  ;;  %v4080_v49 = vadd.f32 %v7411_v42, %v3913_v22  ;;  %v3914_v24 = vadd.f32 %v3847_v35, %v3747_v3  ;;  %v4111_v1 = vadd.f32 %v4079_v58, %v8157_v7  ;;  %4221 = vadd.xlane.f32.xlu0 %v4220_v26  ;;  %v8167_v58 = vld [vmem:[#allocation76_spill] sm:$0xff]  ;;  %v8168_v26 = vld [vmem:[#allocation3_spill] sm:$0xff] }
 0x363   : > { %v3849_v10 = vpop.f32.mrf.mxu0  ;;  %v4223_v38 = vsel %vm2597_vm0, %v4190_v12, 0.0  ;;  %v3585_v42 = vadd.f32 %v7401_v16, %v7270_v45  ;;  %v4191_v16 = vmul.f32 %v7488_v47, %v4141_v14  ;;  %v3588_v8 = vadd.f32 %v8166_v5, %v8165_v57  ;;  %v8169_v12 = vld [vmem:[#allocation36_spill] sm:$0xff]  ;;  %v8170_v14 = vld [vmem:[#allocation79_spill] sm:$0xff] }
 0x364   : > { %v4112_v29 = vadd.f32 %v4080_v49, %v8157_v7  ;;  %v4081_v2 = vadd.f32 %v7417_v18, %v3914_v24  ;;  %v3915_v56 = vadd.f32 %v3849_v10, %v3748_v51  ;;  %v4224_v9 = vadd.f32 %v4223_v38, %v4189_v25  ;;  %v8171_v10 = vld [vmem:[#allocation23_spill] sm:$0xff]  ;;  %v8172_v38 = vld [vmem:[#allocation6_spill] sm:$0xff] }
 0x365   : > { %v3851_v40 = vpop.f32.mrf.mxu0  ;;  %v4192_v33 = vmul.f32 %v8154_v60, %v4142_v43  ;;  %v3751_v18 = vadd.f32 %v7266_v61, %v3584_v13  ;;  %v4143_v32 = vmax.f32 %v4111_v1, 0.0  ;;  %v8162_v61 = vld [vmem:[#allocation49_spill] sm:$0xff]  ;;  %v3752_v27 = vadd.f32 %v8164_v17, %v3585_v42  ;;  %v8174_v42 = vld [vmem:[#allocation50_spill] sm:$0xff] }
 0x366   : > { %v4144_v52 = vmax.f32 %v4112_v29, 0.0  ;;  %v4082_v31 = vadd.f32 %v7423_v20, %v3915_v56  ;;  %v3916_v4 = vadd.f32 %v3851_v40, %v3749_v28  ;;  %v4113_v23 = vadd.f32 %v4081_v2, %v8158_v62  ;;  %2636 = vadd.xlane.f32.xlu0 %v8159_v44  ;;  %4225 = vadd.xlane.f32.xlu1 %v4224_v9  ;;  %v8161_v20 = vld [vmem:[#allocation73_spill] sm:$0xff]  ;;  %v8173_v29 = vld [vmem:[#allocation67_spill] sm:$0xff] }
 0x367   : > { %v3853_v45 = vpop.f32.mrf.mxu0  ;;  %v4227_v46 = vsel %vm2597_vm0, %v4192_v33, 0.0  ;;  %v3587_v59 = vadd.f32 %v8163_v34, %v8162_v61  ;;  %v4193_v43 = vmul.f32 %v7488_v47, %v4143_v32  ;;  %v3753_v25 = vadd.f32 %v8171_v10, %v3586_v41  ;;  %v8179_v41 = vld [vmem:[#allocation25_spill] sm:$0xff] }
 0x368   : > { %v4114_v63 = vadd.f32 %v4082_v31, %v8158_v62  ;;  %v4083_v11 = vadd.f32 %v8161_v20, %v3916_v4  ;;  %v3917_v15 = vadd.f32 %v3853_v45, %v3750_v19  ;;  %v4228_v54 = vadd.f32 %v4227_v46, %v4191_v16  ;;  %v7559_v19 = vpop.f32.mrf.mxu1  ;;  %v8178_v45 = vld [vmem:[#allocation38_spill] sm:$0xff] }
 0x369   : > { %v3857_v3 = vpop.f32.mrf.mxu0  ;;  %v4194_v39 = vmul.f32 %v8154_v60, %v4144_v52  ;;  %v4145_v35 = vmax.f32 %v4113_v23, 0.0  ;;  %v3589_v2 = vadd.f32 %v8173_v29, %v8172_v38  ;;  %v3754_v40 = vadd.f32 %v8174_v42, %v3587_v59  ;;  %v8175_v52 = vld [vmem:[#allocation82_spill] sm:$0xff]  ;;  %v8182_v59 = vld [vmem:[#allocation55_spill] sm:$0xff] }
 0x36a   : > { %v4146_v30 = vmax.f32 %v4114_v63, 0.0  ;;  %v4084_v22 = vadd.f32 %v8167_v58, %v3917_v15  ;;  %v3918_v21 = vadd.f32 %v3857_v3, %v3751_v18  ;;  %v4115_v51 = vadd.f32 %v4083_v11, %v8168_v26  ;;  %2640 = vadd.xlane.f32.xlu0 %v8169_v12  ;;  %4229 = vadd.xlane.f32.xlu1 %v4228_v54  ;;  %v8176_v18 = vld [vmem:[#allocation51_spill] sm:$0xff]  ;;  %v8177_v23 = vld [vmem:[#allocation10_spill] sm:$0xff]  ;;  %v8180_v63 = vld [vmem:[#allocation68_spill] sm:$0xff] }
 0x36b   : > { %v3859_v13 = vpop.f32.mrf.mxu0  ;;  %v4231_v49 = vsel %vm2597_vm0, %v4194_v39, 0.0  ;;  %v3755_v32 = vadd.f32 %v8176_v18, %v3588_v8  ;;  %v4195_v46 = vmul.f32 %v7488_v47, %v4145_v35  ;;  %v3590_v20 = vadd.f32 %v8180_v63, %v8179_v41  ;;  %v8181_v15 = vld [vmem:[#allocation85_spill] sm:$0xff]  ;;  %v7575_v8 = vpop.f32.mrf.mxu1  ;;  %v8186_v58 = vld [vmem:[#allocation70_spill] sm:$0xff]  ;;  %v8187_v12 = vld [vmem:[#allocation32_spill] sm:$0xff] }
 0x36c   : > { %v4116_v24 = vadd.f32 %v4084_v22, %v8168_v26  ;;  %v4085_v7 = vadd.f32 %v8170_v14, %v3918_v21  ;;  %v3919_v1 = vadd.f32 %v3859_v13, %v3752_v27  ;;  %v4232_v28 = vadd.f32 %v4231_v49, %v4193_v43  ;;  %v8183_v3 = vld [vmem:[#allocation69_spill] sm:$0xff]  ;;  %v8188_v43 = vld [vmem:[#allocation40_spill] sm:$0xff]  ;;  %v8191_v29 = vld [vmem:[#allocation71_spill] sm:$0xff] }
 0x36d   : > { %v3861_v56 = vpop.f32.mrf.mxu0  ;;  %v4196_v9 = vmul.f32 %v8154_v60, %v4146_v30  ;;  %v4147_v62 = vmax.f32 %v4115_v51, 0.0  ;;  %v3591_v54 = vadd.f32 %v8183_v3, %v8182_v59  ;;  %v8184_v39 = vld [vmem:[#allocation53_spill] sm:$0xff]  ;;  %v8185_v30 = vld [vmem:[#allocation56_spill] sm:$0xff]  ;;  %v8192_v42 = vld [vmem:[#allocation26_spill] sm:$0xff] }
 0x36e   : > { %v4148_v33 = vmax.f32 %v4116_v24, 0.0  ;;  %v4086_v31 = vadd.f32 %v8175_v52, %v3919_v1  ;;  %v3920_v4 = vadd.f32 %v3861_v56, %v3753_v25  ;;  %v4117_v44 = vadd.f32 %v4085_v7, %v8177_v23  ;;  %2644 = vadd.xlane.f32.xlu0 %v8178_v45  ;;  %4233 = vadd.xlane.f32.xlu1 %v4232_v28  ;;  %v8189_v25 = vld [vmem:[#allocation54_spill] sm:$0xff]  ;;  %v8193_v18 = vld [vmem:[#allocation57_spill] sm:$0xff]  ;;  %v8197_v41 = vld [vmem:[#allocation72_spill] sm:$0xff] }
 0x36f   : > { %v3863_v16 = vpop.f32.mrf.mxu0  ;;  %v4235_v6 = vsel %vm2597_vm0, %v4196_v9, 0.0  ;;  %v3756_v57 = vadd.f32 %v8184_v39, %v3589_v2  ;;  %v3592_v22 = vadd.f32 %v8186_v58, %v8185_v30  ;;  %v4197_v24 = vmul.f32 %v7488_v47, %v4147_v62  ;;  %v8194_v62 = vld [vmem:[#allocation31_spill] sm:$0xff] }
 0x370   : > { %v4118_v11 = vadd.f32 %v4086_v31, %v8177_v23  ;;  %v4087_v61 = vadd.f32 %v8181_v15, %v3920_v4  ;;  %v3921_v34 = vadd.f32 %v3863_v16, %v3754_v40  ;;  %v4236_v27 = vadd.f32 %v4235_v6, %v4195_v46  ;;  %v8196_v6 = vld [vmem:[#allocation59_spill] sm:$0xff]  ;;  %v8198_v15 = vld [vmem:[#allocation52_spill] sm:$0xff] }
 0x371   : > { %v3867_v17 = vpop.f32.mrf.mxu0  ;;  %v4198_v5 = vmul.f32 %v8154_v60, %v4148_v33  ;;  %v4149_v51 = vmax.f32 %v4117_v44, 0.0  ;;  %v3757_v38 = vadd.f32 %v8189_v25, %v3590_v20  ;;  %v3758_v40 = vadd.f32 %v8192_v42, %v3591_v54  ;;  %v7591_v33 = vpop.f32.mrf.mxu1  ;;  %v8195_v44 = vld [vmem:[#allocation39_spill] sm:$0xff]  ;;  %v8200_v54 = vld [vmem:[#allocation58_spill] sm:$0xff] }
 0x372   : > { %v4150_v21 = vmax.f32 %v4118_v11, 0.0  ;;  %v4088_v35 = vadd.f32 %v7461_v55, %v3921_v34  ;;  %v3922_v26 = vadd.f32 %v3867_v17, %v3755_v32  ;;  %v4119_v13 = vadd.f32 %v4087_v61, %v8187_v12  ;;  %2648 = vadd.xlane.f32.xlu0 %v8188_v43  ;;  %4237 = vadd.xlane.f32.xlu1 %v4236_v27  ;;  %v8190_v55 = vld [vmem:[#allocation27_spill] sm:$0xff]  ;;  %v8199_v61 = vld [vmem:[#allocation74_spill] sm:$0xff] }
 0x373   : > { %v3869_v49 = vpop.f32.mrf.mxu0  ;;  %v4239_v14 = vsel %vm2597_vm0, %v4198_v5, 0.0  ;;  %v3593_v2 = vadd.f32 %v8191_v29, %v8190_v55  ;;  %v4199_v16 = vmul.f32 %v7488_v47, %v4149_v51  ;;  %v3594_v63 = vadd.f32 %v8197_v41, %v8196_v6  ;;  %v7607_v39 = vpop.f32.mrf.mxu1  ;;  %v8202_v5 = vld [vmem:[#allocation75_spill] sm:$0xff]  ;;  %v8208_v29 = vld [vmem:[#allocation60_spill] sm:$0xff] }
 0x374   : > { %v4120_v7 = vadd.f32 %v4088_v35, %v8187_v12  ;;  %v4089_v1 = vadd.f32 %v7468_v53, %v3922_v26  ;;  %v3923_v10 = vadd.f32 %v3869_v49, %v3756_v57  ;;  %v4240_v28 = vadd.f32 %v4239_v14, %v4197_v24  ;;  %v8201_v57 = vld [vmem:[#allocation7_spill] sm:$0xff]  ;;  %v8203_v35 = vld [vmem:[#allocation33_spill] sm:$0xff]  ;;  %v8214_v41 = vld [vmem:[#allocation20_spill] sm:$0xff] }
 0x375   : > { %v3871_v56 = vpop.f32.mrf.mxu0  ;;  %v4200_v9 = vmul.f32 %v8154_v60, %v4150_v21  ;;  %v3759_v53 = vadd.f32 %v8193_v18, %v3592_v22  ;;  %v4151_v32 = vmax.f32 %v4119_v13, 0.0  ;;  %v3595_v34 = vadd.f32 %v8199_v61, %v8198_v15  ;;  %v8204_v51 = vld [vmem:[#allocation19_spill] sm:$0xff] }
 0x376   : > { %v4152_v52 = vmax.f32 %v4120_v7, 0.0  ;;  %v4090_v31 = vadd.f32 %v7479_v37, %v3923_v10  ;;  %v3924_v4 = vadd.f32 %v3871_v56, %v3757_v38  ;;  %v4121_v23 = vadd.f32 %v4089_v1, %v8194_v62  ;;  %2652 = vadd.xlane.f32.xlu0 %v8195_v44  ;;  %4241 = vadd.xlane.f32.xlu1 %v4240_v28  ;;  %v8205_v7 = vld [vmem:[#allocation28_spill] sm:$0xff]  ;;  %v8207_v10 = vld [vmem:[#allocation77_spill] sm:$0xff]  ;;  %v4058_v28 = vpop.f32.mrf.mxu1  ;;  %v8216_v15 = vld [vmem:[#allocation11_spill] sm:$0xff] }
 0x377   : > { %v3873_v45 = vpop.f32.mrf.mxu0  ;;  %v4243_v46 = vsel %vm2597_vm0, %v4200_v9, 0.0  ;;  %v3760_v17 = vadd.f32 %v8200_v54, %v3593_v2  ;;  %v3596_v30 = vadd.f32 %v8202_v5, %v8201_v57  ;;  %v4201_v13 = vmul.f32 %v7488_v47, %v4151_v32  ;;  %v8212_v44 = vld [vmem:[#allocation41_spill] sm:$0xff] }
 0x378   : > { %v4122_v20 = vadd.f32 %v4090_v31, %v8194_v62  ;;  %v4091_v37 = vadd.f32 %v7497_v36, %v3924_v4  ;;  %v3925_v11 = vadd.f32 %v3873_v45, %v3758_v40  ;;  %v4244_v3 = vadd.f32 %v4243_v46, %v4199_v16  ;;  %v8210_v4 = vld [vmem:[#allocation13_spill] sm:$0xff]  ;;  %v8213_v45 = vld [vmem:[#allocation78_spill] sm:$0xff] }
 0x379   : > { %v3877_v59 = vpop.f32.mrf.mxu0  ;;  %v4202_v27 = vmul.f32 %v8154_v60, %v4152_v52  ;;  %v4153_v36 = vmax.f32 %v4121_v23, 0.0  ;;  %v3761_v1 = vadd.f32 %v8205_v7, %v3594_v63  ;;  %v3762_v2 = vadd.f32 %v8208_v29, %v3595_v34  ;;  %v8209_v52 = vld [vmem:[#allocation18_spill] sm:$0xff]  ;;  %v8215_v63 = vld [vmem:[#allocation80_spill] sm:$0xff]  ;;  %v4060_v34 = vpop.f32.mrf.mxu1  ;;  %v8218_v54 = vld [vmem:[#allocation81_spill] sm:$0xff] }
 0x37a   : > { %v4154_v58 = vmax.f32 %v4122_v20, 0.0  ;;  %v4092_v22 = vadd.f32 %v7512_v50, %v3925_v11  ;;  %v3926_v21 = vadd.f32 %v3877_v59, %v3759_v53  ;;  %v4123_v26 = vadd.f32 %v4091_v37, %v8203_v35  ;;  %2656 = vadd.xlane.f32.xlu0 %v8204_v51  ;;  %4245 = vadd.xlane.f32.xlu1 %v4244_v3  ;;  %v8206_v50 = vld [vmem:[#allocation61_spill] sm:$0xff]  ;;  %v8211_v53 = vld [vmem:[#allocation42_spill] sm:$0xff] }
 0x37b   : > { %v3879_v12 = vpop.f32.mrf.mxu0  ;;  %v4247_v43 = vsel %vm2597_vm0, %v4202_v27, 0.0  ;;  %v3597_v25 = vadd.f32 %v8207_v10, %v8206_v50  ;;  %v3763_v31 = vadd.f32 %v8209_v52, %v3596_v30  ;;  %v4203_v62 = vmul.f32 %v7488_v47, %v4153_v36  ;;  %v8217_v3 = vld [vmem:[#allocation5_spill] sm:$0xff]  ;;  %v4064_v7 = vpop.f32.mrf.mxu1 }
 0x37c   : > { %v4124_v49 = vadd.f32 %v4092_v22, %v8203_v35  ;;  %v4093_v24 = vadd.f32 %v7527_v48, %v3926_v21  ;;  %v3927_v14 = vadd.f32 %v3879_v12, %v3760_v17  ;;  %v4248_v55 = vadd.f32 %v4247_v43, %v4201_v13  ;;  %v8220_v12 = vld [vmem:[#allocation43_spill] sm:$0xff]  ;;  %v8221_v43 = vld [vmem:[#allocation21_spill] sm:$0xff] }
 0x37d   : > { %v3881_v38 = vpop.f32.mrf.mxu0  ;;  %v4204_v56 = vmul.f32 %v8154_v60, %v4154_v58  ;;  %v4155_v48 = vmax.f32 %v4123_v26, 0.0  ;;  %v3598_v16 = vadd.f32 %v8213_v45, %v8212_v44  ;;  %v3599_v20 = vadd.f32 %v8215_v63, %v8214_v41  ;;  %v8224_v29 = vld [vmem:[#allocation45_spill] sm:$0xff]  ;;  %v4066_v44 = vpop.f32.mrf.mxu1  ;;  %v8231_v63 = vld [vmem:[#allocation16_spill] sm:$0xff] }
 0x37e   : > { %v4156_v42 = vmax.f32 %v4124_v49, 0.0  ;;  %v4094_v40 = vadd.f32 %v7543_v0, %v3927_v14  ;;  %v3928_v9 = vadd.f32 %v3881_v38, %v3761_v1  ;;  %v4125_v18 = vadd.f32 %v4093_v24, %v8210_v4  ;;  %2660 = vadd.xlane.f32.xlu0 %v8211_v53  ;;  %4249 = vadd.xlane.f32.xlu1 %v4248_v55  ;;  %v8222_v49 = vld [vmem:[#allocation83_spill] sm:$0xff]  ;;  %v8223_v1 = vld [vmem:[#allocation44_spill] sm:$0xff] }
 0x37f   : > { %v3883_v32 = vpop.f32.mrf.mxu0  ;;  %v4251_v23 = vsel %vm2597_vm0, %v4204_v56, 0.0  ;;  %v3764_v61 = vadd.f32 %v8216_v15, %v3597_v25  ;;  %v3600_v17 = vadd.f32 %v8218_v54, %v8217_v3  ;;  %v4205_v21 = vmul.f32 %v7488_v47, %v4155_v48  ;;  %v8225_v56 = vld [vmem:[#allocation34_spill] sm:$0xff]  ;;  %v8227_v48 = vld [vmem:[#allocation84_spill] sm:$0xff] }
 0x380   : > { %v4126_v46 = vadd.f32 %v4094_v40, %v8210_v4  ;;  %v4095_v0 = vadd.f32 %v7559_v19, %v3928_v9  ;;  %v3929_v6 = vadd.f32 %v3883_v32, %v3762_v2  ;;  %v4252_v11 = vadd.f32 %v4251_v23, %v4203_v62  ;;  %v8219_v19 = vld [vmem:[#allocation15_spill] sm:$0xff]  ;;  %v8229_v62 = vld [vmem:[#allocation86_spill] sm:$0xff] }
 0x381   : > { %v3887_v37 = vpop.f32.mrf.mxu0  ;;  %v4206_v59 = vmul.f32 %v8154_v60, %v4156_v42  ;;  %v4157_v30 = vmax.f32 %v4125_v18, 0.0  ;;  %v3765_v13 = vadd.f32 %v8220_v12, %v3598_v16  ;;  %v3766_v50 = vadd.f32 %v8223_v1, %v3599_v20 }
 0x382   : > { %v4158_v27 = vmax.f32 %v4126_v46, 0.0  ;;  %v4096_v57 = vadd.f32 %v7575_v8, %v3929_v6  ;;  %v3930_v5 = vadd.f32 %v3887_v37, %v3763_v31  ;;  %v4127_v58 = vadd.f32 %v4095_v0, %v8219_v19  ;;  %4253 = vadd.xlane.f32.xlu1 %v4252_v11  ;;  %v8226_v31 = vld [vmem:[#allocation46_spill] sm:$0xff] }
 0x383   : > { %v3889_v22 = vpop.f32.mrf.mxu0  ;;  %v4255_v36 = vsel %vm2597_vm0, %v4206_v59, 0.0  ;;  %v3601_v8 = vadd.f32 %v8222_v49, %v8221_v43  ;;  %v3767_v2 = vadd.f32 %v8224_v29, %v3600_v17  ;;  %v4207_v9 = vmul.f32 %v7488_v47, %v4157_v30  ;;  %v8230_v46 = vld [vmem:[#allocation22_spill] sm:$0xff]  ;;  %v4068_v30 = vpop.f32.mrf.mxu1 }
 0x384   : > { %v4128_v35 = vadd.f32 %v4096_v57, %v8219_v19  ;;  %v4097_v26 = vadd.f32 %v7591_v33, %v3930_v5  ;;  %v3931_v51 = vadd.f32 %v3889_v22, %v3764_v61  ;;  %v4256_v14 = vadd.f32 %v4255_v36, %v4205_v21  ;;  %v8233_v22 = vld [vmem:[#allocation63_spill] sm:$0xff] }
 0x385   : > { %v3891_v24 = vpop.f32.mrf.mxu0  ;;  %v4208_v10 = vmul.f32 %v8154_v60, %v4158_v27  ;;  %v4159_v33 = vmax.f32 %v4127_v58, 0.0  ;;  %v3602_v4 = vadd.f32 %v8227_v48, %v8226_v31  ;;  %v3768_v0 = vadd.f32 %v8230_v46, %v3601_v8  ;;  %v8232_v27 = vld [vmem:[#allocation48_spill] sm:$0xff]  ;;  %v4070_v1 = vpop.f32.mrf.mxu1 }
 0x386   : > { %v4160_v25 = vmax.f32 %v4128_v35, 0.0  ;;  %v4098_v38 = vadd.f32 %v7607_v39, %v3931_v51  ;;  %v3932_v55 = vadd.f32 %v3891_v24, %v3765_v13  ;;  %v4129_v42 = vadd.f32 %v4097_v26, %v8225_v56  ;;  %4257 = vadd.xlane.f32.xlu1 %v4256_v14  ;;  %v8228_v39 = vld [vmem:[#allocation47_spill] sm:$0xff]  ;;  %v8234_v35 = vld [vmem:[#allocation37_spill] sm:$0xff]  ;;  %v2601_v46 = vpop.xlane.xlu1 %2600 }
 0x387   : > { %v3893_v40 = vpop.f32.mrf.mxu0  ;;  %v4259_v52 = vsel %vm2597_vm0, %v4208_v10, 0.0  ;;  %v3603_v23 = vadd.f32 %v8229_v62, %v8228_v39  ;;  %v3769_v57 = vadd.f32 %v8232_v27, %v3602_v4  ;;  %v2605_v62 = vpop.xlane.xlu0 %2604  ;;  %v4299_v27 = vld [vmem:[%s7759_s4] sm:$0xff] }
 0x388   : > { %v4130_v18 = vadd.f32 %v4098_v38, %v8225_v56  ;;  %v4099_v53 = vadd.f32 %v4058_v28, %v3932_v55  ;;  %v3933_v32 = vadd.f32 %v3893_v40, %v3766_v50  ;;  %v4260_v16 = vadd.f32 %v4259_v52, %v4207_v9  ;;  %v8235_v38 = vld [vmem:[#allocation4_spill] sm:$0xff] }
 0x389   : > { %v3897_v45 = vpop.f32.mrf.mxu0  ;;  %v4210_v6 = vmul.f32 %v8154_v60, %v4160_v25  ;;  %v4161_v15 = vmax.f32 %v4129_v42, 0.0  ;;  %v4209_v28 = vmul.f32 %v7488_v47, %v4159_v33 }
 0x38a   : > { %v4162_v41 = vmax.f32 %v4130_v18, 0.0  ;;  %v4131_v20 = vadd.f32 %v4099_v53, %v8231_v63  ;;  %v4100_v37 = vadd.f32 %v4060_v34, %v3933_v32  ;;  %v3934_v11 = vadd.f32 %v3897_v45, %v3767_v2  ;;  %4261 = vadd.xlane.f32.xlu1 %v4260_v16 }
 0x38b   : > { %v3899_v61 = vpop.f32.mrf.mxu0  ;;  %v4263_v59 = vsel %vm2597_vm0, %v4210_v6, 0.0  ;;  %v3770_v34 = vadd.f32 %v8233_v22, %v3603_v23  ;;  %v4211_v43 = vmul.f32 %v7488_v47, %v4161_v15  ;;  %v2609_v23 = vpop.xlane.xlu0 %2608 }
 0x38c   : > { %v4132_v3 = vadd.f32 %v4100_v37, %v8231_v63  ;;  %v4101_v54 = vadd.f32 %v4064_v7, %v3934_v11  ;;  %v3935_v17 = vadd.f32 %v3899_v61, %v3768_v0  ;;  %v4163_v5 = vmax.f32 %v4131_v20, 0.0 }
 0x38d   : > { %v3901_v19 = vpop.f32.mrf.mxu0  ;;  %v4264_v58 = vadd.f32 %v4263_v59, %v4209_v28  ;;  %v4212_v21 = vmul.f32 %v8154_v60, %v4162_v41  ;;  %v4300_v59 = vld [vmem:[%s7759_s4 + $0x8] sm:$0xff] }
 0x38e   : > { %v4164_v36 = vmax.f32 %v4132_v3, 0.0  ;;  %v4133_v26 = vadd.f32 %v4101_v54, %v8234_v35  ;;  %v4102_v51 = vadd.f32 %v4066_v44, %v3935_v17  ;;  %v3936_v12 = vadd.f32 %v3901_v19, %v3769_v57 }
 0x38f   : > { %4265 = vadd.xlane.f32.xlu1 %v4264_v58  ;;  %v3903_v13 = vpop.f32.mrf.mxu0  ;;  %v4267_v49 = vsel %vm2597_vm0, %v4212_v21, 0.0  ;;  %v4213_v2 = vmul.f32 %v7488_v47, %v4163_v5  ;;  %v2613_v44 = vpop.xlane.xlu0 %2612  ;;  %v4301_v5 = vld [vmem:[%s7759_s4 + $0x10] sm:$0xff]  ;;  %v4302_v58 = vld [vmem:[%s7759_s4 + $0x18] sm:$0xff] }
 0x390   : > { %v4134_v8 = vadd.f32 %v4102_v51, %v8234_v35  ;;  %v4103_v24 = vadd.f32 %v4068_v30, %v3936_v12  ;;  %v3937_v14 = vadd.f32 %v3903_v13, %v3770_v34  ;;  %v4165_v7 = vmax.f32 %v4133_v26, 0.0  ;;  %v4303_v35 = vld [vmem:[%s7759_s4 + $0x20] sm:$0xff] }
 0x391   : > { %v4268_v50 = vadd.f32 %v4267_v49, %v4211_v43  ;;  %v4214_v10 = vmul.f32 %v8154_v60, %v4164_v36  ;;  %v4304_v43 = vld [vmem:[%s7759_s4 + $0x28] sm:$0xff] }
 0x392   : > { %v4166_v25 = vmax.f32 %v4134_v8, 0.0  ;;  %v4135_v55 = vadd.f32 %v4103_v24, %v8235_v38  ;;  %v4104_v29 = vadd.f32 %v4070_v1, %v3937_v14  ;;  %v4215_v52 = vmul.f32 %v7488_v47, %v4165_v7 }
 0x393   : > { %4269 = vadd.xlane.f32.xlu1 %v4268_v50  ;;  %v4271_v33 = vsel %vm2597_vm0, %v4214_v10, 0.0  ;;  %v2617_v45 = vpop.xlane.xlu0 %2616  ;;  %v4305_v50 = vld [vmem:[%s7759_s4 + $0x30] sm:$0xff] }
 0x394   : > { %v4136_v56 = vadd.f32 %v4104_v29, %v8235_v38  ;;  %v4272_v42 = vadd.f32 %v4271_v33, %v4213_v2  ;;  %v4216_v40 = vmul.f32 %v8154_v60, %v4166_v25  ;;  %v4167_v9 = vmax.f32 %v4135_v55, 0.0  ;;  %v4306_v29 = vld [vmem:[%s7759_s4 + $0x38] sm:$0xff] }
 0x396   : > { %v4168_v31 = vmax.f32 %v4136_v56, 0.0  ;;  %v4275_v48 = vsel %vm2597_vm0, %v4216_v40, 0.0  ;;  %v4217_v53 = vmul.f32 %v7488_v47, %v4167_v9 }
 0x397   : > { %4273 = vadd.xlane.f32.xlu1 %v4272_v42  ;;  %v4276_v4 = vadd.f32 %v4275_v48, %v4215_v52  ;;  %v2621_v16 = vpop.xlane.xlu0 %2620  ;;  %v4307_v52 = vld [vmem:[%s7759_s4 + $0x40] sm:$0xff] }
 0x398   : > { %v4218_v18 = vmul.f32 %v8154_v60, %v4168_v31 }
 0x39a   : > { %v4279_v32 = vsel %vm2597_vm0, %v4218_v18, 0.0 }
 0x39b   : > { %4277 = vadd.xlane.f32.xlu1 %v4276_v4  ;;  %v4280_v39 = vadd.f32 %v4279_v32, %v4217_v53  ;;  %v2625_v0 = vpop.xlane.xlu0 %2624  ;;  %v4308_v53 = vld [vmem:[%s7759_s4 + $0x48] sm:$0xff] }
 0x39f   : > { %4281 = vadd.xlane.f32.xlu1 %v4280_v39  ;;  %v2629_v41 = vpop.xlane.xlu0 %2628 }
 0x3a3   : > { %v2633_v37 = vpop.xlane.xlu0 %2632 }
 0x3eb   : > { %v4222_v11 = vpop.xlane.xlu0 %4221 }
 0x3ec   : > { %v4283_v54 = vadd.f32 %v4222_v11, %v2601_v46 }
 0x3ee   : > { %v4315_v34 = vmul.f32 %v4299_v27, %v4283_v54 }
 0x3ef   : > { %v4226_v6 = vpop.xlane.xlu1 %4225  ;;  %v2637_v15 = vpop.xlane.xlu0 %2636 }
 0x3f0   : > { %v4284_v28 = vadd.f32 %v4226_v6, %v2605_v62  ;;  %v4332_v8 = vsel %vm4331_vm1, %v4315_v34, 0.0  ;;  %v4313_v34 = vld [vmem:[%s7759_s4 + $0x70] sm:$0xff] }
 0x3f2   : > { %v4316_v30 = vmul.f32 %v4300_v59, %v4284_v28 }
 0x3f3   : > { %v4230_v63 = vpop.xlane.xlu1 %4229  ;;  %v2641_v57 = vpop.xlane.xlu0 %2640 }
 0x3f4   : > { %v4285_v17 = vadd.f32 %v4230_v63, %v2609_v23  ;;  %v4333_v26 = vsel %vm4331_vm1, %v4316_v30, 0.0  ;;  %v4310_v63 = vld [vmem:[%s7759_s4 + $0x58] sm:$0xff] }
 0x3f5   : > { %v4334_v1 = vadd.f32 %v4333_v26, %v4332_v8 }
 0x3f6   : > { %v4317_v21 = vmul.f32 %v4301_v5, %v4285_v17 }
 0x3f7   : > { %v4234_v20 = vpop.xlane.xlu1 %4233  ;;  %v2645_v13 = vpop.xlane.xlu0 %2644 }
 0x3f8   : > { %v4286_v19 = vadd.f32 %v4234_v20, %v2613_v44  ;;  %v4335_v24 = vsel %vm4331_vm1, %v4317_v21, 0.0 }
 0x3f9   : > { %v4336_v55 = vadd.f32 %v4335_v24, %v4334_v1 }
 0x3fa   : > { %v4318_v51 = vmul.f32 %v4302_v58, %v4286_v19 }
 0x3fb   : > { %v4238_v60 = vpop.xlane.xlu1 %4237  ;;  %v2649_v9 = vpop.xlane.xlu0 %2648 }
 0x3fc   : > { %v4287_v36 = vadd.f32 %v4238_v60, %v2617_v45  ;;  %v4337_v10 = vsel %vm4331_vm1, %v4318_v51, 0.0  ;;  %v4309_v45 = vld [vmem:[%s7759_s4 + $0x50] sm:$0xff] }
 0x3fd   : > { %v4338_v40 = vadd.f32 %v4337_v10, %v4336_v55 }
 0x3fe   : > { %v4319_v14 = vmul.f32 %v4303_v35, %v4287_v36 }
 0x3ff   : > { %v4242_v47 = vpop.xlane.xlu1 %4241  ;;  %v2653_v6 = vpop.xlane.xlu0 %2652 }
 0x400   : > { %v4288_v12 = vadd.f32 %v4242_v47, %v2621_v16  ;;  %v4339_v33 = vsel %vm4331_vm1, %v4319_v14, 0.0 }
 0x401   : > { %v4340_v18 = vadd.f32 %v4339_v33, %v4338_v40 }
 0x402   : > { %v4320_v25 = vmul.f32 %v4304_v43, %v4288_v12 }
 0x403   : > { %v4246_v61 = vpop.xlane.xlu1 %4245  ;;  %v2657_v5 = vpop.xlane.xlu0 %2656 }
 0x404   : > { %v4289_v7 = vadd.f32 %v4246_v61, %v2625_v0  ;;  %v4341_v31 = vsel %vm4331_vm1, %v4320_v25, 0.0 }
 0x405   : > { %v4342_v44 = vadd.f32 %v4341_v31, %v4340_v18 }
 0x406   : > { %v4321_v56 = vmul.f32 %v4305_v50, %v4289_v7 }
 0x407   : > { %v4250_v3 = vpop.xlane.xlu1 %4249 }
 0x408   : > { %v4290_v38 = vadd.f32 %v4250_v3, %v2629_v41  ;;  %v4343_v39 = vsel %vm4331_vm1, %v4321_v56, 0.0  ;;  %v4312_v3 = vld [vmem:[%s7759_s4 + $0x68] sm:$0xff]  ;;  %v4369_v56 = vld [vmem:[#allocation2] sm:$0x1] }
 0x409   : > { %v4344_v41 = vadd.f32 %v4343_v39, %v4342_v44 }
 0x40a   : > { %v4322_v48 = vmul.f32 %v4306_v29, %v4290_v38 }
 0x40b   : > { %v4254_v22 = vpop.xlane.xlu1 %4253 }
 0x40c   : > { %v4291_v42 = vadd.f32 %v4254_v22, %v2633_v37  ;;  %v4345_v16 = vsel %vm4331_vm1, %v4322_v48, 0.0 }
 0x40d   : > { %v4346_v47 = vadd.f32 %v4345_v16, %v4344_v41 }
 0x40e   : > { %v4323_v62 = vmul.f32 %v4307_v52, %v4291_v42 }
 0x40f   : > { %v4258_v49 = vpop.xlane.xlu1 %4257 }
 0x410   : > { %v4292_v4 = vadd.f32 %v4258_v49, %v2637_v15  ;;  %v4347_v37 = vsel %vm4331_vm1, %v4323_v62, 0.0  ;;  %v4311_v15 = vld [vmem:[%s7759_s4 + $0x60] sm:$0xff]  ;;  %v4314_v49 = vld [vmem:[%s7759_s4 + $0x78] sm:$0xff] }
 0x411   : > { %v4348_v59 = vadd.f32 %v4347_v37, %v4346_v47 }
 0x412   : > { %v4324_v46 = vmul.f32 %v4308_v53, %v4292_v4 }
 0x413   : > { %v4262_v2 = vpop.xlane.xlu1 %4261 }
 0x414   : > { %v4293_v23 = vadd.f32 %v4262_v2, %v2641_v57  ;;  %v4349_v61 = vsel %vm4331_vm1, %v4324_v46, 0.0 }
 0x415   : > { %v4350_v30 = vadd.f32 %v4349_v61, %v4348_v59 }
 0x416   : > { %v4325_v60 = vmul.f32 %v4309_v45, %v4293_v23 }
 0x418   : > { %v4266_v32 = vpop.xlane.xlu1 %4265  ;;  %v4351_v17 = vsel %vm4331_vm1, %v4325_v60, 0.0 }
 0x419   : > { %v4294_v0 = vadd.f32 %v4266_v32, %v2645_v13  ;;  %v4352_v22 = vadd.f32 %v4351_v17, %v4350_v30  ;;  %v2661_v13 = vpop.xlane.xlu0 %2660 }
 0x41b   : > { %v4326_v28 = vmul.f32 %v4310_v63, %v4294_v0 }
 0x41c   : > { %v4270_v20 = vpop.xlane.xlu1 %4269 }
 0x41d   : > { %v4295_v11 = vadd.f32 %v4270_v20, %v2649_v9  ;;  %v4353_v19 = vsel %vm4331_vm1, %v4326_v28, 0.0 }
 0x41e   : > { %v4354_v26 = vadd.f32 %v4353_v19, %v4352_v22 }
 0x41f   : > { %v4327_v27 = vmul.f32 %v4311_v15, %v4295_v11 }
 0x420   : > { %v4274_v54 = vpop.xlane.xlu1 %4273 }
 0x421   : > { %v4296_v57 = vadd.f32 %v4274_v54, %v2653_v6  ;;  %v4355_v36 = vsel %vm4331_vm1, %v4327_v27, 0.0 }
 0x422   : > { %v4356_v43 = vadd.f32 %v4355_v36, %v4354_v26 }
 0x423   : > { %v4328_v58 = vmul.f32 %v4312_v3, %v4296_v57 }
 0x424   : > { %v4278_v21 = vpop.xlane.xlu1 %4277 }
 0x425   : > { %v4297_v35 = vadd.f32 %v4278_v21, %v2657_v5  ;;  %v4357_v51 = vsel %vm4331_vm1, %v4328_v58, 0.0 }
 0x426   : > { %v4358_v7 = vadd.f32 %v4357_v51, %v4356_v43 }
 0x427   : > { %v4329_v12 = vmul.f32 %v4313_v34, %v4297_v35 }
 0x428   : > { %v4282_v8 = vpop.xlane.xlu1 %4281 }
 0x429   : > { %v4359_v24 = vsel %vm4331_vm1, %v4329_v12, 0.0  ;;  %v4298_v14 = vadd.f32 %v4282_v8, %v2661_v13 }
 0x42a   : > { %v4360_v50 = vadd.f32 %v4359_v24, %v4358_v7 }
 0x42b   : > { %v4330_v1 = vmul.f32 %v4314_v49, %v4298_v14 }
 0x42d   : > { %v4361_v10 = vsel %vm4331_vm1, %v4330_v1, 0.0 }
 0x42e   : > { %v4362_v25 = vadd.f32 %v4361_v10, %v4360_v50 }
 0x430   : > { %v4363_v38 = vrot.slane %v4362_v25, 4 }
 0x432   : > { %v4364_v55 = vadd.f32 %v4363_v38, %v4362_v25 }
 0x434   : > { %v4365_v29 = vrot.slane %v4364_v55, 2 }
 0x436   : > { %v4366_v2 = vadd.f32 %v4365_v29, %v4364_v55 }
 0x438   : > { %v4367_v33 = vrot.slane %v4366_v2, 1 }
 0x43a   : > { %v4368_v42 = vadd.f32 %v4367_v33, %v4366_v2 }
 0x43c   : > { %v4370_v40 = vadd.f32 %v4369_v56, %v4368_v42 }
 0x43e   : > { %4373 = vst.msk [vmem:[%s4371_s30] sm:$0x1] %vm4372_vm3, %v4370_v40 }
 0x43f PF: > { %s18_s23 = sadd.s32 1, %s4945_s23  }
 0x440   : > { %p15_p4 = scmp.ge.s32.totalorder %s18_s23, 4  }
 0x442   :  { %17 = sbr.rel (!%p15_p4) target bundleno = 3 (0x3), region = 79 }

</bundles_post_ra>
